<compile_context>
chip_gen: v7x
topology: tpu7x:2x2x1
jax: 0.10.0
libtpu: 0.0.40
codegen_flags: <defaults>
</compile_context>

<pallas_src>
import jax
import jax.numpy as jnp
from jax.experimental import pallas as pl
from jax.experimental.pallas import tpu as pltpu

LANE = 128
SUBLANE = 8


# ------------------------------ fused kernel ---------------------------------
def _fused_lstm_mlp_kernel(x_ref, wih1_ref, whh1_ref, b1_ref,
                           wih2_ref, whh2_ref, b2_ref,
                           w1_ref, bf1_ref, w2_ref, bf2_ref,
                           out_ref):
    # Shapes (all static at trace time):
    #   x_ref:    (T*Bp, D)     time-major, batch padded to a sublane multiple
    #   whh*_ref: (H, 4H)
    #   out_ref:  (Bp, O_pad)   O_pad multiple of 128 (lane-dense unmasked store)
    TB = x_ref.shape[0]
    B = out_ref.shape[0]            # padded batch (sublane multiple)
    T = TB // B
    H = whh1_ref.shape[0]

    def cell(gates, c_prev):
        i = jax.nn.sigmoid(gates[:, 0 * H:1 * H])
        f = jax.nn.sigmoid(gates[:, 1 * H:2 * H])
        g = jnp.tanh(gates[:, 2 * H:3 * H])
        o = jax.nn.sigmoid(gates[:, 3 * H:4 * H])
        c_new = f * c_prev + i * g
        h_new = o * jnp.tanh(c_new)
        return h_new, c_new

    # Hoisted loads (don't re-read refs inside the unrolled loops).
    whh1 = whh1_ref[...]
    wih2 = wih2_ref[...]
    whh2 = whh2_ref[...]
    b2 = b2_ref[...]

    # ---- layer 1: hoisted input projection (one matmul for all timesteps) ----
    g1 = (jnp.dot(x_ref[...], wih1_ref[...], preferred_element_type=jnp.float32)
          + b1_ref[...])                                   # (T*Bp, 4H)

    h1 = jnp.zeros((B, H), jnp.float32)
    c1 = jnp.zeros((B, H), jnp.float32)
    g2_steps = []
    for t in range(T):                                     # trace-time unrolled (T small)
        gates = g1[t * B:(t + 1) * B, :] + jnp.dot(
            h1, whh1, preferred_element_type=jnp.float32)
        h1, c1 = cell(gates, c1)
        # Layer-2 input projection for step t.  Depends only on h1_t, so it is
        # off the layer-1 serial chain and the scheduler can hide it under the
        # recurrence latency; nothing is written back to VMEM/HBM here.
        g2_steps.append(jnp.dot(h1, wih2, preferred_element_type=jnp.float32) + b2)

    # ---- layer 2 recurrence (inputs already projected per step above) ----
    h2 = jnp.zeros((B, H), jnp.float32)
    c2 = jnp.zeros((B, H), jnp.float32)
    for t in range(T):
        gates = g2_steps[t] + jnp.dot(h2, whh2, preferred_element_type=jnp.float32)
        h2, c2 = cell(gates, c2)
    # Only the final hidden state is consumed; the (T,B,H) sequences never
    # touch HBM.

    # ---- fused MLP head: fc1 -> ReLU -> fc2 (fc2 padded to 128 lanes) ----
    z = jnp.maximum(
        jnp.dot(h2, w1_ref[...], preferred_element_type=jnp.float32) + bf1_ref[...], 0.0)
    y = jnp.dot(z, w2_ref[...], preferred_element_type=jnp.float32) + bf2_ref[...]
    out_ref[...] = y.astype(out_ref.dtype)


# ----------------------------- parameters / glue ------------------------------
def init_params(key, input_size, hidden_size, fc_size, output_size, num_layers):
    params = {}
    keys = jax.random.split(key, 4 * num_layers + 4)
    idx = 0
    k_lstm = 1.0 / float(hidden_size) ** 0.5
    lstm = []
    for layer in range(num_layers):
        d_in = input_size if layer == 0 else hidden_size
        w_ih = jax.random.uniform(keys[idx], (4 * hidden_size, d_in), jnp.float32, -k_lstm, k_lstm); idx += 1
        w_hh = jax.random.uniform(keys[idx], (4 * hidden_size, hidden_size), jnp.float32, -k_lstm, k_lstm); idx += 1
        b_ih = jax.random.uniform(keys[idx], (4 * hidden_size,), jnp.float32, -k_lstm, k_lstm); idx += 1
        b_hh = jax.random.uniform(keys[idx], (4 * hidden_size,), jnp.float32, -k_lstm, k_lstm); idx += 1
        lstm.append((w_ih, w_hh, b_ih, b_hh))
    params["lstm"] = lstm
    k1 = 1.0 / float(hidden_size) ** 0.5
    params["fc1_w"] = jax.random.uniform(keys[idx], (fc_size, hidden_size), jnp.float32, -k1, k1); idx += 1
    params["fc1_b"] = jax.random.uniform(keys[idx], (fc_size,), jnp.float32, -k1, k1); idx += 1
    k2 = 1.0 / float(fc_size) ** 0.5
    params["fc2_w"] = jax.random.uniform(keys[idx], (output_size, fc_size), jnp.float32, -k2, k2); idx += 1
    params["fc2_b"] = jax.random.uniform(keys[idx], (output_size,), jnp.float32, -k2, k2); idx += 1
    return params


def prepare_params(params):
    """One-time conversion to kernel-ready layout (transposes, fused biases,
    lane-padded fc2).  Do this once and reuse across forwards."""
    assert len(params["lstm"]) == 2, "fused kernel implements the 2-layer module"
    (w_ih1, w_hh1, b_ih1, b_hh1), (w_ih2, w_hh2, b_ih2, b_hh2) = params["lstm"]
    H = w_hh1.shape[1]
    F = params["fc1_w"].shape[0]
    O = params["fc2_w"].shape[0]
    o_pad = ((O + LANE - 1) // LANE) * LANE

    w2_t = params["fc2_w"].T.astype(jnp.float32)                     # (F, O)
    w2_pad = jnp.zeros((F, o_pad), jnp.float32).at[:, :O].set(w2_t)  # lane-dense
    b2_pad = jnp.zeros((1, o_pad), jnp.float32).at[0, :O].set(
        params["fc2_b"].astype(jnp.float32))

    return {
        "wih1_t": w_ih1.T.astype(jnp.float32),                       # (D, 4H)
        "whh1_t": w_hh1.T.astype(jnp.float32),                       # (H, 4H)
        "b1": (b_ih1 + b_hh1).reshape(1, 4 * H).astype(jnp.float32),
        "wih2_t": w_ih2.T.astype(jnp.float32),                       # (H, 4H)
        "whh2_t": w_hh2.T.astype(jnp.float32),                       # (H, 4H)
        "b2": (b_ih2 + b_hh2).reshape(1, 4 * H).astype(jnp.float32),
        "w1_t": params["fc1_w"].T.astype(jnp.float32),               # (H, F)
        "bf1": params["fc1_b"].reshape(1, F).astype(jnp.float32),
        "w2_t": w2_pad,                                              # (F, O_pad)
        "bf2": b2_pad,                                               # (1, O_pad)
        "out_features": O,                                           # python int
    }


def lstm_forward(prepared, x_btd):
    """x_btd: (B, T, D) batch-first. Returns (B, output_size)."""
    B, T, D = x_btd.shape
    o_pad = prepared["w2_t"].shape[1]
    b_pad = ((B + SUBLANE - 1) // SUBLANE) * SUBLANE
    # batch-first -> time-major, batch padded to a sublane multiple so every
    # per-timestep row slice inside the kernel is tile-aligned.  Padded rows
    # are zeros, compute independently, and are discarded below.
    x_tm = jnp.transpose(x_btd, (1, 0, 2)).astype(jnp.float32)            # (T, B, D)
    x_pad = jnp.zeros((T, b_pad, D), jnp.float32).at[:, :B, :].set(x_tm)
    x2d = x_pad.reshape(T * b_pad, D)

    y_pad = pl.pallas_call(
        _fused_lstm_mlp_kernel,
        out_shape=jax.ShapeDtypeStruct((b_pad, o_pad), jnp.float32),
    )(x2d,
      prepared["wih1_t"], prepared["whh1_t"], prepared["b1"],
      prepared["wih2_t"], prepared["whh2_t"], prepared["b2"],
      prepared["w1_t"], prepared["bf1"], prepared["w2_t"], prepared["bf2"])

    return y_pad[:B, :prepared["out_features"]]


# ------------------------------ pure-JAX reference ---------------------------
def reference_forward(params, x_btd):
    x = jnp.transpose(x_btd, (1, 0, 2))
    for (w_ih, w_hh, b_ih, b_hh) in params["lstm"]:
        T, B, _ = x.shape
        H = w_hh.shape[1]
        h = jnp.zeros((B, H), jnp.float32)
        c = jnp.zeros((B, H), jnp.float32)
        outs = []
        for t in range(T):
            gates = x[t] @ w_ih.T + h @ w_hh.T + b_ih + b_hh
            i = jax.nn.sigmoid(gates[:, :H])
            f = jax.nn.sigmoid(gates[:, H:2 * H])
            g = jnp.tanh(gates[:, 2 * H:3 * H])
            o = jax.nn.sigmoid(gates[:, 3 * H:4 * H])
            c = f * c + i * g
            h = o * jnp.tanh(c)
            outs.append(h)
        x = jnp.stack(outs, axis=0)
    last = x[-1]
    z = jnp.maximum(last @ params["fc1_w"].T + params["fc1_b"], 0.0)
    return z @ params["fc2_w"].T + params["fc2_b"]


if __name__ == "__main__":
    B, T, D = 2, 8, 16          # batch, seq, input_size
    H, F, O = 128, 128, 10      # hidden_size, fc_size, output_size
    key = jax.random.PRNGKey(0)
    pkey, xkey = jax.random.split(key)
    params = init_params(pkey, D, H, F, O, num_layers=2)
    prepared = prepare_params(params)   # one-time kernel-ready weight layout
    x = jax.random.normal(xkey, (B, T, D), jnp.float32)

    out = jax.block_until_ready(lstm_forward(prepared, x))
    ref = jax.block_until_ready(reference_forward(params, x))

    assert out.shape == (B, O), out.shape
    assert jnp.allclose(out, ref, atol=1e-4, rtol=1e-4), float(jnp.max(jnp.abs(out - ref)))
    print("KERNEL_OK")
</pallas_src>

<mosaic_0001>
module attributes {stable_mosaic.version = 11 : i64} {
  func.func @_fused_lstm_mlp_kernel(%arg0: memref<64x16xf32, #tpu.memory_space<vmem>>, %arg1: memref<16x512xf32, #tpu.memory_space<vmem>>, %arg2: memref<128x512xf32, #tpu.memory_space<vmem>>, %arg3: memref<1x512xf32, #tpu.memory_space<vmem>>, %arg4: memref<128x512xf32, #tpu.memory_space<vmem>>, %arg5: memref<128x512xf32, #tpu.memory_space<vmem>>, %arg6: memref<1x512xf32, #tpu.memory_space<vmem>>, %arg7: memref<128x128xf32, #tpu.memory_space<vmem>>, %arg8: memref<1x128xf32, #tpu.memory_space<vmem>>, %arg9: memref<128x128xf32, #tpu.memory_space<vmem>>, %arg10: memref<1x128xf32, #tpu.memory_space<vmem>>, %arg11: memref<8x128xf32, #tpu.memory_space<vmem>>) attributes {dimension_semantics = [], scalar_prefetch = 0 : i64, scratch_operands = 0 : i64, tpu.core_type = #tpu.core_type<tc>} {
    %c0 = arith.constant 0 : index
    %c0_0 = arith.constant 0 : index
    %0 = vector.load %arg2[%c0, %c0_0] : memref<128x512xf32, #tpu.memory_space<vmem>>, vector<128x512xf32>
    %c0_1 = arith.constant 0 : index
    %c0_2 = arith.constant 0 : index
    %1 = vector.load %arg4[%c0_1, %c0_2] : memref<128x512xf32, #tpu.memory_space<vmem>>, vector<128x512xf32>
    %c0_3 = arith.constant 0 : index
    %c0_4 = arith.constant 0 : index
    %2 = vector.load %arg5[%c0_3, %c0_4] : memref<128x512xf32, #tpu.memory_space<vmem>>, vector<128x512xf32>
    %c0_5 = arith.constant 0 : index
    %c0_6 = arith.constant 0 : index
    %3 = vector.load %arg6[%c0_5, %c0_6] : memref<1x512xf32, #tpu.memory_space<vmem>>, vector<1x512xf32>
    %c0_7 = arith.constant 0 : index
    %c0_8 = arith.constant 0 : index
    %4 = vector.load %arg0[%c0_7, %c0_8] : memref<64x16xf32, #tpu.memory_space<vmem>>, vector<64x16xf32>
    %c0_9 = arith.constant 0 : index
    %c0_10 = arith.constant 0 : index
    %5 = vector.load %arg1[%c0_9, %c0_10] : memref<16x512xf32, #tpu.memory_space<vmem>>, vector<16x512xf32>
    %cst = arith.constant dense<0.000000e+00> : vector<64x512xf32>
    %6 = tpu.matmul %4, %5, %cst {dimension_numbers = #tpu.dot_dimension_numbers<[1], [0], [0], [1], [0, 0, 1, 1], [], []>} : vector<64x16xf32>, vector<16x512xf32>, vector<64x512xf32> -> vector<64x512xf32>
    %c0_11 = arith.constant 0 : index
    %c0_12 = arith.constant 0 : index
    %7 = vector.load %arg3[%c0_11, %c0_12] : memref<1x512xf32, #tpu.memory_space<vmem>>, vector<1x512xf32>
    %8 = vector.broadcast %7 : vector<1x512xf32> to vector<64x512xf32>
    %9 = arith.addf %6, %8 : vector<64x512xf32>
    %cst_13 = arith.constant 0.000000e+00 : f32
    %10 = vector.broadcast %cst_13 : f32 to vector<8x128xf32>
    %cst_14 = arith.constant 0.000000e+00 : f32
    %11 = vector.broadcast %cst_14 : f32 to vector<8x128xf32>
    %12 = vector.extract_strided_slice %9 {offsets = [0, 0], sizes = [8, 512], strides = [1, 1]} : vector<64x512xf32> to vector<8x512xf32>
    %cst_15 = arith.constant dense<0.000000e+00> : vector<8x512xf32>
    %13 = tpu.matmul %10, %0, %cst_15 {dimension_numbers = #tpu.dot_dimension_numbers<[1], [0], [0], [1], [0, 0, 1, 1], [], []>} : vector<8x128xf32>, vector<128x512xf32>, vector<8x512xf32> -> vector<8x512xf32>
    %14 = arith.addf %12, %13 : vector<8x512xf32>
    %15 = vector.extract_strided_slice %14 {offsets = [0, 0], sizes = [8, 128], strides = [1, 1]} : vector<8x512xf32> to vector<8x128xf32>
    %16 = arith.negf %15 : vector<8x128xf32>
    %17 = math.exp %16 : vector<8x128xf32>
    %cst_16 = arith.constant 1.000000e+00 : f32
    %18 = vector.broadcast %cst_16 : f32 to vector<8x128xf32>
    %19 = arith.addf %18, %17 : vector<8x128xf32>
    %20 = arith.divf %18, %19 : vector<8x128xf32>
    %21 = vector.extract_strided_slice %14 {offsets = [0, 128], sizes = [8, 128], strides = [1, 1]} : vector<8x512xf32> to vector<8x128xf32>
    %22 = arith.negf %21 : vector<8x128xf32>
    %23 = math.exp %22 : vector<8x128xf32>
    %cst_17 = arith.constant 1.000000e+00 : f32
    %24 = vector.broadcast %cst_17 : f32 to vector<8x128xf32>
    %25 = arith.addf %24, %23 : vector<8x128xf32>
    %26 = arith.divf %24, %25 : vector<8x128xf32>
    %27 = vector.extract_strided_slice %14 {offsets = [0, 256], sizes = [8, 128], strides = [1, 1]} : vector<8x512xf32> to vector<8x128xf32>
    %28 = math.tanh %27 : vector<8x128xf32>
    %29 = vector.extract_strided_slice %14 {offsets = [0, 384], sizes = [8, 128], strides = [1, 1]} : vector<8x512xf32> to vector<8x128xf32>
    %30 = arith.negf %29 : vector<8x128xf32>
    %31 = math.exp %30 : vector<8x128xf32>
    %cst_18 = arith.constant 1.000000e+00 : f32
    %32 = vector.broadcast %cst_18 : f32 to vector<8x128xf32>
    %33 = arith.addf %32, %31 : vector<8x128xf32>
    %34 = arith.divf %32, %33 : vector<8x128xf32>
    %35 = arith.mulf %26, %11 : vector<8x128xf32>
    %36 = arith.mulf %20, %28 : vector<8x128xf32>
    %37 = arith.addf %35, %36 : vector<8x128xf32>
    %38 = math.tanh %37 : vector<8x128xf32>
    %39 = arith.mulf %34, %38 : vector<8x128xf32>
    %cst_19 = arith.constant dense<0.000000e+00> : vector<8x512xf32>
    %40 = tpu.matmul %39, %1, %cst_19 {dimension_numbers = #tpu.dot_dimension_numbers<[1], [0], [0], [1], [0, 0, 1, 1], [], []>} : vector<8x128xf32>, vector<128x512xf32>, vector<8x512xf32> -> vector<8x512xf32>
    %41 = vector.broadcast %3 : vector<1x512xf32> to vector<8x512xf32>
    %42 = arith.addf %40, %41 : vector<8x512xf32>
    %43 = vector.extract_strided_slice %9 {offsets = [8, 0], sizes = [8, 512], strides = [1, 1]} : vector<64x512xf32> to vector<8x512xf32>
    %cst_20 = arith.constant dense<0.000000e+00> : vector<8x512xf32>
    %44 = tpu.matmul %39, %0, %cst_20 {dimension_numbers = #tpu.dot_dimension_numbers<[1], [0], [0], [1], [0, 0, 1, 1], [], []>} : vector<8x128xf32>, vector<128x512xf32>, vector<8x512xf32> -> vector<8x512xf32>
    %45 = arith.addf %43, %44 : vector<8x512xf32>
    %46 = vector.extract_strided_slice %45 {offsets = [0, 0], sizes = [8, 128], strides = [1, 1]} : vector<8x512xf32> to vector<8x128xf32>
    %47 = arith.negf %46 : vector<8x128xf32>
    %48 = math.exp %47 : vector<8x128xf32>
    %cst_21 = arith.constant 1.000000e+00 : f32
    %49 = vector.broadcast %cst_21 : f32 to vector<8x128xf32>
    %50 = arith.addf %49, %48 : vector<8x128xf32>
    %51 = arith.divf %49, %50 : vector<8x128xf32>
    %52 = vector.extract_strided_slice %45 {offsets = [0, 128], sizes = [8, 128], strides = [1, 1]} : vector<8x512xf32> to vector<8x128xf32>
    %53 = arith.negf %52 : vector<8x128xf32>
    %54 = math.exp %53 : vector<8x128xf32>
    %cst_22 = arith.constant 1.000000e+00 : f32
    %55 = vector.broadcast %cst_22 : f32 to vector<8x128xf32>
    %56 = arith.addf %55, %54 : vector<8x128xf32>
    %57 = arith.divf %55, %56 : vector<8x128xf32>
    %58 = vector.extract_strided_slice %45 {offsets = [0, 256], sizes = [8, 128], strides = [1, 1]} : vector<8x512xf32> to vector<8x128xf32>
    %59 = math.tanh %58 : vector<8x128xf32>
    %60 = vector.extract_strided_slice %45 {offsets = [0, 384], sizes = [8, 128], strides = [1, 1]} : vector<8x512xf32> to vector<8x128xf32>
    %61 = arith.negf %60 : vector<8x128xf32>
    %62 = math.exp %61 : vector<8x128xf32>
    %cst_23 = arith.constant 1.000000e+00 : f32
    %63 = vector.broadcast %cst_23 : f32 to vector<8x128xf32>
    %64 = arith.addf %63, %62 : vector<8x128xf32>
    %65 = arith.divf %63, %64 : vector<8x128xf32>
    %66 = arith.mulf %57, %37 : vector<8x128xf32>
    %67 = arith.mulf %51, %59 : vector<8x128xf32>
    %68 = arith.addf %66, %67 : vector<8x128xf32>
    %69 = math.tanh %68 : vector<8x128xf32>
    %70 = arith.mulf %65, %69 : vector<8x128xf32>
    %cst_24 = arith.constant dense<0.000000e+00> : vector<8x512xf32>
    %71 = tpu.matmul %70, %1, %cst_24 {dimension_numbers = #tpu.dot_dimension_numbers<[1], [0], [0], [1], [0, 0, 1, 1], [], []>} : vector<8x128xf32>, vector<128x512xf32>, vector<8x512xf32> -> vector<8x512xf32>
    %72 = vector.broadcast %3 : vector<1x512xf32> to vector<8x512xf32>
    %73 = arith.addf %71, %72 : vector<8x512xf32>
    %74 = vector.extract_strided_slice %9 {offsets = [16, 0], sizes = [8, 512], strides = [1, 1]} : vector<64x512xf32> to vector<8x512xf32>
    %cst_25 = arith.constant dense<0.000000e+00> : vector<8x512xf32>
    %75 = tpu.matmul %70, %0, %cst_25 {dimension_numbers = #tpu.dot_dimension_numbers<[1], [0], [0], [1], [0, 0, 1, 1], [], []>} : vector<8x128xf32>, vector<128x512xf32>, vector<8x512xf32> -> vector<8x512xf32>
    %76 = arith.addf %74, %75 : vector<8x512xf32>
    %77 = vector.extract_strided_slice %76 {offsets = [0, 0], sizes = [8, 128], strides = [1, 1]} : vector<8x512xf32> to vector<8x128xf32>
    %78 = arith.negf %77 : vector<8x128xf32>
    %79 = math.exp %78 : vector<8x128xf32>
    %cst_26 = arith.constant 1.000000e+00 : f32
    %80 = vector.broadcast %cst_26 : f32 to vector<8x128xf32>
    %81 = arith.addf %80, %79 : vector<8x128xf32>
    %82 = arith.divf %80, %81 : vector<8x128xf32>
    %83 = vector.extract_strided_slice %76 {offsets = [0, 128], sizes = [8, 128], strides = [1, 1]} : vector<8x512xf32> to vector<8x128xf32>
    %84 = arith.negf %83 : vector<8x128xf32>
    %85 = math.exp %84 : vector<8x128xf32>
    %cst_27 = arith.constant 1.000000e+00 : f32
    %86 = vector.broadcast %cst_27 : f32 to vector<8x128xf32>
    %87 = arith.addf %86, %85 : vector<8x128xf32>
    %88 = arith.divf %86, %87 : vector<8x128xf32>
    %89 = vector.extract_strided_slice %76 {offsets = [0, 256], sizes = [8, 128], strides = [1, 1]} : vector<8x512xf32> to vector<8x128xf32>
    %90 = math.tanh %89 : vector<8x128xf32>
    %91 = vector.extract_strided_slice %76 {offsets = [0, 384], sizes = [8, 128], strides = [1, 1]} : vector<8x512xf32> to vector<8x128xf32>
    %92 = arith.negf %91 : vector<8x128xf32>
    %93 = math.exp %92 : vector<8x128xf32>
    %cst_28 = arith.constant 1.000000e+00 : f32
    %94 = vector.broadcast %cst_28 : f32 to vector<8x128xf32>
    %95 = arith.addf %94, %93 : vector<8x128xf32>
    %96 = arith.divf %94, %95 : vector<8x128xf32>
    %97 = arith.mulf %88, %68 : vector<8x128xf32>
    %98 = arith.mulf %82, %90 : vector<8x128xf32>
    %99 = arith.addf %97, %98 : vector<8x128xf32>
    %100 = math.tanh %99 : vector<8x128xf32>
    %101 = arith.mulf %96, %100 : vector<8x128xf32>
    %cst_29 = arith.constant dense<0.000000e+00> : vector<8x512xf32>
    %102 = tpu.matmul %101, %1, %cst_29 {dimension_numbers = #tpu.dot_dimension_numbers<[1], [0], [0], [1], [0, 0, 1, 1], [], []>} : vector<8x128xf32>, vector<128x512xf32>, vector<8x512xf32> -> vector<8x512xf32>
    %103 = vector.broadcast %3 : vector<1x512xf32> to vector<8x512xf32>
    %104 = arith.addf %102, %103 : vector<8x512xf32>
    %105 = vector.extract_strided_slice %9 {offsets = [24, 0], sizes = [8, 512], strides = [1, 1]} : vector<64x512xf32> to vector<8x512xf32>
    %cst_30 = arith.constant dense<0.000000e+00> : vector<8x512xf32>
    %106 = tpu.matmul %101, %0, %cst_30 {dimension_numbers = #tpu.dot_dimension_numbers<[1], [0], [0], [1], [0, 0, 1, 1], [], []>} : vector<8x128xf32>, vector<128x512xf32>, vector<8x512xf32> -> vector<8x512xf32>
    %107 = arith.addf %105, %106 : vector<8x512xf32>
    %108 = vector.extract_strided_slice %107 {offsets = [0, 0], sizes = [8, 128], strides = [1, 1]} : vector<8x512xf32> to vector<8x128xf32>
    %109 = arith.negf %108 : vector<8x128xf32>
    %110 = math.exp %109 : vector<8x128xf32>
    %cst_31 = arith.constant 1.000000e+00 : f32
    %111 = vector.broadcast %cst_31 : f32 to vector<8x128xf32>
    %112 = arith.addf %111, %110 : vector<8x128xf32>
    %113 = arith.divf %111, %112 : vector<8x128xf32>
    %114 = vector.extract_strided_slice %107 {offsets = [0, 128], sizes = [8, 128], strides = [1, 1]} : vector<8x512xf32> to vector<8x128xf32>
    %115 = arith.negf %114 : vector<8x128xf32>
    %116 = math.exp %115 : vector<8x128xf32>
    %cst_32 = arith.constant 1.000000e+00 : f32
    %117 = vector.broadcast %cst_32 : f32 to vector<8x128xf32>
    %118 = arith.addf %117, %116 : vector<8x128xf32>
    %119 = arith.divf %117, %118 : vector<8x128xf32>
    %120 = vector.extract_strided_slice %107 {offsets = [0, 256], sizes = [8, 128], strides = [1, 1]} : vector<8x512xf32> to vector<8x128xf32>
    %121 = math.tanh %120 : vector<8x128xf32>
    %122 = vector.extract_strided_slice %107 {offsets = [0, 384], sizes = [8, 128], strides = [1, 1]} : vector<8x512xf32> to vector<8x128xf32>
    %123 = arith.negf %122 : vector<8x128xf32>
    %124 = math.exp %123 : vector<8x128xf32>
    %cst_33 = arith.constant 1.000000e+00 : f32
    %125 = vector.broadcast %cst_33 : f32 to vector<8x128xf32>
    %126 = arith.addf %125, %124 : vector<8x128xf32>
    %127 = arith.divf %125, %126 : vector<8x128xf32>
    %128 = arith.mulf %119, %99 : vector<8x128xf32>
    %129 = arith.mulf %113, %121 : vector<8x128xf32>
    %130 = arith.addf %128, %129 : vector<8x128xf32>
    %131 = math.tanh %130 : vector<8x128xf32>
    %132 = arith.mulf %127, %131 : vector<8x128xf32>
    %cst_34 = arith.constant dense<0.000000e+00> : vector<8x512xf32>
    %133 = tpu.matmul %132, %1, %cst_34 {dimension_numbers = #tpu.dot_dimension_numbers<[1], [0], [0], [1], [0, 0, 1, 1], [], []>} : vector<8x128xf32>, vector<128x512xf32>, vector<8x512xf32> -> vector<8x512xf32>
    %134 = vector.broadcast %3 : vector<1x512xf32> to vector<8x512xf32>
    %135 = arith.addf %133, %134 : vector<8x512xf32>
    %136 = vector.extract_strided_slice %9 {offsets = [32, 0], sizes = [8, 512], strides = [1, 1]} : vector<64x512xf32> to vector<8x512xf32>
    %cst_35 = arith.constant dense<0.000000e+00> : vector<8x512xf32>
    %137 = tpu.matmul %132, %0, %cst_35 {dimension_numbers = #tpu.dot_dimension_numbers<[1], [0], [0], [1], [0, 0, 1, 1], [], []>} : vector<8x128xf32>, vector<128x512xf32>, vector<8x512xf32> -> vector<8x512xf32>
    %138 = arith.addf %136, %137 : vector<8x512xf32>
    %139 = vector.extract_strided_slice %138 {offsets = [0, 0], sizes = [8, 128], strides = [1, 1]} : vector<8x512xf32> to vector<8x128xf32>
    %140 = arith.negf %139 : vector<8x128xf32>
    %141 = math.exp %140 : vector<8x128xf32>
    %cst_36 = arith.constant 1.000000e+00 : f32
    %142 = vector.broadcast %cst_36 : f32 to vector<8x128xf32>
    %143 = arith.addf %142, %141 : vector<8x128xf32>
    %144 = arith.divf %142, %143 : vector<8x128xf32>
    %145 = vector.extract_strided_slice %138 {offsets = [0, 128], sizes = [8, 128], strides = [1, 1]} : vector<8x512xf32> to vector<8x128xf32>
    %146 = arith.negf %145 : vector<8x128xf32>
    %147 = math.exp %146 : vector<8x128xf32>
    %cst_37 = arith.constant 1.000000e+00 : f32
    %148 = vector.broadcast %cst_37 : f32 to vector<8x128xf32>
    %149 = arith.addf %148, %147 : vector<8x128xf32>
    %150 = arith.divf %148, %149 : vector<8x128xf32>
    %151 = vector.extract_strided_slice %138 {offsets = [0, 256], sizes = [8, 128], strides = [1, 1]} : vector<8x512xf32> to vector<8x128xf32>
    %152 = math.tanh %151 : vector<8x128xf32>
    %153 = vector.extract_strided_slice %138 {offsets = [0, 384], sizes = [8, 128], strides = [1, 1]} : vector<8x512xf32> to vector<8x128xf32>
    %154 = arith.negf %153 : vector<8x128xf32>
    %155 = math.exp %154 : vector<8x128xf32>
    %cst_38 = arith.constant 1.000000e+00 : f32
    %156 = vector.broadcast %cst_38 : f32 to vector<8x128xf32>
    %157 = arith.addf %156, %155 : vector<8x128xf32>
    %158 = arith.divf %156, %157 : vector<8x128xf32>
    %159 = arith.mulf %150, %130 : vector<8x128xf32>
    %160 = arith.mulf %144, %152 : vector<8x128xf32>
    %161 = arith.addf %159, %160 : vector<8x128xf32>
    %162 = math.tanh %161 : vector<8x128xf32>
    %163 = arith.mulf %158, %162 : vector<8x128xf32>
    %cst_39 = arith.constant dense<0.000000e+00> : vector<8x512xf32>
    %164 = tpu.matmul %163, %1, %cst_39 {dimension_numbers = #tpu.dot_dimension_numbers<[1], [0], [0], [1], [0, 0, 1, 1], [], []>} : vector<8x128xf32>, vector<128x512xf32>, vector<8x512xf32> -> vector<8x512xf32>
    %165 = vector.broadcast %3 : vector<1x512xf32> to vector<8x512xf32>
    %166 = arith.addf %164, %165 : vector<8x512xf32>
    %167 = vector.extract_strided_slice %9 {offsets = [40, 0], sizes = [8, 512], strides = [1, 1]} : vector<64x512xf32> to vector<8x512xf32>
    %cst_40 = arith.constant dense<0.000000e+00> : vector<8x512xf32>
    %168 = tpu.matmul %163, %0, %cst_40 {dimension_numbers = #tpu.dot_dimension_numbers<[1], [0], [0], [1], [0, 0, 1, 1], [], []>} : vector<8x128xf32>, vector<128x512xf32>, vector<8x512xf32> -> vector<8x512xf32>
    %169 = arith.addf %167, %168 : vector<8x512xf32>
    %170 = vector.extract_strided_slice %169 {offsets = [0, 0], sizes = [8, 128], strides = [1, 1]} : vector<8x512xf32> to vector<8x128xf32>
    %171 = arith.negf %170 : vector<8x128xf32>
    %172 = math.exp %171 : vector<8x128xf32>
    %cst_41 = arith.constant 1.000000e+00 : f32
    %173 = vector.broadcast %cst_41 : f32 to vector<8x128xf32>
    %174 = arith.addf %173, %172 : vector<8x128xf32>
    %175 = arith.divf %173, %174 : vector<8x128xf32>
    %176 = vector.extract_strided_slice %169 {offsets = [0, 128], sizes = [8, 128], strides = [1, 1]} : vector<8x512xf32> to vector<8x128xf32>
    %177 = arith.negf %176 : vector<8x128xf32>
    %178 = math.exp %177 : vector<8x128xf32>
    %cst_42 = arith.constant 1.000000e+00 : f32
    %179 = vector.broadcast %cst_42 : f32 to vector<8x128xf32>
    %180 = arith.addf %179, %178 : vector<8x128xf32>
    %181 = arith.divf %179, %180 : vector<8x128xf32>
    %182 = vector.extract_strided_slice %169 {offsets = [0, 256], sizes = [8, 128], strides = [1, 1]} : vector<8x512xf32> to vector<8x128xf32>
    %183 = math.tanh %182 : vector<8x128xf32>
    %184 = vector.extract_strided_slice %169 {offsets = [0, 384], sizes = [8, 128], strides = [1, 1]} : vector<8x512xf32> to vector<8x128xf32>
    %185 = arith.negf %184 : vector<8x128xf32>
    %186 = math.exp %185 : vector<8x128xf32>
    %cst_43 = arith.constant 1.000000e+00 : f32
    %187 = vector.broadcast %cst_43 : f32 to vector<8x128xf32>
    %188 = arith.addf %187, %186 : vector<8x128xf32>
    %189 = arith.divf %187, %188 : vector<8x128xf32>
    %190 = arith.mulf %181, %161 : vector<8x128xf32>
    %191 = arith.mulf %175, %183 : vector<8x128xf32>
    %192 = arith.addf %190, %191 : vector<8x128xf32>
    %193 = math.tanh %192 : vector<8x128xf32>
    %194 = arith.mulf %189, %193 : vector<8x128xf32>
    %cst_44 = arith.constant dense<0.000000e+00> : vector<8x512xf32>
    %195 = tpu.matmul %194, %1, %cst_44 {dimension_numbers = #tpu.dot_dimension_numbers<[1], [0], [0], [1], [0, 0, 1, 1], [], []>} : vector<8x128xf32>, vector<128x512xf32>, vector<8x512xf32> -> vector<8x512xf32>
    %196 = vector.broadcast %3 : vector<1x512xf32> to vector<8x512xf32>
    %197 = arith.addf %195, %196 : vector<8x512xf32>
    %198 = vector.extract_strided_slice %9 {offsets = [48, 0], sizes = [8, 512], strides = [1, 1]} : vector<64x512xf32> to vector<8x512xf32>
    %cst_45 = arith.constant dense<0.000000e+00> : vector<8x512xf32>
    %199 = tpu.matmul %194, %0, %cst_45 {dimension_numbers = #tpu.dot_dimension_numbers<[1], [0], [0], [1], [0, 0, 1, 1], [], []>} : vector<8x128xf32>, vector<128x512xf32>, vector<8x512xf32> -> vector<8x512xf32>
    %200 = arith.addf %198, %199 : vector<8x512xf32>
    %201 = vector.extract_strided_slice %200 {offsets = [0, 0], sizes = [8, 128], strides = [1, 1]} : vector<8x512xf32> to vector<8x128xf32>
    %202 = arith.negf %201 : vector<8x128xf32>
    %203 = math.exp %202 : vector<8x128xf32>
    %cst_46 = arith.constant 1.000000e+00 : f32
    %204 = vector.broadcast %cst_46 : f32 to vector<8x128xf32>
    %205 = arith.addf %204, %203 : vector<8x128xf32>
    %206 = arith.divf %204, %205 : vector<8x128xf32>
    %207 = vector.extract_strided_slice %200 {offsets = [0, 128], sizes = [8, 128], strides = [1, 1]} : vector<8x512xf32> to vector<8x128xf32>
    %208 = arith.negf %207 : vector<8x128xf32>
    %209 = math.exp %208 : vector<8x128xf32>
    %cst_47 = arith.constant 1.000000e+00 : f32
    %210 = vector.broadcast %cst_47 : f32 to vector<8x128xf32>
    %211 = arith.addf %210, %209 : vector<8x128xf32>
    %212 = arith.divf %210, %211 : vector<8x128xf32>
    %213 = vector.extract_strided_slice %200 {offsets = [0, 256], sizes = [8, 128], strides = [1, 1]} : vector<8x512xf32> to vector<8x128xf32>
    %214 = math.tanh %213 : vector<8x128xf32>
    %215 = vector.extract_strided_slice %200 {offsets = [0, 384], sizes = [8, 128], strides = [1, 1]} : vector<8x512xf32> to vector<8x128xf32>
    %216 = arith.negf %215 : vector<8x128xf32>
    %217 = math.exp %216 : vector<8x128xf32>
    %cst_48 = arith.constant 1.000000e+00 : f32
    %218 = vector.broadcast %cst_48 : f32 to vector<8x128xf32>
    %219 = arith.addf %218, %217 : vector<8x128xf32>
    %220 = arith.divf %218, %219 : vector<8x128xf32>
    %221 = arith.mulf %212, %192 : vector<8x128xf32>
    %222 = arith.mulf %206, %214 : vector<8x128xf32>
    %223 = arith.addf %221, %222 : vector<8x128xf32>
    %224 = math.tanh %223 : vector<8x128xf32>
    %225 = arith.mulf %220, %224 : vector<8x128xf32>
    %cst_49 = arith.constant dense<0.000000e+00> : vector<8x512xf32>
    %226 = tpu.matmul %225, %1, %cst_49 {dimension_numbers = #tpu.dot_dimension_numbers<[1], [0], [0], [1], [0, 0, 1, 1], [], []>} : vector<8x128xf32>, vector<128x512xf32>, vector<8x512xf32> -> vector<8x512xf32>
    %227 = vector.broadcast %3 : vector<1x512xf32> to vector<8x512xf32>
    %228 = arith.addf %226, %227 : vector<8x512xf32>
    %229 = vector.extract_strided_slice %9 {offsets = [56, 0], sizes = [8, 512], strides = [1, 1]} : vector<64x512xf32> to vector<8x512xf32>
    %cst_50 = arith.constant dense<0.000000e+00> : vector<8x512xf32>
    %230 = tpu.matmul %225, %0, %cst_50 {dimension_numbers = #tpu.dot_dimension_numbers<[1], [0], [0], [1], [0, 0, 1, 1], [], []>} : vector<8x128xf32>, vector<128x512xf32>, vector<8x512xf32> -> vector<8x512xf32>
    %231 = arith.addf %229, %230 : vector<8x512xf32>
    %232 = vector.extract_strided_slice %231 {offsets = [0, 0], sizes = [8, 128], strides = [1, 1]} : vector<8x512xf32> to vector<8x128xf32>
    %233 = arith.negf %232 : vector<8x128xf32>
    %234 = math.exp %233 : vector<8x128xf32>
    %cst_51 = arith.constant 1.000000e+00 : f32
    %235 = vector.broadcast %cst_51 : f32 to vector<8x128xf32>
    %236 = arith.addf %235, %234 : vector<8x128xf32>
    %237 = arith.divf %235, %236 : vector<8x128xf32>
    %238 = vector.extract_strided_slice %231 {offsets = [0, 128], sizes = [8, 128], strides = [1, 1]} : vector<8x512xf32> to vector<8x128xf32>
    %239 = arith.negf %238 : vector<8x128xf32>
    %240 = math.exp %239 : vector<8x128xf32>
    %cst_52 = arith.constant 1.000000e+00 : f32
    %241 = vector.broadcast %cst_52 : f32 to vector<8x128xf32>
    %242 = arith.addf %241, %240 : vector<8x128xf32>
    %243 = arith.divf %241, %242 : vector<8x128xf32>
    %244 = vector.extract_strided_slice %231 {offsets = [0, 256], sizes = [8, 128], strides = [1, 1]} : vector<8x512xf32> to vector<8x128xf32>
    %245 = math.tanh %244 : vector<8x128xf32>
    %246 = vector.extract_strided_slice %231 {offsets = [0, 384], sizes = [8, 128], strides = [1, 1]} : vector<8x512xf32> to vector<8x128xf32>
    %247 = arith.negf %246 : vector<8x128xf32>
    %248 = math.exp %247 : vector<8x128xf32>
    %cst_53 = arith.constant 1.000000e+00 : f32
    %249 = vector.broadcast %cst_53 : f32 to vector<8x128xf32>
    %250 = arith.addf %249, %248 : vector<8x128xf32>
    %251 = arith.divf %249, %250 : vector<8x128xf32>
    %252 = arith.mulf %243, %223 : vector<8x128xf32>
    %253 = arith.mulf %237, %245 : vector<8x128xf32>
    %254 = arith.addf %252, %253 : vector<8x128xf32>
    %255 = math.tanh %254 : vector<8x128xf32>
    %256 = arith.mulf %251, %255 : vector<8x128xf32>
    %cst_54 = arith.constant dense<0.000000e+00> : vector<8x512xf32>
    %257 = tpu.matmul %256, %1, %cst_54 {dimension_numbers = #tpu.dot_dimension_numbers<[1], [0], [0], [1], [0, 0, 1, 1], [], []>} : vector<8x128xf32>, vector<128x512xf32>, vector<8x512xf32> -> vector<8x512xf32>
    %258 = vector.broadcast %3 : vector<1x512xf32> to vector<8x512xf32>
    %259 = arith.addf %257, %258 : vector<8x512xf32>
    %cst_55 = arith.constant 0.000000e+00 : f32
    %260 = vector.broadcast %cst_55 : f32 to vector<8x128xf32>
    %cst_56 = arith.constant 0.000000e+00 : f32
    %261 = vector.broadcast %cst_56 : f32 to vector<8x128xf32>
    %cst_57 = arith.constant dense<0.000000e+00> : vector<8x512xf32>
    %262 = tpu.matmul %260, %2, %cst_57 {dimension_numbers = #tpu.dot_dimension_numbers<[1], [0], [0], [1], [0, 0, 1, 1], [], []>} : vector<8x128xf32>, vector<128x512xf32>, vector<8x512xf32> -> vector<8x512xf32>
    %263 = arith.addf %42, %262 : vector<8x512xf32>
    %264 = vector.extract_strided_slice %263 {offsets = [0, 0], sizes = [8, 128], strides = [1, 1]} : vector<8x512xf32> to vector<8x128xf32>
    %265 = arith.negf %264 : vector<8x128xf32>
    %266 = math.exp %265 : vector<8x128xf32>
    %cst_58 = arith.constant 1.000000e+00 : f32
    %267 = vector.broadcast %cst_58 : f32 to vector<8x128xf32>
    %268 = arith.addf %267, %266 : vector<8x128xf32>
    %269 = arith.divf %267, %268 : vector<8x128xf32>
    %270 = vector.extract_strided_slice %263 {offsets = [0, 128], sizes = [8, 128], strides = [1, 1]} : vector<8x512xf32> to vector<8x128xf32>
    %271 = arith.negf %270 : vector<8x128xf32>
    %272 = math.exp %271 : vector<8x128xf32>
    %cst_59 = arith.constant 1.000000e+00 : f32
    %273 = vector.broadcast %cst_59 : f32 to vector<8x128xf32>
    %274 = arith.addf %273, %272 : vector<8x128xf32>
    %275 = arith.divf %273, %274 : vector<8x128xf32>
    %276 = vector.extract_strided_slice %263 {offsets = [0, 256], sizes = [8, 128], strides = [1, 1]} : vector<8x512xf32> to vector<8x128xf32>
    %277 = math.tanh %276 : vector<8x128xf32>
    %278 = vector.extract_strided_slice %263 {offsets = [0, 384], sizes = [8, 128], strides = [1, 1]} : vector<8x512xf32> to vector<8x128xf32>
    %279 = arith.negf %278 : vector<8x128xf32>
    %280 = math.exp %279 : vector<8x128xf32>
    %cst_60 = arith.constant 1.000000e+00 : f32
    %281 = vector.broadcast %cst_60 : f32 to vector<8x128xf32>
    %282 = arith.addf %281, %280 : vector<8x128xf32>
    %283 = arith.divf %281, %282 : vector<8x128xf32>
    %284 = arith.mulf %275, %261 : vector<8x128xf32>
    %285 = arith.mulf %269, %277 : vector<8x128xf32>
    %286 = arith.addf %284, %285 : vector<8x128xf32>
    %287 = math.tanh %286 : vector<8x128xf32>
    %288 = arith.mulf %283, %287 : vector<8x128xf32>
    %cst_61 = arith.constant dense<0.000000e+00> : vector<8x512xf32>
    %289 = tpu.matmul %288, %2, %cst_61 {dimension_numbers = #tpu.dot_dimension_numbers<[1], [0], [0], [1], [0, 0, 1, 1], [], []>} : vector<8x128xf32>, vector<128x512xf32>, vector<8x512xf32> -> vector<8x512xf32>
    %290 = arith.addf %73, %289 : vector<8x512xf32>
    %291 = vector.extract_strided_slice %290 {offsets = [0, 0], sizes = [8, 128], strides = [1, 1]} : vector<8x512xf32> to vector<8x128xf32>
    %292 = arith.negf %291 : vector<8x128xf32>
    %293 = math.exp %292 : vector<8x128xf32>
    %cst_62 = arith.constant 1.000000e+00 : f32
    %294 = vector.broadcast %cst_62 : f32 to vector<8x128xf32>
    %295 = arith.addf %294, %293 : vector<8x128xf32>
    %296 = arith.divf %294, %295 : vector<8x128xf32>
    %297 = vector.extract_strided_slice %290 {offsets = [0, 128], sizes = [8, 128], strides = [1, 1]} : vector<8x512xf32> to vector<8x128xf32>
    %298 = arith.negf %297 : vector<8x128xf32>
    %299 = math.exp %298 : vector<8x128xf32>
    %cst_63 = arith.constant 1.000000e+00 : f32
    %300 = vector.broadcast %cst_63 : f32 to vector<8x128xf32>
    %301 = arith.addf %300, %299 : vector<8x128xf32>
    %302 = arith.divf %300, %301 : vector<8x128xf32>
    %303 = vector.extract_strided_slice %290 {offsets = [0, 256], sizes = [8, 128], strides = [1, 1]} : vector<8x512xf32> to vector<8x128xf32>
    %304 = math.tanh %303 : vector<8x128xf32>
    %305 = vector.extract_strided_slice %290 {offsets = [0, 384], sizes = [8, 128], strides = [1, 1]} : vector<8x512xf32> to vector<8x128xf32>
    %306 = arith.negf %305 : vector<8x128xf32>
    %307 = math.exp %306 : vector<8x128xf32>
    %cst_64 = arith.constant 1.000000e+00 : f32
    %308 = vector.broadcast %cst_64 : f32 to vector<8x128xf32>
    %309 = arith.addf %308, %307 : vector<8x128xf32>
    %310 = arith.divf %308, %309 : vector<8x128xf32>
    %311 = arith.mulf %302, %286 : vector<8x128xf32>
    %312 = arith.mulf %296, %304 : vector<8x128xf32>
    %313 = arith.addf %311, %312 : vector<8x128xf32>
    %314 = math.tanh %313 : vector<8x128xf32>
    %315 = arith.mulf %310, %314 : vector<8x128xf32>
    %cst_65 = arith.constant dense<0.000000e+00> : vector<8x512xf32>
    %316 = tpu.matmul %315, %2, %cst_65 {dimension_numbers = #tpu.dot_dimension_numbers<[1], [0], [0], [1], [0, 0, 1, 1], [], []>} : vector<8x128xf32>, vector<128x512xf32>, vector<8x512xf32> -> vector<8x512xf32>
    %317 = arith.addf %104, %316 : vector<8x512xf32>
    %318 = vector.extract_strided_slice %317 {offsets = [0, 0], sizes = [8, 128], strides = [1, 1]} : vector<8x512xf32> to vector<8x128xf32>
    %319 = arith.negf %318 : vector<8x128xf32>
    %320 = math.exp %319 : vector<8x128xf32>
    %cst_66 = arith.constant 1.000000e+00 : f32
    %321 = vector.broadcast %cst_66 : f32 to vector<8x128xf32>
    %322 = arith.addf %321, %320 : vector<8x128xf32>
    %323 = arith.divf %321, %322 : vector<8x128xf32>
    %324 = vector.extract_strided_slice %317 {offsets = [0, 128], sizes = [8, 128], strides = [1, 1]} : vector<8x512xf32> to vector<8x128xf32>
    %325 = arith.negf %324 : vector<8x128xf32>
    %326 = math.exp %325 : vector<8x128xf32>
    %cst_67 = arith.constant 1.000000e+00 : f32
    %327 = vector.broadcast %cst_67 : f32 to vector<8x128xf32>
    %328 = arith.addf %327, %326 : vector<8x128xf32>
    %329 = arith.divf %327, %328 : vector<8x128xf32>
    %330 = vector.extract_strided_slice %317 {offsets = [0, 256], sizes = [8, 128], strides = [1, 1]} : vector<8x512xf32> to vector<8x128xf32>
    %331 = math.tanh %330 : vector<8x128xf32>
    %332 = vector.extract_strided_slice %317 {offsets = [0, 384], sizes = [8, 128], strides = [1, 1]} : vector<8x512xf32> to vector<8x128xf32>
    %333 = arith.negf %332 : vector<8x128xf32>
    %334 = math.exp %333 : vector<8x128xf32>
    %cst_68 = arith.constant 1.000000e+00 : f32
    %335 = vector.broadcast %cst_68 : f32 to vector<8x128xf32>
    %336 = arith.addf %335, %334 : vector<8x128xf32>
    %337 = arith.divf %335, %336 : vector<8x128xf32>
    %338 = arith.mulf %329, %313 : vector<8x128xf32>
    %339 = arith.mulf %323, %331 : vector<8x128xf32>
    %340 = arith.addf %338, %339 : vector<8x128xf32>
    %341 = math.tanh %340 : vector<8x128xf32>
    %342 = arith.mulf %337, %341 : vector<8x128xf32>
    %cst_69 = arith.constant dense<0.000000e+00> : vector<8x512xf32>
    %343 = tpu.matmul %342, %2, %cst_69 {dimension_numbers = #tpu.dot_dimension_numbers<[1], [0], [0], [1], [0, 0, 1, 1], [], []>} : vector<8x128xf32>, vector<128x512xf32>, vector<8x512xf32> -> vector<8x512xf32>
    %344 = arith.addf %135, %343 : vector<8x512xf32>
    %345 = vector.extract_strided_slice %344 {offsets = [0, 0], sizes = [8, 128], strides = [1, 1]} : vector<8x512xf32> to vector<8x128xf32>
    %346 = arith.negf %345 : vector<8x128xf32>
    %347 = math.exp %346 : vector<8x128xf32>
    %cst_70 = arith.constant 1.000000e+00 : f32
    %348 = vector.broadcast %cst_70 : f32 to vector<8x128xf32>
    %349 = arith.addf %348, %347 : vector<8x128xf32>
    %350 = arith.divf %348, %349 : vector<8x128xf32>
    %351 = vector.extract_strided_slice %344 {offsets = [0, 128], sizes = [8, 128], strides = [1, 1]} : vector<8x512xf32> to vector<8x128xf32>
    %352 = arith.negf %351 : vector<8x128xf32>
    %353 = math.exp %352 : vector<8x128xf32>
    %cst_71 = arith.constant 1.000000e+00 : f32
    %354 = vector.broadcast %cst_71 : f32 to vector<8x128xf32>
    %355 = arith.addf %354, %353 : vector<8x128xf32>
    %356 = arith.divf %354, %355 : vector<8x128xf32>
    %357 = vector.extract_strided_slice %344 {offsets = [0, 256], sizes = [8, 128], strides = [1, 1]} : vector<8x512xf32> to vector<8x128xf32>
    %358 = math.tanh %357 : vector<8x128xf32>
    %359 = vector.extract_strided_slice %344 {offsets = [0, 384], sizes = [8, 128], strides = [1, 1]} : vector<8x512xf32> to vector<8x128xf32>
    %360 = arith.negf %359 : vector<8x128xf32>
    %361 = math.exp %360 : vector<8x128xf32>
    %cst_72 = arith.constant 1.000000e+00 : f32
    %362 = vector.broadcast %cst_72 : f32 to vector<8x128xf32>
    %363 = arith.addf %362, %361 : vector<8x128xf32>
    %364 = arith.divf %362, %363 : vector<8x128xf32>
    %365 = arith.mulf %356, %340 : vector<8x128xf32>
    %366 = arith.mulf %350, %358 : vector<8x128xf32>
    %367 = arith.addf %365, %366 : vector<8x128xf32>
    %368 = math.tanh %367 : vector<8x128xf32>
    %369 = arith.mulf %364, %368 : vector<8x128xf32>
    %cst_73 = arith.constant dense<0.000000e+00> : vector<8x512xf32>
    %370 = tpu.matmul %369, %2, %cst_73 {dimension_numbers = #tpu.dot_dimension_numbers<[1], [0], [0], [1], [0, 0, 1, 1], [], []>} : vector<8x128xf32>, vector<128x512xf32>, vector<8x512xf32> -> vector<8x512xf32>
    %371 = arith.addf %166, %370 : vector<8x512xf32>
    %372 = vector.extract_strided_slice %371 {offsets = [0, 0], sizes = [8, 128], strides = [1, 1]} : vector<8x512xf32> to vector<8x128xf32>
    %373 = arith.negf %372 : vector<8x128xf32>
    %374 = math.exp %373 : vector<8x128xf32>
    %cst_74 = arith.constant 1.000000e+00 : f32
    %375 = vector.broadcast %cst_74 : f32 to vector<8x128xf32>
    %376 = arith.addf %375, %374 : vector<8x128xf32>
    %377 = arith.divf %375, %376 : vector<8x128xf32>
    %378 = vector.extract_strided_slice %371 {offsets = [0, 128], sizes = [8, 128], strides = [1, 1]} : vector<8x512xf32> to vector<8x128xf32>
    %379 = arith.negf %378 : vector<8x128xf32>
    %380 = math.exp %379 : vector<8x128xf32>
    %cst_75 = arith.constant 1.000000e+00 : f32
    %381 = vector.broadcast %cst_75 : f32 to vector<8x128xf32>
    %382 = arith.addf %381, %380 : vector<8x128xf32>
    %383 = arith.divf %381, %382 : vector<8x128xf32>
    %384 = vector.extract_strided_slice %371 {offsets = [0, 256], sizes = [8, 128], strides = [1, 1]} : vector<8x512xf32> to vector<8x128xf32>
    %385 = math.tanh %384 : vector<8x128xf32>
    %386 = vector.extract_strided_slice %371 {offsets = [0, 384], sizes = [8, 128], strides = [1, 1]} : vector<8x512xf32> to vector<8x128xf32>
    %387 = arith.negf %386 : vector<8x128xf32>
    %388 = math.exp %387 : vector<8x128xf32>
    %cst_76 = arith.constant 1.000000e+00 : f32
    %389 = vector.broadcast %cst_76 : f32 to vector<8x128xf32>
    %390 = arith.addf %389, %388 : vector<8x128xf32>
    %391 = arith.divf %389, %390 : vector<8x128xf32>
    %392 = arith.mulf %383, %367 : vector<8x128xf32>
    %393 = arith.mulf %377, %385 : vector<8x128xf32>
    %394 = arith.addf %392, %393 : vector<8x128xf32>
    %395 = math.tanh %394 : vector<8x128xf32>
    %396 = arith.mulf %391, %395 : vector<8x128xf32>
    %cst_77 = arith.constant dense<0.000000e+00> : vector<8x512xf32>
    %397 = tpu.matmul %396, %2, %cst_77 {dimension_numbers = #tpu.dot_dimension_numbers<[1], [0], [0], [1], [0, 0, 1, 1], [], []>} : vector<8x128xf32>, vector<128x512xf32>, vector<8x512xf32> -> vector<8x512xf32>
    %398 = arith.addf %197, %397 : vector<8x512xf32>
    %399 = vector.extract_strided_slice %398 {offsets = [0, 0], sizes = [8, 128], strides = [1, 1]} : vector<8x512xf32> to vector<8x128xf32>
    %400 = arith.negf %399 : vector<8x128xf32>
    %401 = math.exp %400 : vector<8x128xf32>
    %cst_78 = arith.constant 1.000000e+00 : f32
    %402 = vector.broadcast %cst_78 : f32 to vector<8x128xf32>
    %403 = arith.addf %402, %401 : vector<8x128xf32>
    %404 = arith.divf %402, %403 : vector<8x128xf32>
    %405 = vector.extract_strided_slice %398 {offsets = [0, 128], sizes = [8, 128], strides = [1, 1]} : vector<8x512xf32> to vector<8x128xf32>
    %406 = arith.negf %405 : vector<8x128xf32>
    %407 = math.exp %406 : vector<8x128xf32>
    %cst_79 = arith.constant 1.000000e+00 : f32
    %408 = vector.broadcast %cst_79 : f32 to vector<8x128xf32>
    %409 = arith.addf %408, %407 : vector<8x128xf32>
    %410 = arith.divf %408, %409 : vector<8x128xf32>
    %411 = vector.extract_strided_slice %398 {offsets = [0, 256], sizes = [8, 128], strides = [1, 1]} : vector<8x512xf32> to vector<8x128xf32>
    %412 = math.tanh %411 : vector<8x128xf32>
    %413 = vector.extract_strided_slice %398 {offsets = [0, 384], sizes = [8, 128], strides = [1, 1]} : vector<8x512xf32> to vector<8x128xf32>
    %414 = arith.negf %413 : vector<8x128xf32>
    %415 = math.exp %414 : vector<8x128xf32>
    %cst_80 = arith.constant 1.000000e+00 : f32
    %416 = vector.broadcast %cst_80 : f32 to vector<8x128xf32>
    %417 = arith.addf %416, %415 : vector<8x128xf32>
    %418 = arith.divf %416, %417 : vector<8x128xf32>
    %419 = arith.mulf %410, %394 : vector<8x128xf32>
    %420 = arith.mulf %404, %412 : vector<8x128xf32>
    %421 = arith.addf %419, %420 : vector<8x128xf32>
    %422 = math.tanh %421 : vector<8x128xf32>
    %423 = arith.mulf %418, %422 : vector<8x128xf32>
    %cst_81 = arith.constant dense<0.000000e+00> : vector<8x512xf32>
    %424 = tpu.matmul %423, %2, %cst_81 {dimension_numbers = #tpu.dot_dimension_numbers<[1], [0], [0], [1], [0, 0, 1, 1], [], []>} : vector<8x128xf32>, vector<128x512xf32>, vector<8x512xf32> -> vector<8x512xf32>
    %425 = arith.addf %228, %424 : vector<8x512xf32>
    %426 = vector.extract_strided_slice %425 {offsets = [0, 0], sizes = [8, 128], strides = [1, 1]} : vector<8x512xf32> to vector<8x128xf32>
    %427 = arith.negf %426 : vector<8x128xf32>
    %428 = math.exp %427 : vector<8x128xf32>
    %cst_82 = arith.constant 1.000000e+00 : f32
    %429 = vector.broadcast %cst_82 : f32 to vector<8x128xf32>
    %430 = arith.addf %429, %428 : vector<8x128xf32>
    %431 = arith.divf %429, %430 : vector<8x128xf32>
    %432 = vector.extract_strided_slice %425 {offsets = [0, 128], sizes = [8, 128], strides = [1, 1]} : vector<8x512xf32> to vector<8x128xf32>
    %433 = arith.negf %432 : vector<8x128xf32>
    %434 = math.exp %433 : vector<8x128xf32>
    %cst_83 = arith.constant 1.000000e+00 : f32
    %435 = vector.broadcast %cst_83 : f32 to vector<8x128xf32>
    %436 = arith.addf %435, %434 : vector<8x128xf32>
    %437 = arith.divf %435, %436 : vector<8x128xf32>
    %438 = vector.extract_strided_slice %425 {offsets = [0, 256], sizes = [8, 128], strides = [1, 1]} : vector<8x512xf32> to vector<8x128xf32>
    %439 = math.tanh %438 : vector<8x128xf32>
    %440 = vector.extract_strided_slice %425 {offsets = [0, 384], sizes = [8, 128], strides = [1, 1]} : vector<8x512xf32> to vector<8x128xf32>
    %441 = arith.negf %440 : vector<8x128xf32>
    %442 = math.exp %441 : vector<8x128xf32>
    %cst_84 = arith.constant 1.000000e+00 : f32
    %443 = vector.broadcast %cst_84 : f32 to vector<8x128xf32>
    %444 = arith.addf %443, %442 : vector<8x128xf32>
    %445 = arith.divf %443, %444 : vector<8x128xf32>
    %446 = arith.mulf %437, %421 : vector<8x128xf32>
    %447 = arith.mulf %431, %439 : vector<8x128xf32>
    %448 = arith.addf %446, %447 : vector<8x128xf32>
    %449 = math.tanh %448 : vector<8x128xf32>
    %450 = arith.mulf %445, %449 : vector<8x128xf32>
    %cst_85 = arith.constant dense<0.000000e+00> : vector<8x512xf32>
    %451 = tpu.matmul %450, %2, %cst_85 {dimension_numbers = #tpu.dot_dimension_numbers<[1], [0], [0], [1], [0, 0, 1, 1], [], []>} : vector<8x128xf32>, vector<128x512xf32>, vector<8x512xf32> -> vector<8x512xf32>
    %452 = arith.addf %259, %451 : vector<8x512xf32>
    %453 = vector.extract_strided_slice %452 {offsets = [0, 0], sizes = [8, 128], strides = [1, 1]} : vector<8x512xf32> to vector<8x128xf32>
    %454 = arith.negf %453 : vector<8x128xf32>
    %455 = math.exp %454 : vector<8x128xf32>
    %cst_86 = arith.constant 1.000000e+00 : f32
    %456 = vector.broadcast %cst_86 : f32 to vector<8x128xf32>
    %457 = arith.addf %456, %455 : vector<8x128xf32>
    %458 = arith.divf %456, %457 : vector<8x128xf32>
    %459 = vector.extract_strided_slice %452 {offsets = [0, 128], sizes = [8, 128], strides = [1, 1]} : vector<8x512xf32> to vector<8x128xf32>
    %460 = arith.negf %459 : vector<8x128xf32>
    %461 = math.exp %460 : vector<8x128xf32>
    %cst_87 = arith.constant 1.000000e+00 : f32
    %462 = vector.broadcast %cst_87 : f32 to vector<8x128xf32>
    %463 = arith.addf %462, %461 : vector<8x128xf32>
    %464 = arith.divf %462, %463 : vector<8x128xf32>
    %465 = vector.extract_strided_slice %452 {offsets = [0, 256], sizes = [8, 128], strides = [1, 1]} : vector<8x512xf32> to vector<8x128xf32>
    %466 = math.tanh %465 : vector<8x128xf32>
    %467 = vector.extract_strided_slice %452 {offsets = [0, 384], sizes = [8, 128], strides = [1, 1]} : vector<8x512xf32> to vector<8x128xf32>
    %468 = arith.negf %467 : vector<8x128xf32>
    %469 = math.exp %468 : vector<8x128xf32>
    %cst_88 = arith.constant 1.000000e+00 : f32
    %470 = vector.broadcast %cst_88 : f32 to vector<8x128xf32>
    %471 = arith.addf %470, %469 : vector<8x128xf32>
    %472 = arith.divf %470, %471 : vector<8x128xf32>
    %473 = arith.mulf %464, %448 : vector<8x128xf32>
    %474 = arith.mulf %458, %466 : vector<8x128xf32>
    %475 = arith.addf %473, %474 : vector<8x128xf32>
    %476 = math.tanh %475 : vector<8x128xf32>
    %477 = arith.mulf %472, %476 : vector<8x128xf32>
    %c0_89 = arith.constant 0 : index
    %c0_90 = arith.constant 0 : index
    %478 = vector.load %arg7[%c0_89, %c0_90] : memref<128x128xf32, #tpu.memory_space<vmem>>, vector<128x128xf32>
    %cst_91 = arith.constant dense<0.000000e+00> : vector<8x128xf32>
    %479 = tpu.matmul %477, %478, %cst_91 {dimension_numbers = #tpu.dot_dimension_numbers<[1], [0], [0], [1], [0, 0, 1, 1], [], []>} : vector<8x128xf32>, vector<128x128xf32>, vector<8x128xf32> -> vector<8x128xf32>
    %c0_92 = arith.constant 0 : index
    %c0_93 = arith.constant 0 : index
    %480 = vector.load %arg8[%c0_92, %c0_93] : memref<1x128xf32, #tpu.memory_space<vmem>>, vector<1x128xf32>
    %481 = vector.broadcast %480 : vector<1x128xf32> to vector<8x128xf32>
    %482 = arith.addf %479, %481 : vector<8x128xf32>
    %cst_94 = arith.constant 0.000000e+00 : f32
    %483 = vector.broadcast %cst_94 : f32 to vector<8x128xf32>
    %484 = arith.maximumf %482, %483 : vector<8x128xf32>
    %c0_95 = arith.constant 0 : index
    %c0_96 = arith.constant 0 : index
    %485 = vector.load %arg9[%c0_95, %c0_96] : memref<128x128xf32, #tpu.memory_space<vmem>>, vector<128x128xf32>
    %cst_97 = arith.constant dense<0.000000e+00> : vector<8x128xf32>
    %486 = tpu.matmul %484, %485, %cst_97 {dimension_numbers = #tpu.dot_dimension_numbers<[1], [0], [0], [1], [0, 0, 1, 1], [], []>} : vector<8x128xf32>, vector<128x128xf32>, vector<8x128xf32> -> vector<8x128xf32>
    %c0_98 = arith.constant 0 : index
    %c0_99 = arith.constant 0 : index
    %487 = vector.load %arg10[%c0_98, %c0_99] : memref<1x128xf32, #tpu.memory_space<vmem>>, vector<1x128xf32>
    %488 = vector.broadcast %487 : vector<1x128xf32> to vector<8x128xf32>
    %489 = arith.addf %486, %488 : vector<8x128xf32>
    %c0_100 = arith.constant 0 : index
    %c0_101 = arith.constant 0 : index
    %490 = vector.load %arg11[%c0_100, %c0_101] : memref<8x128xf32, #tpu.memory_space<vmem>>, vector<8x128xf32>
    tpu.vector_store %arg11[%c0_100, %c0_101], %489 {strides = array<i32>} : memref<8x128xf32, #tpu.memory_space<vmem>>, vector<8x128xf32>,
    return
  }
}

</mosaic_0001>

<bundles_post_ra>
// kernel: tpu_custom_call.1
= control target key start
LH: loop header
LB: loop body
LE: loop exit
PB: predicated region body
PF: predicated region fallthrough
CT: control target
= control target key end

     0   :  { %16 = vsyncpa [#allocation3], 0  ;;  %s8424_s0 = inlined_call_operand.vmem [shape: f32[64,16], index: 0, kind: input, shape index: {}]   ;;  %s8425_s1 = inlined_call_operand.vmem [shape: f32[16,512], index: 1, kind: input, shape index: {}]   ;;  %s8426_s2 = inlined_call_operand.hbm [shape: f32[128,512], index: 2, kind: input, shape index: {}]   ;;  %s8427_s3 = inlined_call_operand.vmem [shape: f32[1,512], index: 3, kind: input, shape index: {}]   ;;  %s8428_s4 = inlined_call_operand.hbm [shape: f32[128,512], index: 4, kind: input, shape index: {}]   ;;  %s8429_s5 = inlined_call_operand.hbm [shape: f32[128,512], index: 5, kind: input, shape index: {}]   ;;  %s8430_s6 = inlined_call_operand.vmem [shape: f32[1,512], index: 6, kind: input, shape index: {}]   ;;  %s8431_s7 = inlined_call_operand.hbm [shape: f32[128,128], index: 7, kind: input, shape index: {}]   ;;  %s8432_s8 = inlined_call_operand.vmem [shape: f32[1,128], index: 8, kind: input, shape index: {}]   ;;  %s8433_s9 = inlined_call_operand.hbm [shape: f32[128,128], index: 9, kind: input, shape index: {}]   ;;  %s8434_s10 = inlined_call_operand.vmem [shape: f32[1,128], index: 10, kind: input, shape index: {}]   ;;  %s8435_s11 = inlined_call_operand.hbm [shape: f32[8,128], index: 11, kind: output, shape index: {}]  }
   0x1   :  { %17 = vsyncpa [#allocation6], 0 }
   0x2   :  { %18 = vsyncpa [#allocation9], 0 }
   0x3   :  { %19 = vsyncpa [#allocation4], 0  ;;  %s6970_s17 = smov [#allocation5]   ;;  %s6971_s19 = smov [#allocation8]  }
   0x4   :  { %s43_s18 = sshll.u32 %s6970_s17, 4  ;;  %s69_s20 = sshll.u32 %s6971_s19, 4  ;;  %s44_s18 = int_to_ptr.vmem [resolvable:$true] %s43_s18  ;;  %s7043_s20 = int_to_ptr.vmem [resolvable:$true] %s69_s20 }
   0x5   :  { %s6830_s23 = scalar_lea.hbm %s8428_s4, 8192 }
   0x6   :  { %p6831_p0 = scmp.ne.s32.totalorder %s8428_s4, %s6830_s23  ;;  %p6834_p1 = scmp.lt.u32.totalorder %s6830_s23, %s8428_s4 }
   0x8   :  { %p6836_p2 = pnand %p6834_p1, %p6831_p0 }
   0xa   :  { %6839 = shalt.err (!%p6836_p2)
}
   0xb   :  { %s6840_s28 = scalar_lea.vmem %s44_s18, 8192  ;;  %p6845_p4 = scmp.lt.s32.totalorder %s44_s18, %s44_s18 }
   0xc   :  { %p6841_p3 = scmp.ne.s32.totalorder %s44_s18, %s6840_s28  ;;  %p6846_p5 = scmp.lt.s32.totalorder %s6840_s28, %s6840_s28 }
   0xe   :  { %p6847_p6 = por %p6846_p5, %p6845_p4 }
  0x10   :  { %p6848_p7 = pnand %p6847_p6, %p6841_p3 }
  0x12   :  { %6851 = shalt.err (!%p6848_p7)
}
  0x13   :  { %s6972_s29 = smov 512   ;;  %s6973_s30 = smov 32  }
  0x14   :  { %49 = dma.hbm_to_vmem [thread:$0]  %s8428_s4, 8192, %s44_s18, [#allocation6], %s6972_s29, %s6972_s29, %s6973_s30  }
  0x15   :  { %s6852_s16 = scalar_lea.hbm %s8431_s7, 2048 }
  0x16   :  { %p6853_p8 = scmp.ne.s32.totalorder %s8431_s7, %s6852_s16  ;;  %p6856_p9 = scmp.lt.u32.totalorder %s6852_s16, %s8431_s7 }
  0x18   :  { %p6858_p10 = pnand %p6856_p9, %p6853_p8 }
  0x1a   :  { %6861 = shalt.err (!%p6858_p10)
}
  0x1b   :  { %s6862_s23 = scalar_lea.vmem %s7043_s20, 2048  ;;  %p6867_p12 = scmp.lt.s32.totalorder %s7043_s20, %s7043_s20 }
  0x1c   :  { %p6863_p11 = scmp.ne.s32.totalorder %s7043_s20, %s6862_s23  ;;  %p6868_p13 = scmp.lt.s32.totalorder %s6862_s23, %s6862_s23 }
  0x1e   :  { %p6869_p0 = por %p6868_p13, %p6867_p12 }
  0x20   :  { %p6870_p1 = pnand %p6869_p0, %p6863_p11 }
  0x22   :  { %6873 = shalt.err (!%p6870_p1)
}
  0x23   :  { %s6974_s4 = smov 128   ;;  %s6975_s18 = smov 8  }
  0x24   :  { %75 = dma.hbm_to_vmem [thread:$0]  %s8431_s7, 2048, %s7043_s20, [#allocation9], %s6974_s4, %s6974_s4, %s6975_s18  }
  0x25   :  { %s6976_s26 = smov [#allocation2]   ;;  %s6977_s28 = smov [#allocation7]  }
  0x26   :  { %s29_s27 = sshll.u32 %s6976_s26, 4  ;;  %s55_s12 = sshll.u32 %s6977_s28, 4  ;;  %s30_s27 = int_to_ptr.vmem [resolvable:$true] %s29_s27  ;;  %s7080_s12 = int_to_ptr.vmem [resolvable:$true] %s55_s12 }
  0x27   :  { %s6874_s15 = scalar_lea.hbm %s8426_s2, 8192 }
  0x28   :  { %p6875_p2 = scmp.ne.s32.totalorder %s8426_s2, %s6874_s15  ;;  %p6878_p3 = scmp.lt.u32.totalorder %s6874_s15, %s8426_s2 }
  0x2a   :  { %p6880_p4 = pnand %p6878_p3, %p6875_p2 }
  0x2c   :  { %6883 = shalt.err (!%p6880_p4)
}
  0x2d   :  { %s6884_s7 = scalar_lea.vmem %s30_s27, 8192  ;;  %p6889_p6 = scmp.lt.s32.totalorder %s30_s27, %s30_s27 }
  0x2e   :  { %p6885_p5 = scmp.ne.s32.totalorder %s30_s27, %s6884_s7  ;;  %p6890_p7 = scmp.lt.s32.totalorder %s6884_s7, %s6884_s7 }
  0x30   :  { %p6891_p8 = por %p6890_p7, %p6889_p6 }
  0x32   :  { %p6892_p9 = pnand %p6891_p8, %p6885_p5 }
  0x34   :  { %6895 = shalt.err (!%p6892_p9)
}
  0x35   :  { %35 = dma.hbm_to_vmem [thread:$0]  %s8426_s2, 8192, %s30_s27, [#allocation3], %s6972_s29, %s6972_s29, %s6973_s30  }
  0x36   :  { %s6896_s25 = scalar_lea.hbm %s8429_s5, 8192 }
  0x37   :  { %p6897_p10 = scmp.ne.s32.totalorder %s8429_s5, %s6896_s25  ;;  %p6900_p11 = scmp.lt.u32.totalorder %s6896_s25, %s8429_s5 }
  0x39   :  { %p6902_p12 = pnand %p6900_p11, %p6897_p10 }
  0x3b   :  { %6905 = shalt.err (!%p6902_p12)
}
  0x3c   :  { %s6906_s15 = scalar_lea.vmem %s7080_s12, 8192  ;;  %p6911_p0 = scmp.lt.s32.totalorder %s7080_s12, %s7080_s12 }
  0x3d   :  { %p6907_p13 = scmp.ne.s32.totalorder %s7080_s12, %s6906_s15  ;;  %p6912_p1 = scmp.lt.s32.totalorder %s6906_s15, %s6906_s15 }
  0x3f   :  { %p6913_p2 = por %p6912_p1, %p6911_p0 }
  0x41   :  { %p6914_p3 = pnand %p6913_p2, %p6907_p13 }
  0x43   :  { %6917 = shalt.err (!%p6914_p3)
}
  0x44   :  { %61 = dma.hbm_to_vmem [thread:$0]  %s8429_s5, 8192, %s7080_s12, [#allocation6], %s6972_s29, %s6972_s29, %s6973_s30  }
  0x45   :  { %s6978_s16 = smov [#allocation10]   ;;  %s6918_s7 = scalar_lea.hbm %s8433_s9, 2048 }
  0x46   :  { %s83_s17 = sshll.u32 %s6978_s16, 4  ;;  %p6919_p4 = scmp.ne.s32.totalorder %s8433_s9, %s6918_s7  ;;  %s84_s17 = int_to_ptr.vmem [resolvable:$true] %s83_s17 }
  0x47   :  { %p6922_p5 = scmp.lt.u32.totalorder %s6918_s7, %s8433_s9 }
  0x49   :  { %p6924_p6 = pnand %p6922_p5, %p6919_p4 }
  0x4b   :  { %6927 = shalt.err (!%p6924_p6)
}
  0x4c   :  { %s6928_s25 = scalar_lea.vmem %s84_s17, 2048  ;;  %p6933_p8 = scmp.lt.s32.totalorder %s84_s17, %s84_s17 }
  0x4d   :  { %p6929_p7 = scmp.ne.s32.totalorder %s84_s17, %s6928_s25  ;;  %p6934_p9 = scmp.lt.s32.totalorder %s6928_s25, %s6928_s25 }
  0x4f   :  { %p6935_p10 = por %p6934_p9, %p6933_p8 }
  0x51   :  { %p6936_p11 = pnand %p6935_p10, %p6929_p7 }
  0x53   :  { %6939 = shalt.err (!%p6936_p11)
}
  0x54   :  { %89 = dma.hbm_to_vmem [thread:$0]  %s8433_s9, 2048, %s84_s17, [#allocation9], %s6974_s4, %s6974_s4, %s6975_s18  }
  0x55   :  { %6962 = dma.done.wait [#allocation3], 8192  }
  0x56   :  { %6963 = vsyncadd [#allocation3], 4294959104 }
  0x57   :  { %6964 = dma.done.wait [#allocation6], 16384  }
  0x58   :  { %6965 = vsyncadd [#allocation6], 4294950912 }
  0x59   :  { %6966 = dma.done.wait [#allocation9], 4096  }
  0x5a   :  { %6967 = vsyncadd [#allocation9], 4294963200  ;;  %v8436_v0 = vmov 0.0   ;;  %v309_v1 = vld [vmem:[%s8425_s1 + $0x8] sm:$0xff]  ;;  %v311_v3 = vld [vmem:[%s8425_s1 + $0x18] sm:$0xff]  ;;  %vm338_vm0 = vcmask 130048  }
  0x5b   :  { %427 = vmatprep.mubr.f32.mxu0 %v8436_v0  ;;  %540 = vmatprep.mubr.f32.mxu1 %v8436_v0  ;;  %v313_v2 = vld [vmem:[%s8425_s1 + $0x28] sm:$0xff]  ;;  %v315_v5 = vld [vmem:[%s8425_s1 + $0x38] sm:$0xff]  ;;  %v308_v6 = vld [vmem:[%s8425_s1] sm:$0xff]  ;;  %vm6981_vm1 = vmmov 0   ;;  %s6982_s16 = smov [#allocation11]  }
  0x5c   :  { %v4841_v4 = vpack.c.bf16 %v313_v2, %v309_v1  ;;  %v312_v7 = vld [vmem:[%s8425_s1 + $0x20] sm:$0xff]  ;;  %v4845_v8 = vpack.c.bf16 %v315_v5, %v311_v3  ;;  %v310_v10 = vld [vmem:[%s8425_s1 + $0x10] sm:$0xff]  ;;  %v108_v14 = vld [vmem:[#allocation2 + $0x8] sm:$0xff]  ;;  %s4660_s17 = sshll.u32 %s6982_s16, 4  ;;  %s4661_s17 = int_to_ptr.vmem [resolvable:$true] %s4660_s17 }
  0x5d   :  { %v4843_v9 = vpack.c.bf16 %v312_v7, %v308_v6  ;;  %v314_v11 = vld [vmem:[%s8425_s1 + $0x30] sm:$0xff]  ;;  %v300_v12 = vld [vmem:[%s8424_s0] sm:$0xff]  ;;  %v112_v15 = vld [vmem:[#allocation2 + $0x28] sm:$0xff]  ;;  %s6940_s19 = scalar_lea.vmem %s4661_s17, 128  ;;  %p6945_p13 = scmp.lt.s32.totalorder %s4661_s17, %s4661_s17 }
  0x5e   :  { %4842 = vmatprep.subr.bf16.mxu0 %v4841_v4  ;;  %v4847_v13 = vpack.c.bf16 %v314_v11, %v310_v10  ;;  %v110_v16 = vld [vmem:[#allocation2 + $0x18] sm:$0xff]  ;;  %4846 = vmatprep.subr.bf16.mxu1 %v4845_v8  ;;  %v7161_v17 = vpack.c.bf16 %v112_v15, %v108_v14  ;;  %v107_v19 = vld [vmem:[#allocation2] sm:$0xff]  ;;  %v109_v23 = vld [vmem:[#allocation2 + $0x10] sm:$0xff]  ;;  %p6941_p12 = scmp.ne.s32.totalorder %s4661_s17, %s6940_s19  ;;  %p6946_p0 = scmp.lt.s32.totalorder %s6940_s19, %s6940_s19 }
  0x5f   :  { %4844 = vmatpush1.bf16.msra.mxu0 %v4843_v9  ;;  %v114_v18 = vld [vmem:[#allocation2 + $0x38] sm:$0xff]  ;;  %v111_v20 = vld [vmem:[#allocation2 + $0x20] sm:$0xff]  ;;  %v113_v24 = vld [vmem:[#allocation2 + $0x30] sm:$0xff] }
  0x60   :  { %8492 = vst [vmem:[#allocation16_spill] sm:$0xff] %v7161_v17  ;;  %4848 = vmatpush1.bf16.msra.mxu1 %v4847_v13  ;;  %v7163_v21 = vpack.c.bf16 %v114_v18, %v110_v16  ;;  %v7165_v22 = vpack.c.bf16 %v111_v20, %v107_v19  ;;  %4850 = vmatprep.subr.bf16.mxu0 %v7161_v17  ;;  %v116_v26 = vld [vmem:[#allocation2 + $0x48] sm:$0xff]  ;;  %v118_v28 = vld [vmem:[#allocation2 + $0x58] sm:$0xff]  ;;  %v115_v31 = vld [vmem:[#allocation2 + $0x40] sm:$0xff]  ;;  %p6947_p1 = por %p6946_p0, %p6945_p13 }
  0x61   :  { %v7168_v25 = vpack.c.bf16 %v113_v24, %v109_v23  ;;  %v120_v27 = vld [vmem:[#allocation2 + $0x68] sm:$0xff]  ;;  %v122_v30 = vld [vmem:[#allocation2 + $0x78] sm:$0xff]  ;;  %v119_v32 = vld [vmem:[#allocation2 + $0x60] sm:$0xff] }
  0x62   :  { %8493 = vst [vmem:[#allocation17_spill] sm:$0xff] %v7163_v21  ;;  %4671 = vmatmul.mubr.msk.f32.vlgmr.msra.gmra.mrb[0].mxu0 %vm338_vm0, %v300_v12  ;;  %4882 = vmatprep.subr.bf16.mxu1 %v7163_v21  ;;  %v7172_v29 = vpack.c.bf16 %v120_v27, %v116_v26  ;;  %v301_v33 = vld [vmem:[%s8424_s0 + $0x8] sm:$0xff]  ;;  %v7179_v34 = vpack.c.bf16 %v122_v30, %v118_v28  ;;  %v117_v36 = vld [vmem:[#allocation2 + $0x50] sm:$0xff]  ;;  %v126_v41 = vld [vmem:[#allocation2 + $0x98] sm:$0xff]  ;;  %p6948_p2 = pnand %p6947_p1, %p6941_p12 }
  0x63   :  { %4679 = vmatmul.mubr.msk.f32.vlgmr.msra.gmra.mrb[0].mxu1 %vm338_vm0, %v300_v12  ;;  %4852 = vmatpush1.bf16.msra.mxu0 %v7165_v22  ;;  %v7181_v35 = vpack.c.bf16 %v119_v32, %v115_v31  ;;  %v121_v37 = vld [vmem:[#allocation2 + $0x70] sm:$0xff]  ;;  %v124_v39 = vld [vmem:[#allocation2 + $0x88] sm:$0xff]  ;;  %v130_v43 = vld [vmem:[#allocation2 + $0xb8] sm:$0xff] }
  0x64   :  { %4884 = vmatpush1.bf16.msra.mxu1 %v7168_v25  ;;  %433 = vmatprep.mubr.f32.mxu0 %v8436_v0  ;;  %v7185_v38 = vpack.c.bf16 %v121_v37, %v117_v36  ;;  %v128_v40 = vld [vmem:[#allocation2 + $0xa8] sm:$0xff]  ;;  %v123_v44 = vld [vmem:[#allocation2 + $0x80] sm:$0xff]  ;;  %v302_v46 = vld [vmem:[%s8424_s0 + $0x10] sm:$0xff]  ;;  %v7196_v47 = vpack.c.bf16 %v130_v43, %v126_v41 }
  0x65   :  { %546 = vmatprep.mubr.f32.mxu1 %v8436_v0  ;;  %4854 = vmatprep.subr.bf16.mxu0 %v7172_v29  ;;  %v7189_v42 = vpack.c.bf16 %v128_v40, %v124_v39  ;;  %v127_v45 = vld [vmem:[#allocation2 + $0xa0] sm:$0xff]  ;;  %v125_v48 = vld [vmem:[#allocation2 + $0x90] sm:$0xff]  ;;  %v132_v51 = vld [vmem:[#allocation2 + $0xc8] sm:$0xff] }
  0x66   :  { %4672 = vmatmul.mubr.msk.f32.gmra.mrb[2].mxu0 %vm338_vm0, %v301_v33  ;;  %4886 = vmatprep.subr.bf16.mxu1 %v7179_v34  ;;  %v129_v49 = vld [vmem:[#allocation2 + $0xb0] sm:$0xff]  ;;  %v7200_v50 = vpack.c.bf16 %v127_v45, %v123_v44  ;;  %v136_v52 = vld [vmem:[#allocation2 + $0xe8] sm:$0xff]  ;;  %v134_v53 = vld [vmem:[#allocation2 + $0xd8] sm:$0xff] }
  0x67   :  { %4680 = vmatmul.mubr.msk.f32.gmra.mrb[2].mxu1 %vm338_vm0, %v301_v33  ;;  %4856 = vmatpush1.bf16.msra.mxu0 %v7181_v35  ;;  %v7204_v54 = vpack.c.bf16 %v129_v49, %v125_v48  ;;  %v138_v55 = vld [vmem:[#allocation2 + $0xf8] sm:$0xff]  ;;  %v131_v56 = vld [vmem:[#allocation2 + $0xc0] sm:$0xff]  ;;  %v7208_v58 = vpack.c.bf16 %v136_v52, %v132_v51  ;;  %v133_v59 = vld [vmem:[#allocation2 + $0xd0] sm:$0xff] }
  0x68   :  { %4888 = vmatpush1.bf16.msra.mxu1 %v7185_v38  ;;  %439 = vmatprep.mubr.f32.mxu0 %v8436_v0  ;;  %v135_v57 = vld [vmem:[#allocation2 + $0xe0] sm:$0xff]  ;;  %v137_v60 = vld [vmem:[#allocation2 + $0xf0] sm:$0xff]  ;;  %v7212_v61 = vpack.c.bf16 %v138_v55, %v134_v53  ;;  %v140_v62 = vld [vmem:[#allocation2 + $0x108] sm:$0xff] }
  0x69   :  { %552 = vmatprep.mubr.f32.mxu1 %v8436_v0  ;;  %4858 = vmatprep.subr.bf16.mxu0 %v7189_v42  ;;  %v144_v63 = vld [vmem:[#allocation2 + $0x128] sm:$0xff]  ;;  %v303_v1 = vld [vmem:[%s8424_s0 + $0x18] sm:$0xff]  ;;  %v7219_v2 = vpack.c.bf16 %v135_v57, %v131_v56  ;;  %v7223_v5 = vpack.c.bf16 %v137_v60, %v133_v59  ;;  %v139_v6 = vld [vmem:[#allocation2 + $0x100] sm:$0xff] }
  0x6a   :  { %4673 = vmatmul.mubr.msk.f32.gmra.mrb[4].mxu0 %vm338_vm0, %v302_v46  ;;  %4890 = vmatprep.subr.bf16.mxu1 %v7196_v47  ;;  %v142_v3 = vld [vmem:[#allocation2 + $0x118] sm:$0xff]  ;;  %v143_v7 = vld [vmem:[#allocation2 + $0x120] sm:$0xff]  ;;  %v7227_v8 = vpack.c.bf16 %v144_v63, %v140_v62  ;;  %v141_v9 = vld [vmem:[#allocation2 + $0x110] sm:$0xff] }
  0x6b   :  { %4681 = vmatmul.mubr.msk.f32.gmra.mrb[4].mxu1 %vm338_vm0, %v302_v46  ;;  %4860 = vmatpush1.bf16.msra.mxu0 %v7200_v50  ;;  %v146_v4 = vld [vmem:[#allocation2 + $0x138] sm:$0xff]  ;;  %v145_v10 = vld [vmem:[#allocation2 + $0x130] sm:$0xff]  ;;  %v148_v12 = vld [vmem:[#allocation2 + $0x148] sm:$0xff]  ;;  %v7238_v15 = vpack.c.bf16 %v143_v7, %v139_v6 }
  0x6c   :  { %4892 = vmatpush1.bf16.msra.mxu1 %v7204_v54  ;;  %445 = vmatprep.mubr.f32.mxu0 %v8436_v0  ;;  %v7231_v11 = vpack.c.bf16 %v146_v4, %v142_v3  ;;  %v152_v13 = vld [vmem:[#allocation2 + $0x168] sm:$0xff]  ;;  %v304_v14 = vld [vmem:[%s8424_s0 + $0x20] sm:$0xff]  ;;  %v150_v16 = vld [vmem:[#allocation2 + $0x158] sm:$0xff]  ;;  %v7242_v19 = vpack.c.bf16 %v145_v10, %v141_v9 }
  0x6d   :  { %558 = vmatprep.mubr.f32.mxu1 %v8436_v0  ;;  %4862 = vmatprep.subr.bf16.mxu0 %v7208_v58  ;;  %v154_v18 = vld [vmem:[#allocation2 + $0x178] sm:$0xff]  ;;  %v147_v20 = vld [vmem:[#allocation2 + $0x140] sm:$0xff]  ;;  %v7246_v24 = vpack.c.bf16 %v152_v13, %v148_v12  ;;  %v149_v26 = vld [vmem:[#allocation2 + $0x150] sm:$0xff] }
  0x6e   :  { %4674 = vmatmul.mubr.msk.f32.gmra.mrb[6].mxu0 %vm338_vm0, %v303_v1  ;;  %4894 = vmatprep.subr.bf16.mxu1 %v7212_v61  ;;  %v151_v23 = vld [vmem:[#allocation2 + $0x160] sm:$0xff]  ;;  %v153_v27 = vld [vmem:[#allocation2 + $0x170] sm:$0xff]  ;;  %v7250_v28 = vpack.c.bf16 %v154_v18, %v150_v16  ;;  %v156_v30 = vld [vmem:[#allocation2 + $0x188] sm:$0xff] }
  0x6f   :  { %4682 = vmatmul.mubr.msk.f32.gmra.mrb[6].mxu1 %vm338_vm0, %v303_v1  ;;  %4864 = vmatpush1.bf16.msra.mxu0 %v7219_v2  ;;  %v160_v31 = vld [vmem:[#allocation2 + $0x1a8] sm:$0xff]  ;;  %v7257_v33 = vpack.c.bf16 %v151_v23, %v147_v20  ;;  %v158_v36 = vld [vmem:[#allocation2 + $0x198] sm:$0xff]  ;;  %v7261_v39 = vpack.c.bf16 %v153_v27, %v149_v26  ;;  %v155_v40 = vld [vmem:[#allocation2 + $0x180] sm:$0xff] }
  0x70   :  { %4896 = vmatpush1.bf16.msra.mxu1 %v7223_v5  ;;  %451 = vmatprep.mubr.f32.mxu0 %v8436_v0  ;;  %v305_v32 = vld [vmem:[%s8424_s0 + $0x28] sm:$0xff]  ;;  %v162_v37 = vld [vmem:[#allocation2 + $0x1b8] sm:$0xff]  ;;  %v159_v41 = vld [vmem:[#allocation2 + $0x1a0] sm:$0xff]  ;;  %v7265_v43 = vpack.c.bf16 %v160_v31, %v156_v30 }
  0x71   :  { %564 = vmatprep.mubr.f32.mxu1 %v8436_v0  ;;  %4866 = vmatprep.subr.bf16.mxu0 %v7227_v8  ;;  %v157_v44 = vld [vmem:[#allocation2 + $0x190] sm:$0xff]  ;;  %v7269_v46 = vpack.c.bf16 %v162_v37, %v158_v36  ;;  %v164_v48 = vld [vmem:[#allocation2 + $0x1c8] sm:$0xff]  ;;  %v7276_v52 = vpack.c.bf16 %v159_v41, %v155_v40  ;;  %v166_v53 = vld [vmem:[#allocation2 + $0x1d8] sm:$0xff] }
  0x72   :  { %4675 = vmatmul.mubr.msk.f32.gmra.mrb[8].mxu0 %vm338_vm0, %v304_v14  ;;  %4898 = vmatprep.subr.bf16.mxu1 %v7231_v11  ;;  %v161_v45 = vld [vmem:[#allocation2 + $0x1b0] sm:$0xff]  ;;  %v168_v49 = vld [vmem:[#allocation2 + $0x1e8] sm:$0xff]  ;;  %v170_v55 = vld [vmem:[#allocation2 + $0x1f8] sm:$0xff] }
  0x73   :  { %4683 = vmatmul.mubr.msk.f32.gmra.mrb[8].mxu1 %vm338_vm0, %v304_v14  ;;  %4868 = vmatpush1.bf16.msra.mxu0 %v7238_v15  ;;  %v306_v51 = vld [vmem:[%s8424_s0 + $0x30] sm:$0xff]  ;;  %v7280_v56 = vpack.c.bf16 %v161_v45, %v157_v44  ;;  %v163_v57 = vld [vmem:[#allocation2 + $0x1c0] sm:$0xff]  ;;  %v7284_v60 = vpack.c.bf16 %v168_v49, %v164_v48  ;;  %v7288_v1 = vpack.c.bf16 %v170_v55, %v166_v53  ;;  %v307_v3 = vld [vmem:[%s8424_s0 + $0x38] sm:$0xff] }
  0x74   :  { %4900 = vmatpush1.bf16.msra.mxu1 %v7242_v19  ;;  %457 = vmatprep.mubr.f32.mxu0 %v8436_v0  ;;  %v167_v59 = vld [vmem:[#allocation2 + $0x1e0] sm:$0xff]  ;;  %v165_v62 = vld [vmem:[#allocation2 + $0x1d0] sm:$0xff]  ;;  %v172_v7 = vld [vmem:[#allocation5 + $0x8] sm:$0xff] }
  0x75   :  { %570 = vmatprep.mubr.f32.mxu1 %v8436_v0  ;;  %4870 = vmatprep.subr.bf16.mxu0 %v7246_v24  ;;  %v169_v63 = vld [vmem:[#allocation2 + $0x1f0] sm:$0xff]  ;;  %v7295_v4 = vpack.c.bf16 %v167_v59, %v163_v57  ;;  %v176_v9 = vld [vmem:[#allocation5 + $0x28] sm:$0xff]  ;;  %v174_v10 = vld [vmem:[#allocation5 + $0x18] sm:$0xff] }
  0x76   :  { %4676 = vmatmul.mubr.msk.f32.gmra.mrb[10].mxu0 %vm338_vm0, %v305_v32  ;;  %4902 = vmatprep.subr.bf16.mxu1 %v7250_v28  ;;  %v7299_v6 = vpack.c.bf16 %v169_v63, %v165_v62  ;;  %v7314_v12 = vpack.c.bf16 %v176_v9, %v172_v7  ;;  %v178_v13 = vld [vmem:[#allocation5 + $0x38] sm:$0xff]  ;;  %v171_v14 = vld [vmem:[#allocation5] sm:$0xff]  ;;  %v173_v23 = vld [vmem:[#allocation5 + $0x10] sm:$0xff] }
  0x77   :  { %4684 = vmatmul.mubr.msk.f32.gmra.mrb[10].mxu1 %vm338_vm0, %v305_v32  ;;  %4872 = vmatpush1.bf16.msra.mxu0 %v7257_v33  ;;  %v175_v16 = vld [vmem:[#allocation5 + $0x20] sm:$0xff]  ;;  %v7316_v18 = vpack.c.bf16 %v178_v13, %v174_v10  ;;  %v177_v26 = vld [vmem:[#allocation5 + $0x30] sm:$0xff]  ;;  %v180_v30 = vld [vmem:[#allocation5 + $0x48] sm:$0xff] }
  0x78   :  { %4904 = vmatpush1.bf16.msra.mxu1 %v7261_v39  ;;  %463 = vmatprep.mubr.f32.mxu0 %v8436_v0  ;;  %v7318_v20 = vpack.c.bf16 %v175_v16, %v171_v14  ;;  %v7321_v27 = vpack.c.bf16 %v177_v26, %v173_v23  ;;  %v184_v31 = vld [vmem:[#allocation5 + $0x68] sm:$0xff]  ;;  %v182_v32 = vld [vmem:[#allocation5 + $0x58] sm:$0xff]  ;;  %v179_v40 = vld [vmem:[#allocation5 + $0x40] sm:$0xff] }
  0x79   :  { %576 = vmatprep.mubr.f32.mxu1 %v8436_v0  ;;  %4874 = vmatprep.subr.bf16.mxu0 %v7265_v43  ;;  %v7326_v36 = vpack.c.bf16 %v184_v31, %v180_v30  ;;  %v186_v37 = vld [vmem:[#allocation5 + $0x78] sm:$0xff]  ;;  %v183_v41 = vld [vmem:[#allocation5 + $0x60] sm:$0xff]  ;;  %v181_v48 = vld [vmem:[#allocation5 + $0x50] sm:$0xff] }
  0x7a   :  { %4677 = vmatmul.mubr.msk.f32.gmra.mrb[12].mxu0 %vm338_vm0, %v306_v51  ;;  %4906 = vmatprep.subr.bf16.mxu1 %v7269_v46  ;;  %v7328_v44 = vpack.c.bf16 %v186_v37, %v182_v32  ;;  %v7330_v45 = vpack.c.bf16 %v183_v41, %v179_v40  ;;  %v185_v49 = vld [vmem:[#allocation5 + $0x70] sm:$0xff]  ;;  %v188_v53 = vld [vmem:[#allocation5 + $0x88] sm:$0xff]  ;;  %v190_v57 = vld [vmem:[#allocation5 + $0x98] sm:$0xff] }
  0x7b   :  { %4685 = vmatmul.mubr.msk.f32.gmra.mrb[12].mxu1 %vm338_vm0, %v306_v51  ;;  %4876 = vmatpush1.bf16.msra.mxu0 %v7276_v52  ;;  %v7333_v51 = vpack.c.bf16 %v185_v49, %v181_v48  ;;  %v192_v55 = vld [vmem:[#allocation5 + $0xa8] sm:$0xff]  ;;  %v194_v62 = vld [vmem:[#allocation5 + $0xb8] sm:$0xff]  ;;  %v187_v63 = vld [vmem:[#allocation5 + $0x80] sm:$0xff] }
  0x7c   :  { %4908 = vmatpush1.bf16.msra.mxu1 %v7280_v56  ;;  %469 = vmatprep.mubr.f32.mxu0 %v8436_v0  ;;  %v7338_v59 = vpack.c.bf16 %v192_v55, %v188_v53  ;;  %v7340_v7 = vpack.c.bf16 %v194_v62, %v190_v57  ;;  %v189_v10 = vld [vmem:[#allocation5 + $0x90] sm:$0xff]  ;;  %v196_v16 = vld [vmem:[#allocation5 + $0xc8] sm:$0xff]  ;;  %v198_v26 = vld [vmem:[#allocation5 + $0xd8] sm:$0xff] }
  0x7d   :  { %582 = vmatprep.mubr.f32.mxu1 %v8436_v0  ;;  %4878 = vmatprep.subr.bf16.mxu0 %v7284_v60  ;;  %v193_v13 = vld [vmem:[#allocation5 + $0xb0] sm:$0xff]  ;;  %v200_v23 = vld [vmem:[#allocation5 + $0xe8] sm:$0xff]  ;;  %v202_v31 = vld [vmem:[#allocation5 + $0xf8] sm:$0xff] }
  0x7e   :  { %4678 = vmatmul.mubr.msk.f32.gmra.mrb[14].mxu0 %vm338_vm0, %v307_v3  ;;  %4910 = vmatprep.subr.bf16.mxu1 %v7288_v1  ;;  %v7345_v14 = vpack.c.bf16 %v193_v13, %v189_v10  ;;  %v7350_v30 = vpack.c.bf16 %v200_v23, %v196_v16  ;;  %v195_v32 = vld [vmem:[#allocation5 + $0xc0] sm:$0xff]  ;;  %v7352_v40 = vpack.c.bf16 %v202_v31, %v198_v26  ;;  %v197_v48 = vld [vmem:[#allocation5 + $0xd0] sm:$0xff]  ;;  %v204_v55 = vld [vmem:[#allocation5 + $0x108] sm:$0xff] }
  0x7f   :  { %4686 = vmatmul.mubr.msk.f32.gmra.mrb[14].mxu1 %vm338_vm0, %v307_v3  ;;  %4880 = vmatpush1.bf16.msra.mxu0 %v7295_v4  ;;  %v191_v3 = vld [vmem:[#allocation5 + $0xa0] sm:$0xff]  ;;  %v201_v49 = vld [vmem:[#allocation5 + $0xf0] sm:$0xff]  ;;  %v208_v57 = vld [vmem:[#allocation5 + $0x128] sm:$0xff] }
  0x80   :  { %4912 = vmatpush1.bf16.msra.mxu1 %v7299_v6  ;;  %653 = vmatprep.mubr.f32.mxu0 %v8436_v0  ;;  %v7342_v9 = vpack.c.bf16 %v191_v3, %v187_v63  ;;  %v199_v37 = vld [vmem:[#allocation5 + $0xe0] sm:$0xff]  ;;  %8494 = vst [vmem:[#allocation18_spill] sm:$0xff] %v7352_v40  ;;  %v7357_v53 = vpack.c.bf16 %v201_v49, %v197_v48  ;;  %v206_v62 = vld [vmem:[#allocation5 + $0x118] sm:$0xff]  ;;  %v205_v26 = vld [vmem:[#allocation5 + $0x110] sm:$0xff] }
  0x81   :  { %724 = vmatprep.mubr.f32.mxu1 %v8436_v0  ;;  %4914 = vmatprep.subr.bf16.mxu0 %v7314_v12  ;;  %v7354_v41 = vpack.c.bf16 %v199_v37, %v195_v32  ;;  %v7362_v63 = vpack.c.bf16 %v208_v57, %v204_v55  ;;  %v210_v3 = vld [vmem:[#allocation5 + $0x138] sm:$0xff]  ;;  %v203_v10 = vld [vmem:[#allocation5 + $0x100] sm:$0xff]  ;;  %v209_v31 = vld [vmem:[#allocation5 + $0x130] sm:$0xff] }
  0x82   :  { %654 = vmatmul.mubr.f32.vlgmr.msra.gmra.mrb[0].mxu0 %v8436_v0  ;;  %4946 = vmatprep.subr.bf16.mxu1 %v7316_v18  ;;  %8496 = vst [vmem:[#allocation20_spill] sm:$0xff] %v7357_v53  ;;  %v207_v13 = vld [vmem:[#allocation5 + $0x120] sm:$0xff]  ;;  %v7364_v16 = vpack.c.bf16 %v210_v3, %v206_v62  ;;  %v7369_v32 = vpack.c.bf16 %v209_v31, %v205_v26  ;;  %v212_v37 = vld [vmem:[#allocation5 + $0x148] sm:$0xff]  ;;  %v214_v49 = vld [vmem:[#allocation5 + $0x158] sm:$0xff] }
  0x83   :  { %725 = vmatmul.mubr.f32.vlgmr.msra.gmra.mrb[0].mxu1 %v8436_v0  ;;  %844 = vmatprep.mubr.f32.mxu0 %v8436_v0  ;;  %8495 = vst [vmem:[#allocation19_spill] sm:$0xff] %v7354_v41  ;;  %8497 = vst [vmem:[#allocation21_spill] sm:$0xff] %v7362_v63  ;;  %v7366_v23 = vpack.c.bf16 %v207_v13, %v203_v10  ;;  %v216_v48 = vld [vmem:[#allocation5 + $0x168] sm:$0xff]  ;;  %v218_v57 = vld [vmem:[#allocation5 + $0x178] sm:$0xff] }
  0x84   :  { %915 = vmatprep.mubr.f32.mxu1 %v8436_v0  ;;  %4916 = vmatpush1.bf16.msra.mxu0 %v7318_v20  ;;  %8498 = vst [vmem:[#allocation22_spill] sm:$0xff] %v7364_v16  ;;  %8500 = vst [vmem:[#allocation24_spill] sm:$0xff] %v7369_v32  ;;  %v7374_v55 = vpack.c.bf16 %v216_v48, %v212_v37  ;;  %v211_v62 = vld [vmem:[#allocation5 + $0x140] sm:$0xff]  ;;  %v7376_v10 = vpack.c.bf16 %v218_v57, %v214_v49  ;;  %v213_v26 = vld [vmem:[#allocation5 + $0x150] sm:$0xff] }
  0x85   :  { %4948 = vmatpush1.bf16.msra.mxu1 %v7321_v27  ;;  %4918 = vmatprep.subr.bf16.mxu0 %v7326_v36  ;;  %8499 = vst [vmem:[#allocation23_spill] sm:$0xff] %v7366_v23  ;;  %v215_v3 = vld [vmem:[#allocation5 + $0x160] sm:$0xff]  ;;  %v217_v31 = vld [vmem:[#allocation5 + $0x170] sm:$0xff]  ;;  %v220_v0 = vld [vmem:[#allocation5 + $0x188] sm:$0xff] }
  0x86   :  { %4950 = vmatprep.subr.bf16.mxu1 %v7328_v44  ;;  %8501 = vst [vmem:[#allocation25_spill] sm:$0xff] %v7374_v55  ;;  %8502 = vst [vmem:[#allocation26_spill] sm:$0xff] %v7376_v10  ;;  %v7378_v13 = vpack.c.bf16 %v215_v3, %v211_v62  ;;  %v219_v49 = vld [vmem:[#allocation5 + $0x180] sm:$0xff]  ;;  %v221_v62 = vld [vmem:[#allocation5 + $0x190] sm:$0xff] }
  0x87   :  { %v223_v57 = vld [vmem:[#allocation5 + $0x1a0] sm:$0xff] }
  0x88   :  { %4920 = vmatpush1.bf16.msra.mxu0 %v7330_v45  ;;  %8503 = vst [vmem:[#allocation27_spill] sm:$0xff] %v7378_v13  ;;  %v7390_v3 = vpack.c.bf16 %v223_v57, %v219_v49  ;;  %v233_v49 = vld [vmem:[#allocation5 + $0x1f0] sm:$0xff] }
  0x89   :  { %4952 = vmatpush1.bf16.msra.mxu1 %v7333_v51  ;;  %4922 = vmatprep.subr.bf16.mxu0 %v7338_v59 }
  0x8a   :  { %4954 = vmatprep.subr.bf16.mxu1 %v7340_v7  ;;  %8507 = vst [vmem:[#allocation31_spill] sm:$0xff] %v7390_v3 }
  0x8c   :  { %4924 = vmatpush1.bf16.msra.mxu0 %v7342_v9 }
  0x8d   :  { %4956 = vmatpush1.bf16.msra.mxu1 %v7345_v14  ;;  %4926 = vmatprep.subr.bf16.mxu0 %v7350_v30 }
  0x8e   :  { %4958 = vmatprep.subr.bf16.mxu1 %v7352_v40 }
  0x90   :  { %4928 = vmatpush1.bf16.msra.mxu0 %v7354_v41 }
  0x91   :  { %4960 = vmatpush1.bf16.msra.mxu1 %v7357_v53  ;;  %4930 = vmatprep.subr.bf16.mxu0 %v7362_v63  ;;  %v222_v63 = vld [vmem:[#allocation5 + $0x198] sm:$0xff] }
  0x92   :  { %4962 = vmatprep.subr.bf16.mxu1 %v7364_v16  ;;  %v224_v16 = vld [vmem:[#allocation5 + $0x1a8] sm:$0xff]  ;;  %v226_v53 = vld [vmem:[#allocation5 + $0x1b8] sm:$0xff] }
  0x93   :  { %v7385_v37 = vpack.c.bf16 %v224_v16, %v220_v0  ;;  %v7387_v48 = vpack.c.bf16 %v226_v53, %v222_v63  ;;  %v230_v53 = vld [vmem:[#allocation5 + $0x1d8] sm:$0xff]  ;;  %v227_v16 = vld [vmem:[#allocation5 + $0x1c0] sm:$0xff] }
  0x94   :  { %4932 = vmatpush1.bf16.msra.mxu0 %v7366_v23  ;;  %v7381_v23 = vpack.c.bf16 %v217_v31, %v213_v26  ;;  %v225_v26 = vld [vmem:[#allocation5 + $0x1b0] sm:$0xff]  ;;  %v228_v31 = vld [vmem:[#allocation5 + $0x1c8] sm:$0xff]  ;;  %v234_v63 = vld [vmem:[#allocation5 + $0x1f8] sm:$0xff] }
  0x95   :  { %4964 = vmatpush1.bf16.msra.mxu1 %v7369_v32  ;;  %4934 = vmatprep.subr.bf16.mxu0 %v7374_v55  ;;  %8505 = vst [vmem:[#allocation29_spill] sm:$0xff] %v7385_v37  ;;  %8506 = vst [vmem:[#allocation30_spill] sm:$0xff] %v7387_v48  ;;  %v232_v55 = vld [vmem:[#allocation5 + $0x1e8] sm:$0xff]  ;;  %v231_v32 = vld [vmem:[#allocation5 + $0x1e0] sm:$0xff] }
  0x96   :  { %8504 = vst [vmem:[#allocation28_spill] sm:$0xff] %v7381_v23  ;;  %4966 = vmatprep.subr.bf16.mxu1 %v7376_v10  ;;  %v7394_v10 = vpack.c.bf16 %v225_v26, %v221_v62  ;;  %v7396_v0 = vpack.c.bf16 %v232_v55, %v228_v31  ;;  %v7401_v57 = vpack.c.bf16 %v231_v32, %v227_v16  ;;  %v318_v55 = vlaneseq }
  0x98   :  { %4936 = vmatpush1.bf16.msra.mxu0 %v7378_v13  ;;  %8508 = vst [vmem:[#allocation32_spill] sm:$0xff] %v7394_v10  ;;  %8509 = vst [vmem:[#allocation33_spill] sm:$0xff] %v7396_v0  ;;  %v7398_v13 = vpack.c.bf16 %v234_v63, %v230_v53  ;;  %v7412_v26 = vshrl.u32 %v318_v55, 7 }
  0x99   :  { %4968 = vmatpush1.bf16.msra.mxu1 %v7381_v23  ;;  %4938 = vmatprep.subr.bf16.mxu0 %v7385_v37  ;;  %v229_v23 = vld [vmem:[#allocation5 + $0x1d0] sm:$0xff]  ;;  %8511 = vst [vmem:[#allocation35_spill] sm:$0xff] %v7401_v57 }
  0x9a   :  { %4970 = vmatprep.subr.bf16.mxu1 %v7387_v48  ;;  %8510 = vst [vmem:[#allocation34_spill] sm:$0xff] %v7398_v13  ;;  %v7405_v62 = vpack.c.bf16 %v233_v49, %v229_v23  ;;  %8513 = vst [vmem:[#allocation37_spill] sm:$0xff] %v7412_v26  ;;  %v8468_v32 = vsub.s32 0, %v7412_v26  ;;  %v316_v23 = vld [vmem:[%s8427_s3] sm:$0xf]  ;;  %v8469_v31 = vsub.s32 1, %v7412_v26 }
  0x9b   :  { %v8476_v49 = vsub.s32 3, %v7412_v26 }
  0x9c   :  { %4940 = vmatpush1.bf16.msra.mxu0 %v7390_v3  ;;  %8512 = vst [vmem:[#allocation36_spill] sm:$0xff] %v7405_v62  ;;  %v7421_v53 = vrot.slane %v316_v23, %v8468_v32  ;;  %v7425_v63 = vrot.slane %v316_v23, %v8469_v31  ;;  %v8485_v31 = vsub.s32 2, %v7412_v26 }
  0x9d   :  { %4972 = vmatpush1.bf16.msra.mxu1 %v7394_v10  ;;  %4942 = vmatprep.subr.bf16.mxu0 %v7396_v0  ;;  %v7432_v32 = vrot.slane %v316_v23, %v8476_v49 }
  0x9e   :  { %4974 = vmatprep.subr.bf16.mxu1 %v7398_v13  ;;  %8514 = vst [vmem:[#allocation38_spill] sm:$0xff] %v7421_v53  ;;  %8515 = vst [vmem:[#allocation39_spill] sm:$0xff] %v7425_v63 }
  0x9f   :  { %8516 = vst [vmem:[#allocation40_spill] sm:$0xff] %v7432_v32 }
  0xa0   :  { %4944 = vmatpush1.bf16.msra.mxu0 %v7401_v57 }
  0xa1   :  { %4976 = vmatpush1.bf16.msra.mxu1 %v7405_v62  ;;  %4978 = vmatprep.subr.bf16.mxu0 %v7161_v17 }
  0xa2   :  { %5010 = vmatprep.subr.bf16.mxu1 %v7163_v21 }
 0x155   :  { %v655_v16 = vpop.f32.mrb[0].mxu0 }
 0x156   :  { %v6433_v55 = vadd.f32 %v655_v16, %v7421_v53  ;;  %v726_v21 = vpop.f32.mrb[0].mxu1  ;;  %v657_v17 = vpop.f32.mrb[1].mxu0  ;;  %v7438_v16 = vrot.slane %v316_v23, %v8485_v31  ;;  %v8532_v31 = vld [vmem:[#allocation35_spill] sm:$0xff] }
 0x157   :  { %v6434_v62 = vadd.f32 %v657_v17, %v7425_v63  ;;  %v728_v57 = vpop.f32.mrb[1].mxu1 }
 0x158   :  { %v4687_v13 = vmul.f32 -1.442695, %v6433_v55  ;;  %v6450_v10 = vadd.f32 %v728_v57, %v7432_v32  ;;  %v6449_v17 = vadd.f32 %v726_v21, %v7438_v16 }
 0x159   :  { %v4688_v0 = vmul.f32 -1.442695, %v6434_v62 }
 0x15a   :  { %6574 = vpow2.f32 %v4687_v13  ;;  %v4689_v53 = vmul.f32 -1.442695, %v6450_v10 }
 0x15b   :  { %6576 = vpow2.f32 %v4688_v0 }
 0x15c   :  { %6578 = vpow2.f32 %v4689_v53  ;;  %v8521_v53 = vld [vmem:[#allocation23_spill] sm:$0xff] }
 0x15d   :  { %6580 = vtanh.f32 %v6449_v17  ;;  %v8523_v17 = vld [vmem:[#allocation25_spill] sm:$0xff] }
 0x164   :  { %v6575_v63 = vpop.eup %6574 }
 0x165   :  { %v6577_v55 = vpop.eup %6576  ;;  %v738_v62 = vadd.f32 1.0, %v6575_v63 }
 0x166   :  { %v744_v49 = vadd.f32 1.0, %v6577_v55  ;;  %v6579_v13 = vpop.eup %6578  ;;  %v8524_v55 = vld [vmem:[#allocation26_spill] sm:$0xff] }
 0x167   :  { %6582 = vrcp.f32 %v738_v62  ;;  %v6581_v3 = vpop.eup %6580  ;;  %v751_v32 = vadd.f32 1.0, %v6579_v13  ;;  %v8525_v62 = vld [vmem:[#allocation27_spill] sm:$0xff]  ;;  %v8526_v13 = vld [vmem:[#allocation28_spill] sm:$0xff] }
 0x168   :  { %6584 = vrcp.f32 %v744_v49  ;;  %v8522_v49 = vld [vmem:[#allocation24_spill] sm:$0xff] }
 0x169   :  { %6586 = vrcp.f32 %v751_v32  ;;  %v8520_v32 = vld [vmem:[#allocation22_spill] sm:$0xff] }
 0x171   :  { %v6583_v0 = vpop.eup %6582 }
 0x172   :  { %v6585_v48 = vpop.eup %6584  ;;  %v755_v57 = vmul.f32 %v6583_v0, %v6581_v3  ;;  %v8517_v3 = vmov 0.0   ;;  %v8527_v0 = vld [vmem:[#allocation30_spill] sm:$0xff] }
 0x173   :  { %v754_v26 = vmul.f32 0.0, %v6585_v48  ;;  %v6587_v21 = vpop.eup %6586  ;;  %v8518_v48 = vld [vmem:[#allocation20_spill] sm:$0xff] }
 0x175   :  { %v7441_v23 = vadd.f32 %v755_v57, %v754_v26  ;;  %v8519_v26 = vld [vmem:[#allocation21_spill] sm:$0xff]  ;;  %v8528_v57 = vld [vmem:[#allocation31_spill] sm:$0xff] }
 0x177   :  { %6588 = vtanh.f32 %v7441_v23 }
 0x181   :  { %v6589_v10 = vpop.eup %6588 }
 0x182   :  { %v758_v63 = vmul.f32 %v6589_v10, %v6587_v21  ;;  %v8529_v21 = vld [vmem:[#allocation32_spill] sm:$0xff]  ;;  %v8530_v10 = vld [vmem:[#allocation33_spill] sm:$0xff] }
 0x184   :  { %845 = vmatmul.mubr.f32.vlgmr.msra.gmra.mrb[16].mxu0 %v758_v63  ;;  %916 = vmatmul.mubr.f32.vlgmr.msra.gmra.mrb[16].mxu1 %v758_v63 }
 0x185   :  { %4980 = vmatpush1.bf16.msra.mxu0 %v7165_v22  ;;  %5012 = vmatpush1.bf16.msra.mxu1 %v7168_v25 }
 0x186   :  { %4982 = vmatprep.subr.bf16.mxu0 %v7172_v29  ;;  %5014 = vmatprep.subr.bf16.mxu1 %v7179_v34 }
 0x187   :  { %986 = vmatprep.mubr.f32.mxu0 %v8517_v3  ;;  %1057 = vmatprep.mubr.f32.mxu1 %v8517_v3 }
 0x189   :  { %4984 = vmatpush1.bf16.msra.mxu0 %v7181_v35  ;;  %5016 = vmatpush1.bf16.msra.mxu1 %v7185_v38 }
 0x18a   :  { %4986 = vmatprep.subr.bf16.mxu0 %v7189_v42  ;;  %5018 = vmatprep.subr.bf16.mxu1 %v7196_v47 }
 0x18d   :  { %4988 = vmatpush1.bf16.msra.mxu0 %v7200_v50  ;;  %5020 = vmatpush1.bf16.msra.mxu1 %v7204_v54 }
 0x18e   :  { %4990 = vmatprep.subr.bf16.mxu0 %v7208_v58  ;;  %5022 = vmatprep.subr.bf16.mxu1 %v7212_v61 }
 0x191   :  { %4992 = vmatpush1.bf16.msra.mxu0 %v7219_v2  ;;  %5024 = vmatpush1.bf16.msra.mxu1 %v7223_v5 }
 0x192   :  { %4994 = vmatprep.subr.bf16.mxu0 %v7227_v8  ;;  %5026 = vmatprep.subr.bf16.mxu1 %v7231_v11 }
 0x195   :  { %4996 = vmatpush1.bf16.msra.mxu0 %v7238_v15  ;;  %5028 = vmatpush1.bf16.msra.mxu1 %v7242_v19 }
 0x196   :  { %4998 = vmatprep.subr.bf16.mxu0 %v7246_v24  ;;  %5030 = vmatprep.subr.bf16.mxu1 %v7250_v28 }
 0x199   :  { %5000 = vmatpush1.bf16.msra.mxu0 %v7257_v33  ;;  %5032 = vmatpush1.bf16.msra.mxu1 %v7261_v39 }
 0x19a   :  { %5002 = vmatprep.subr.bf16.mxu0 %v7265_v43  ;;  %5034 = vmatprep.subr.bf16.mxu1 %v7269_v46 }
 0x19d   :  { %5004 = vmatpush1.bf16.msra.mxu0 %v7276_v52  ;;  %5036 = vmatpush1.bf16.msra.mxu1 %v7280_v56 }
 0x19e   :  { %5006 = vmatprep.subr.bf16.mxu0 %v7284_v60  ;;  %5038 = vmatprep.subr.bf16.mxu1 %v7288_v1 }
 0x1a1   :  { %5008 = vmatpush1.bf16.msra.mxu0 %v7295_v4  ;;  %5040 = vmatpush1.bf16.msra.mxu1 %v7299_v6 }
 0x1a2   :  { %5042 = vmatprep.subr.bf16.mxu0 %v7314_v12  ;;  %5074 = vmatprep.subr.bf16.mxu1 %v7316_v18 }
 0x1a4   :  { %987 = vmatmul.mubr.f32.vlgmr.msra.gmra.mrb[2].mxu0 %v758_v63  ;;  %1058 = vmatmul.mubr.f32.vlgmr.msra.gmra.mrb[2].mxu1 %v758_v63  ;;  %v8531_v63 = vld [vmem:[#allocation34_spill] sm:$0xff] }
 0x1a5   :  { %5044 = vmatpush1.bf16.msra.mxu0 %v7318_v20  ;;  %5076 = vmatpush1.bf16.msra.mxu1 %v7321_v27 }
 0x1a6   :  { %5046 = vmatprep.subr.bf16.mxu0 %v7326_v36  ;;  %5078 = vmatprep.subr.bf16.mxu1 %v7328_v44 }
 0x1a7   :  { %1156 = vmatprep.mubr.f32.mxu0 %v8517_v3  ;;  %1227 = vmatprep.mubr.f32.mxu1 %v8517_v3 }
 0x1a9   :  { %5048 = vmatpush1.bf16.msra.mxu0 %v7330_v45  ;;  %5080 = vmatpush1.bf16.msra.mxu1 %v7333_v51 }
 0x1aa   :  { %5050 = vmatprep.subr.bf16.mxu0 %v7338_v59  ;;  %5082 = vmatprep.subr.bf16.mxu1 %v7340_v7 }
 0x1ad   :  { %5052 = vmatpush1.bf16.msra.mxu0 %v7342_v9  ;;  %5084 = vmatpush1.bf16.msra.mxu1 %v7345_v14 }
 0x1ae   :  { %5054 = vmatprep.subr.bf16.mxu0 %v7350_v30  ;;  %5086 = vmatprep.subr.bf16.mxu1 %v7352_v40 }
 0x1b1   :  { %5056 = vmatpush1.bf16.msra.mxu0 %v7354_v41  ;;  %5088 = vmatpush1.bf16.msra.mxu1 %v8518_v48 }
 0x1b2   :  { %5058 = vmatprep.subr.bf16.mxu0 %v8519_v26  ;;  %5090 = vmatprep.subr.bf16.mxu1 %v8520_v32  ;;  %v8537_v32 = vld [vmem:[#allocation39_spill] sm:$0xff] }
 0x1b5   :  { %5060 = vmatpush1.bf16.msra.mxu0 %v8521_v53  ;;  %5092 = vmatpush1.bf16.msra.mxu1 %v8522_v49  ;;  %v8536_v49 = vld [vmem:[#allocation38_spill] sm:$0xff] }
 0x1b6   :  { %5062 = vmatprep.subr.bf16.mxu0 %v8523_v17  ;;  %5094 = vmatprep.subr.bf16.mxu1 %v8524_v55  ;;  %v8533_v17 = vld [vmem:[#allocation36_spill] sm:$0xff] }
 0x1b7   :  { %v8534_v55 = vld [vmem:[#allocation16_spill] sm:$0xff] }
 0x1b9   :  { %5064 = vmatpush1.bf16.msra.mxu0 %v8525_v62  ;;  %5096 = vmatpush1.bf16.msra.mxu1 %v8526_v13  ;;  %v8535_v62 = vld [vmem:[#allocation17_spill] sm:$0xff] }
 0x1ba   :  { %5066 = vmatprep.subr.bf16.mxu0 %v7385_v37  ;;  %5098 = vmatprep.subr.bf16.mxu1 %v8527_v0 }
 0x1bd   :  { %5068 = vmatpush1.bf16.msra.mxu0 %v8528_v57  ;;  %5100 = vmatpush1.bf16.msra.mxu1 %v8529_v21 }
 0x1be   :  { %5070 = vmatprep.subr.bf16.mxu0 %v8530_v10  ;;  %5102 = vmatprep.subr.bf16.mxu1 %v8531_v63  ;;  %v8538_v63 = vld [vmem:[#allocation40_spill] sm:$0xff] }
 0x1c1   :  { %5072 = vmatpush1.bf16.msra.mxu0 %v8532_v31  ;;  %5104 = vmatpush1.bf16.msra.mxu1 %v8533_v17 }
 0x1c2   :  { %5106 = vmatprep.subr.bf16.mxu0 %v8534_v55  ;;  %5138 = vmatprep.subr.bf16.mxu1 %v8535_v62 }
 0x277   :  { %v988_v13 = vpop.f32.mrb[2].mxu0  ;;  %v1059_v37 = vpop.f32.mrb[2].mxu1 }
 0x278   :  { %v6435_v0 = vadd.f32 %v988_v13, %v8536_v49  ;;  %v990_v53 = vpop.f32.mrb[3].mxu0  ;;  %v1061_v57 = vpop.f32.mrb[3].mxu1  ;;  %v6451_v17 = vadd.f32 %v1059_v37, %v7438_v16 }
 0x279   :  { %v6436_v21 = vadd.f32 %v990_v53, %v8537_v32  ;;  %v6452_v31 = vadd.f32 %v1061_v57, %v8538_v63 }
 0x27a   :  { %v4690_v26 = vmul.f32 -1.442695, %v6435_v0 }
 0x27b   :  { %v4691_v10 = vmul.f32 -1.442695, %v6436_v21  ;;  %v4692_v48 = vmul.f32 -1.442695, %v6452_v31 }
 0x27c   :  { %6590 = vpow2.f32 %v4690_v26 }
 0x27d   :  { %6592 = vpow2.f32 %v4691_v10 }
 0x27e   :  { %6594 = vpow2.f32 %v4692_v48 }
 0x27f   :  { %6596 = vtanh.f32 %v6451_v17  ;;  %v8543_v17 = vld [vmem:[#allocation22_spill] sm:$0xff] }
 0x286   :  { %v6591_v55 = vpop.eup %6590 }
 0x287   :  { %v6593_v41 = vpop.eup %6592  ;;  %v1071_v62 = vadd.f32 1.0, %v6591_v55  ;;  %v8544_v55 = vld [vmem:[#allocation23_spill] sm:$0xff] }
 0x288   :  { %v1077_v40 = vadd.f32 1.0, %v6593_v41  ;;  %v6595_v13 = vpop.eup %6594  ;;  %v8540_v41 = vld [vmem:[#allocation19_spill] sm:$0xff] }
 0x289   :  { %6598 = vrcp.f32 %v1071_v62  ;;  %v6597_v49 = vpop.eup %6596  ;;  %v1084_v26 = vadd.f32 1.0, %v6595_v13  ;;  %v8545_v62 = vld [vmem:[#allocation24_spill] sm:$0xff]  ;;  %v8546_v13 = vld [vmem:[#allocation25_spill] sm:$0xff] }
 0x28a   :  { %6600 = vrcp.f32 %v1077_v40  ;;  %v8539_v40 = vld [vmem:[#allocation18_spill] sm:$0xff] }
 0x28b   :  { %6602 = vrcp.f32 %v1084_v26  ;;  %v8550_v26 = vld [vmem:[#allocation29_spill] sm:$0xff] }
 0x293   :  { %v6599_v53 = vpop.eup %6598 }
 0x294   :  { %v6601_v0 = vpop.eup %6600  ;;  %v1088_v21 = vmul.f32 %v6599_v53, %v6597_v49  ;;  %v8542_v49 = vld [vmem:[#allocation21_spill] sm:$0xff]  ;;  %v8547_v53 = vld [vmem:[#allocation26_spill] sm:$0xff] }
 0x295   :  { %v1087_v10 = vmul.f32 %v6601_v0, %v7441_v23  ;;  %v6603_v37 = vpop.eup %6602  ;;  %v8541_v23 = vld [vmem:[#allocation20_spill] sm:$0xff]  ;;  %v8548_v0 = vld [vmem:[#allocation27_spill] sm:$0xff] }
 0x297   :  { %v7517_v57 = vadd.f32 %v1088_v21, %v1087_v10  ;;  %v8549_v21 = vld [vmem:[#allocation28_spill] sm:$0xff]  ;;  %v8551_v10 = vld [vmem:[#allocation30_spill] sm:$0xff] }
 0x299   :  { %6604 = vtanh.f32 %v7517_v57 }
 0x2a3   :  { %v6605_v31 = vpop.eup %6604 }
 0x2a4   :  { %v1091_v48 = vmul.f32 %v6605_v31, %v6603_v37  ;;  %v8552_v37 = vld [vmem:[#allocation31_spill] sm:$0xff]  ;;  %v8553_v31 = vld [vmem:[#allocation32_spill] sm:$0xff] }
 0x2a6   :  { %1157 = vmatmul.mubr.f32.vlgmr.msra.gmra.mrb[18].mxu0 %v1091_v48  ;;  %1228 = vmatmul.mubr.f32.vlgmr.msra.gmra.mrb[18].mxu1 %v1091_v48 }
 0x2a7   :  { %5108 = vmatpush1.bf16.msra.mxu0 %v7165_v22  ;;  %5140 = vmatpush1.bf16.msra.mxu1 %v7168_v25 }
 0x2a8   :  { %5110 = vmatprep.subr.bf16.mxu0 %v7172_v29  ;;  %5142 = vmatprep.subr.bf16.mxu1 %v7179_v34 }
 0x2a9   :  { %1298 = vmatprep.mubr.f32.mxu0 %v8517_v3  ;;  %1369 = vmatprep.mubr.f32.mxu1 %v8517_v3 }
 0x2ab   :  { %5112 = vmatpush1.bf16.msra.mxu0 %v7181_v35  ;;  %5144 = vmatpush1.bf16.msra.mxu1 %v7185_v38 }
 0x2ac   :  { %5114 = vmatprep.subr.bf16.mxu0 %v7189_v42  ;;  %5146 = vmatprep.subr.bf16.mxu1 %v7196_v47 }
 0x2af   :  { %5116 = vmatpush1.bf16.msra.mxu0 %v7200_v50  ;;  %5148 = vmatpush1.bf16.msra.mxu1 %v7204_v54 }
 0x2b0   :  { %5118 = vmatprep.subr.bf16.mxu0 %v7208_v58  ;;  %5150 = vmatprep.subr.bf16.mxu1 %v7212_v61 }
 0x2b3   :  { %5120 = vmatpush1.bf16.msra.mxu0 %v7219_v2  ;;  %5152 = vmatpush1.bf16.msra.mxu1 %v7223_v5 }
 0x2b4   :  { %5122 = vmatprep.subr.bf16.mxu0 %v7227_v8  ;;  %5154 = vmatprep.subr.bf16.mxu1 %v7231_v11 }
 0x2b7   :  { %5124 = vmatpush1.bf16.msra.mxu0 %v7238_v15  ;;  %5156 = vmatpush1.bf16.msra.mxu1 %v7242_v19 }
 0x2b8   :  { %5126 = vmatprep.subr.bf16.mxu0 %v7246_v24  ;;  %5158 = vmatprep.subr.bf16.mxu1 %v7250_v28 }
 0x2bb   :  { %5128 = vmatpush1.bf16.msra.mxu0 %v7257_v33  ;;  %5160 = vmatpush1.bf16.msra.mxu1 %v7261_v39 }
 0x2bc   :  { %5130 = vmatprep.subr.bf16.mxu0 %v7265_v43  ;;  %5162 = vmatprep.subr.bf16.mxu1 %v7269_v46 }
 0x2bf   :  { %5132 = vmatpush1.bf16.msra.mxu0 %v7276_v52  ;;  %5164 = vmatpush1.bf16.msra.mxu1 %v7280_v56 }
 0x2c0   :  { %5134 = vmatprep.subr.bf16.mxu0 %v7284_v60  ;;  %5166 = vmatprep.subr.bf16.mxu1 %v7288_v1 }
 0x2c3   :  { %5136 = vmatpush1.bf16.msra.mxu0 %v7295_v4  ;;  %5168 = vmatpush1.bf16.msra.mxu1 %v7299_v6 }
 0x2c4   :  { %5170 = vmatprep.subr.bf16.mxu0 %v7314_v12  ;;  %5202 = vmatprep.subr.bf16.mxu1 %v7316_v18 }
 0x2c6   :  { %1299 = vmatmul.mubr.f32.vlgmr.msra.gmra.mrb[4].mxu0 %v1091_v48  ;;  %1370 = vmatmul.mubr.f32.vlgmr.msra.gmra.mrb[4].mxu1 %v1091_v48  ;;  %v8554_v48 = vld [vmem:[#allocation33_spill] sm:$0xff] }
 0x2c7   :  { %5172 = vmatpush1.bf16.msra.mxu0 %v7318_v20  ;;  %5204 = vmatpush1.bf16.msra.mxu1 %v7321_v27 }
 0x2c8   :  { %5174 = vmatprep.subr.bf16.mxu0 %v7326_v36  ;;  %5206 = vmatprep.subr.bf16.mxu1 %v7328_v44 }
 0x2c9   :  { %1468 = vmatprep.mubr.f32.mxu0 %v8517_v3  ;;  %1539 = vmatprep.mubr.f32.mxu1 %v8517_v3 }
 0x2cb   :  { %5176 = vmatpush1.bf16.msra.mxu0 %v7330_v45  ;;  %5208 = vmatpush1.bf16.msra.mxu1 %v7333_v51 }
 0x2cc   :  { %5178 = vmatprep.subr.bf16.mxu0 %v7338_v59  ;;  %5210 = vmatprep.subr.bf16.mxu1 %v7340_v7 }
 0x2cf   :  { %5180 = vmatpush1.bf16.msra.mxu0 %v7342_v9  ;;  %5212 = vmatpush1.bf16.msra.mxu1 %v7345_v14 }
 0x2d0   :  { %5182 = vmatprep.subr.bf16.mxu0 %v7350_v30  ;;  %5214 = vmatprep.subr.bf16.mxu1 %v8539_v40 }
 0x2d3   :  { %5184 = vmatpush1.bf16.msra.mxu0 %v8540_v41  ;;  %5216 = vmatpush1.bf16.msra.mxu1 %v8541_v23 }
 0x2d4   :  { %5186 = vmatprep.subr.bf16.mxu0 %v8542_v49  ;;  %5218 = vmatprep.subr.bf16.mxu1 %v8543_v17  ;;  %v8560_v17 = vld [vmem:[#allocation38_spill] sm:$0xff] }
 0x2d7   :  { %5188 = vmatpush1.bf16.msra.mxu0 %v8544_v55  ;;  %5220 = vmatpush1.bf16.msra.mxu1 %v8545_v62  ;;  %v8555_v55 = vld [vmem:[#allocation34_spill] sm:$0xff]  ;;  %v8556_v62 = vld [vmem:[#allocation35_spill] sm:$0xff] }
 0x2d8   :  { %5190 = vmatprep.subr.bf16.mxu0 %v8546_v13  ;;  %5222 = vmatprep.subr.bf16.mxu1 %v8547_v53  ;;  %v8557_v13 = vld [vmem:[#allocation36_spill] sm:$0xff] }
 0x2d9   :  { %v8558_v53 = vld [vmem:[#allocation16_spill] sm:$0xff] }
 0x2db   :  { %5192 = vmatpush1.bf16.msra.mxu0 %v8548_v0  ;;  %5224 = vmatpush1.bf16.msra.mxu1 %v8549_v21  ;;  %v8559_v0 = vld [vmem:[#allocation17_spill] sm:$0xff] }
 0x2dc   :  { %5194 = vmatprep.subr.bf16.mxu0 %v8550_v26  ;;  %5226 = vmatprep.subr.bf16.mxu1 %v8551_v10 }
 0x2df   :  { %5196 = vmatpush1.bf16.msra.mxu0 %v8552_v37  ;;  %5228 = vmatpush1.bf16.msra.mxu1 %v8553_v31 }
 0x2e0   :  { %5198 = vmatprep.subr.bf16.mxu0 %v8554_v48  ;;  %5230 = vmatprep.subr.bf16.mxu1 %v8555_v55 }
 0x2e3   :  { %5200 = vmatpush1.bf16.msra.mxu0 %v8556_v62  ;;  %5232 = vmatpush1.bf16.msra.mxu1 %v8557_v13 }
 0x2e4   :  { %5234 = vmatprep.subr.bf16.mxu0 %v8558_v53  ;;  %5266 = vmatprep.subr.bf16.mxu1 %v8559_v0 }
 0x399   :  { %v1300_v21 = vpop.f32.mrb[4].mxu0  ;;  %v1371_v26 = vpop.f32.mrb[4].mxu1 }
 0x39a   :  { %v6437_v10 = vadd.f32 %v1300_v21, %v8560_v17  ;;  %v1302_v49 = vpop.f32.mrb[5].mxu0  ;;  %v1373_v37 = vpop.f32.mrb[5].mxu1  ;;  %v6453_v13 = vadd.f32 %v1371_v26, %v7438_v16  ;;  %v8567_v26 = vld [vmem:[#allocation24_spill] sm:$0xff] }
 0x39b   :  { %v6438_v31 = vadd.f32 %v1302_v49, %v8537_v32  ;;  %v6454_v62 = vadd.f32 %v1373_v37, %v8538_v63 }
 0x39c   :  { %v4693_v23 = vmul.f32 -1.442695, %v6437_v10 }
 0x39d   :  { %v4694_v48 = vmul.f32 -1.442695, %v6438_v31  ;;  %v4695_v55 = vmul.f32 -1.442695, %v6454_v62 }
 0x39e   :  { %6606 = vpow2.f32 %v4693_v23 }
 0x39f   :  { %6608 = vpow2.f32 %v4694_v48 }
 0x3a0   :  { %6610 = vpow2.f32 %v4695_v55 }
 0x3a1   :  { %6612 = vtanh.f32 %v6453_v13  ;;  %v8565_v13 = vld [vmem:[#allocation22_spill] sm:$0xff] }
 0x3a8   :  { %v6607_v53 = vpop.eup %6606 }
 0x3a9   :  { %v6609_v41 = vpop.eup %6608  ;;  %v1383_v0 = vadd.f32 1.0, %v6607_v53 }
 0x3aa   :  { %v1389_v40 = vadd.f32 1.0, %v6609_v41  ;;  %v6611_v21 = vpop.eup %6610  ;;  %v8563_v41 = vld [vmem:[#allocation20_spill] sm:$0xff] }
 0x3ab   :  { %6614 = vrcp.f32 %v1383_v0  ;;  %v6613_v17 = vpop.eup %6612  ;;  %v1396_v23 = vadd.f32 1.0, %v6611_v21  ;;  %v8566_v0 = vld [vmem:[#allocation23_spill] sm:$0xff]  ;;  %v8568_v21 = vld [vmem:[#allocation25_spill] sm:$0xff] }
 0x3ac   :  { %6616 = vrcp.f32 %v1389_v40  ;;  %v8562_v40 = vld [vmem:[#allocation19_spill] sm:$0xff] }
 0x3ad   :  { %6618 = vrcp.f32 %v1396_v23  ;;  %v8572_v23 = vld [vmem:[#allocation29_spill] sm:$0xff] }
 0x3b5   :  { %v6615_v49 = vpop.eup %6614 }
 0x3b6   :  { %v6617_v10 = vpop.eup %6616  ;;  %v1400_v31 = vmul.f32 %v6615_v49, %v6613_v17  ;;  %v8564_v17 = vld [vmem:[#allocation21_spill] sm:$0xff]  ;;  %v8569_v49 = vld [vmem:[#allocation26_spill] sm:$0xff] }
 0x3b7   :  { %v1399_v48 = vmul.f32 %v6617_v10, %v7517_v57  ;;  %v6619_v62 = vpop.eup %6618  ;;  %v8561_v57 = vld [vmem:[#allocation18_spill] sm:$0xff]  ;;  %v8570_v10 = vld [vmem:[#allocation27_spill] sm:$0xff] }
 0x3b9   :  { %v7593_v37 = vadd.f32 %v1400_v31, %v1399_v48  ;;  %v8571_v31 = vld [vmem:[#allocation28_spill] sm:$0xff]  ;;  %v8573_v48 = vld [vmem:[#allocation30_spill] sm:$0xff] }
 0x3bb   :  { %6620 = vtanh.f32 %v7593_v37 }
 0x3c5   :  { %v6621_v53 = vpop.eup %6620 }
 0x3c6   :  { %v1403_v55 = vmul.f32 %v6621_v53, %v6619_v62  ;;  %v8574_v62 = vld [vmem:[#allocation31_spill] sm:$0xff]  ;;  %v8575_v53 = vld [vmem:[#allocation32_spill] sm:$0xff] }
 0x3c8   :  { %1469 = vmatmul.mubr.f32.vlgmr.msra.gmra.mrb[20].mxu0 %v1403_v55  ;;  %1540 = vmatmul.mubr.f32.vlgmr.msra.gmra.mrb[20].mxu1 %v1403_v55 }
 0x3c9   :  { %5236 = vmatpush1.bf16.msra.mxu0 %v7165_v22  ;;  %5268 = vmatpush1.bf16.msra.mxu1 %v7168_v25 }
 0x3ca   :  { %5238 = vmatprep.subr.bf16.mxu0 %v7172_v29  ;;  %5270 = vmatprep.subr.bf16.mxu1 %v7179_v34 }
 0x3cb   :  { %1610 = vmatprep.mubr.f32.mxu0 %v8517_v3  ;;  %1681 = vmatprep.mubr.f32.mxu1 %v8517_v3 }
 0x3cd   :  { %5240 = vmatpush1.bf16.msra.mxu0 %v7181_v35  ;;  %5272 = vmatpush1.bf16.msra.mxu1 %v7185_v38 }
 0x3ce   :  { %5242 = vmatprep.subr.bf16.mxu0 %v7189_v42  ;;  %5274 = vmatprep.subr.bf16.mxu1 %v7196_v47 }
 0x3d1   :  { %5244 = vmatpush1.bf16.msra.mxu0 %v7200_v50  ;;  %5276 = vmatpush1.bf16.msra.mxu1 %v7204_v54 }
 0x3d2   :  { %5246 = vmatprep.subr.bf16.mxu0 %v7208_v58  ;;  %5278 = vmatprep.subr.bf16.mxu1 %v7212_v61 }
 0x3d5   :  { %5248 = vmatpush1.bf16.msra.mxu0 %v7219_v2  ;;  %5280 = vmatpush1.bf16.msra.mxu1 %v7223_v5 }
 0x3d6   :  { %5250 = vmatprep.subr.bf16.mxu0 %v7227_v8  ;;  %5282 = vmatprep.subr.bf16.mxu1 %v7231_v11 }
 0x3d9   :  { %5252 = vmatpush1.bf16.msra.mxu0 %v7238_v15  ;;  %5284 = vmatpush1.bf16.msra.mxu1 %v7242_v19 }
 0x3da   :  { %5254 = vmatprep.subr.bf16.mxu0 %v7246_v24  ;;  %5286 = vmatprep.subr.bf16.mxu1 %v7250_v28 }
 0x3dd   :  { %5256 = vmatpush1.bf16.msra.mxu0 %v7257_v33  ;;  %5288 = vmatpush1.bf16.msra.mxu1 %v7261_v39 }
 0x3de   :  { %5258 = vmatprep.subr.bf16.mxu0 %v7265_v43  ;;  %5290 = vmatprep.subr.bf16.mxu1 %v7269_v46 }
 0x3e1   :  { %5260 = vmatpush1.bf16.msra.mxu0 %v7276_v52  ;;  %5292 = vmatpush1.bf16.msra.mxu1 %v7280_v56 }
 0x3e2   :  { %5262 = vmatprep.subr.bf16.mxu0 %v7284_v60  ;;  %5294 = vmatprep.subr.bf16.mxu1 %v7288_v1 }
 0x3e5   :  { %5264 = vmatpush1.bf16.msra.mxu0 %v7295_v4  ;;  %5296 = vmatpush1.bf16.msra.mxu1 %v7299_v6 }
 0x3e6   :  { %5298 = vmatprep.subr.bf16.mxu0 %v7314_v12  ;;  %5330 = vmatprep.subr.bf16.mxu1 %v7316_v18 }
 0x3e8   :  { %1611 = vmatmul.mubr.f32.vlgmr.msra.gmra.mrb[6].mxu0 %v1403_v55  ;;  %1682 = vmatmul.mubr.f32.vlgmr.msra.gmra.mrb[6].mxu1 %v1403_v55  ;;  %v8576_v55 = vld [vmem:[#allocation33_spill] sm:$0xff] }
 0x3e9   :  { %5300 = vmatpush1.bf16.msra.mxu0 %v7318_v20  ;;  %5332 = vmatpush1.bf16.msra.mxu1 %v7321_v27 }
 0x3ea   :  { %5302 = vmatprep.subr.bf16.mxu0 %v7326_v36  ;;  %5334 = vmatprep.subr.bf16.mxu1 %v7328_v44 }
 0x3eb   :  { %1780 = vmatprep.mubr.f32.mxu0 %v8517_v3  ;;  %1851 = vmatprep.mubr.f32.mxu1 %v8517_v3 }
 0x3ed   :  { %5304 = vmatpush1.bf16.msra.mxu0 %v7330_v45  ;;  %5336 = vmatpush1.bf16.msra.mxu1 %v7333_v51 }
 0x3ee   :  { %5306 = vmatprep.subr.bf16.mxu0 %v7338_v59  ;;  %5338 = vmatprep.subr.bf16.mxu1 %v7340_v7 }
 0x3f1   :  { %5308 = vmatpush1.bf16.msra.mxu0 %v7342_v9  ;;  %5340 = vmatpush1.bf16.msra.mxu1 %v7345_v14 }
 0x3f2   :  { %5310 = vmatprep.subr.bf16.mxu0 %v7350_v30  ;;  %5342 = vmatprep.subr.bf16.mxu1 %v8561_v57 }
 0x3f5   :  { %5312 = vmatpush1.bf16.msra.mxu0 %v8562_v40  ;;  %5344 = vmatpush1.bf16.msra.mxu1 %v8563_v41 }
 0x3f6   :  { %5314 = vmatprep.subr.bf16.mxu0 %v8564_v17  ;;  %5346 = vmatprep.subr.bf16.mxu1 %v8565_v13  ;;  %v8582_v13 = vld [vmem:[#allocation38_spill] sm:$0xff] }
 0x3f9   :  { %5316 = vmatpush1.bf16.msra.mxu0 %v8566_v0  ;;  %5348 = vmatpush1.bf16.msra.mxu1 %v8567_v26  ;;  %v8577_v0 = vld [vmem:[#allocation34_spill] sm:$0xff]  ;;  %v8578_v26 = vld [vmem:[#allocation35_spill] sm:$0xff] }
 0x3fa   :  { %5318 = vmatprep.subr.bf16.mxu0 %v8568_v21  ;;  %5350 = vmatprep.subr.bf16.mxu1 %v8569_v49  ;;  %v8579_v21 = vld [vmem:[#allocation36_spill] sm:$0xff] }
 0x3fb   :  { %v8580_v49 = vld [vmem:[#allocation16_spill] sm:$0xff] }
 0x3fd   :  { %5320 = vmatpush1.bf16.msra.mxu0 %v8570_v10  ;;  %5352 = vmatpush1.bf16.msra.mxu1 %v8571_v31  ;;  %v8581_v10 = vld [vmem:[#allocation17_spill] sm:$0xff] }
 0x3fe   :  { %5322 = vmatprep.subr.bf16.mxu0 %v8572_v23  ;;  %5354 = vmatprep.subr.bf16.mxu1 %v8573_v48 }
 0x401   :  { %5324 = vmatpush1.bf16.msra.mxu0 %v8574_v62  ;;  %5356 = vmatpush1.bf16.msra.mxu1 %v8575_v53 }
 0x402   :  { %5326 = vmatprep.subr.bf16.mxu0 %v8576_v55  ;;  %5358 = vmatprep.subr.bf16.mxu1 %v8577_v0 }
 0x405   :  { %5328 = vmatpush1.bf16.msra.mxu0 %v8578_v26  ;;  %5360 = vmatpush1.bf16.msra.mxu1 %v8579_v21 }
 0x406   :  { %5362 = vmatprep.subr.bf16.mxu0 %v8580_v49  ;;  %5394 = vmatprep.subr.bf16.mxu1 %v8581_v10 }
 0x4bb   :  { %v1612_v31 = vpop.f32.mrb[6].mxu0  ;;  %v1683_v23 = vpop.f32.mrb[6].mxu1 }
 0x4bc   :  { %v6439_v48 = vadd.f32 %v1612_v31, %v8582_v13  ;;  %v1614_v17 = vpop.f32.mrb[7].mxu0  ;;  %v1685_v62 = vpop.f32.mrb[7].mxu1  ;;  %v6455_v21 = vadd.f32 %v1683_v23, %v7438_v16  ;;  %v8589_v23 = vld [vmem:[#allocation24_spill] sm:$0xff] }
 0x4bd   :  { %v6440_v53 = vadd.f32 %v1614_v17, %v8537_v32  ;;  %v6456_v26 = vadd.f32 %v1685_v62, %v8538_v63 }
 0x4be   :  { %v4696_v41 = vmul.f32 -1.442695, %v6439_v48 }
 0x4bf   :  { %v4697_v55 = vmul.f32 -1.442695, %v6440_v53  ;;  %v4698_v0 = vmul.f32 -1.442695, %v6456_v26 }
 0x4c0   :  { %6622 = vpow2.f32 %v4696_v41 }
 0x4c1   :  { %6624 = vpow2.f32 %v4697_v55 }
 0x4c2   :  { %6626 = vpow2.f32 %v4698_v0 }
 0x4c3   :  { %6628 = vtanh.f32 %v6455_v21  ;;  %v8587_v21 = vld [vmem:[#allocation22_spill] sm:$0xff] }
 0x4ca   :  { %v6623_v49 = vpop.eup %6622 }
 0x4cb   :  { %v6625_v40 = vpop.eup %6624  ;;  %v1695_v10 = vadd.f32 1.0, %v6623_v49 }
 0x4cc   :  { %v1701_v57 = vadd.f32 1.0, %v6625_v40  ;;  %v6627_v31 = vpop.eup %6626  ;;  %v8585_v40 = vld [vmem:[#allocation20_spill] sm:$0xff] }
 0x4cd   :  { %6630 = vrcp.f32 %v1695_v10  ;;  %v6629_v13 = vpop.eup %6628  ;;  %v1708_v41 = vadd.f32 1.0, %v6627_v31  ;;  %v8588_v10 = vld [vmem:[#allocation23_spill] sm:$0xff]  ;;  %v8590_v31 = vld [vmem:[#allocation25_spill] sm:$0xff] }
 0x4ce   :  { %6632 = vrcp.f32 %v1701_v57  ;;  %v8584_v57 = vld [vmem:[#allocation19_spill] sm:$0xff] }
 0x4cf   :  { %6634 = vrcp.f32 %v1708_v41  ;;  %v8594_v41 = vld [vmem:[#allocation29_spill] sm:$0xff] }
 0x4d7   :  { %v6631_v17 = vpop.eup %6630 }
 0x4d8   :  { %v6633_v48 = vpop.eup %6632  ;;  %v1712_v53 = vmul.f32 %v6631_v17, %v6629_v13  ;;  %v8586_v13 = vld [vmem:[#allocation21_spill] sm:$0xff]  ;;  %v8591_v17 = vld [vmem:[#allocation26_spill] sm:$0xff] }
 0x4d9   :  { %v1711_v55 = vmul.f32 %v6633_v48, %v7593_v37  ;;  %v6635_v26 = vpop.eup %6634  ;;  %v8583_v37 = vld [vmem:[#allocation18_spill] sm:$0xff]  ;;  %v8592_v48 = vld [vmem:[#allocation27_spill] sm:$0xff] }
 0x4db   :  { %v7669_v62 = vadd.f32 %v1712_v53, %v1711_v55  ;;  %v8593_v53 = vld [vmem:[#allocation28_spill] sm:$0xff]  ;;  %v8595_v55 = vld [vmem:[#allocation30_spill] sm:$0xff] }
 0x4dd   :  { %6636 = vtanh.f32 %v7669_v62 }
 0x4e7   :  { %v6637_v49 = vpop.eup %6636 }
 0x4e8   :  { %v1715_v0 = vmul.f32 %v6637_v49, %v6635_v26  ;;  %v8596_v26 = vld [vmem:[#allocation31_spill] sm:$0xff]  ;;  %v8597_v49 = vld [vmem:[#allocation32_spill] sm:$0xff] }
 0x4ea   :  { %1781 = vmatmul.mubr.f32.vlgmr.msra.gmra.mrb[22].mxu0 %v1715_v0  ;;  %1852 = vmatmul.mubr.f32.vlgmr.msra.gmra.mrb[22].mxu1 %v1715_v0 }
 0x4eb   :  { %5364 = vmatpush1.bf16.msra.mxu0 %v7165_v22  ;;  %5396 = vmatpush1.bf16.msra.mxu1 %v7168_v25 }
 0x4ec   :  { %5366 = vmatprep.subr.bf16.mxu0 %v7172_v29  ;;  %5398 = vmatprep.subr.bf16.mxu1 %v7179_v34 }
 0x4ed   :  { %1922 = vmatprep.mubr.f32.mxu0 %v8517_v3  ;;  %1993 = vmatprep.mubr.f32.mxu1 %v8517_v3 }
 0x4ef   :  { %5368 = vmatpush1.bf16.msra.mxu0 %v7181_v35  ;;  %5400 = vmatpush1.bf16.msra.mxu1 %v7185_v38 }
 0x4f0   :  { %5370 = vmatprep.subr.bf16.mxu0 %v7189_v42  ;;  %5402 = vmatprep.subr.bf16.mxu1 %v7196_v47 }
 0x4f3   :  { %5372 = vmatpush1.bf16.msra.mxu0 %v7200_v50  ;;  %5404 = vmatpush1.bf16.msra.mxu1 %v7204_v54 }
 0x4f4   :  { %5374 = vmatprep.subr.bf16.mxu0 %v7208_v58  ;;  %5406 = vmatprep.subr.bf16.mxu1 %v7212_v61 }
 0x4f7   :  { %5376 = vmatpush1.bf16.msra.mxu0 %v7219_v2  ;;  %5408 = vmatpush1.bf16.msra.mxu1 %v7223_v5 }
 0x4f8   :  { %5378 = vmatprep.subr.bf16.mxu0 %v7227_v8  ;;  %5410 = vmatprep.subr.bf16.mxu1 %v7231_v11 }
 0x4fb   :  { %5380 = vmatpush1.bf16.msra.mxu0 %v7238_v15  ;;  %5412 = vmatpush1.bf16.msra.mxu1 %v7242_v19 }
 0x4fc   :  { %5382 = vmatprep.subr.bf16.mxu0 %v7246_v24  ;;  %5414 = vmatprep.subr.bf16.mxu1 %v7250_v28 }
 0x4ff   :  { %5384 = vmatpush1.bf16.msra.mxu0 %v7257_v33  ;;  %5416 = vmatpush1.bf16.msra.mxu1 %v7261_v39 }
 0x500   :  { %5386 = vmatprep.subr.bf16.mxu0 %v7265_v43  ;;  %5418 = vmatprep.subr.bf16.mxu1 %v7269_v46 }
 0x503   :  { %5388 = vmatpush1.bf16.msra.mxu0 %v7276_v52  ;;  %5420 = vmatpush1.bf16.msra.mxu1 %v7280_v56 }
 0x504   :  { %5390 = vmatprep.subr.bf16.mxu0 %v7284_v60  ;;  %5422 = vmatprep.subr.bf16.mxu1 %v7288_v1 }
 0x507   :  { %5392 = vmatpush1.bf16.msra.mxu0 %v7295_v4  ;;  %5424 = vmatpush1.bf16.msra.mxu1 %v7299_v6 }
 0x508   :  { %5426 = vmatprep.subr.bf16.mxu0 %v7314_v12  ;;  %5458 = vmatprep.subr.bf16.mxu1 %v7316_v18 }
 0x50a   :  { %1923 = vmatmul.mubr.f32.vlgmr.msra.gmra.mrb[8].mxu0 %v1715_v0  ;;  %1994 = vmatmul.mubr.f32.vlgmr.msra.gmra.mrb[8].mxu1 %v1715_v0  ;;  %v8598_v0 = vld [vmem:[#allocation33_spill] sm:$0xff] }
 0x50b   :  { %5428 = vmatpush1.bf16.msra.mxu0 %v7318_v20  ;;  %5460 = vmatpush1.bf16.msra.mxu1 %v7321_v27 }
 0x50c   :  { %5430 = vmatprep.subr.bf16.mxu0 %v7326_v36  ;;  %5462 = vmatprep.subr.bf16.mxu1 %v7328_v44 }
 0x50d   :  { %2092 = vmatprep.mubr.f32.mxu0 %v8517_v3  ;;  %2163 = vmatprep.mubr.f32.mxu1 %v8517_v3 }
 0x50f   :  { %5432 = vmatpush1.bf16.msra.mxu0 %v7330_v45  ;;  %5464 = vmatpush1.bf16.msra.mxu1 %v7333_v51 }
 0x510   :  { %5434 = vmatprep.subr.bf16.mxu0 %v7338_v59  ;;  %5466 = vmatprep.subr.bf16.mxu1 %v7340_v7 }
 0x513   :  { %5436 = vmatpush1.bf16.msra.mxu0 %v7342_v9  ;;  %5468 = vmatpush1.bf16.msra.mxu1 %v7345_v14 }
 0x514   :  { %5438 = vmatprep.subr.bf16.mxu0 %v7350_v30  ;;  %5470 = vmatprep.subr.bf16.mxu1 %v8583_v37 }
 0x517   :  { %5440 = vmatpush1.bf16.msra.mxu0 %v8584_v57  ;;  %5472 = vmatpush1.bf16.msra.mxu1 %v8585_v40 }
 0x518   :  { %5442 = vmatprep.subr.bf16.mxu0 %v8586_v13  ;;  %5474 = vmatprep.subr.bf16.mxu1 %v8587_v21  ;;  %v8604_v21 = vld [vmem:[#allocation38_spill] sm:$0xff] }
 0x51b   :  { %5444 = vmatpush1.bf16.msra.mxu0 %v8588_v10  ;;  %5476 = vmatpush1.bf16.msra.mxu1 %v8589_v23  ;;  %v8599_v10 = vld [vmem:[#allocation34_spill] sm:$0xff]  ;;  %v8600_v23 = vld [vmem:[#allocation35_spill] sm:$0xff] }
 0x51c   :  { %5446 = vmatprep.subr.bf16.mxu0 %v8590_v31  ;;  %5478 = vmatprep.subr.bf16.mxu1 %v8591_v17  ;;  %v8601_v31 = vld [vmem:[#allocation36_spill] sm:$0xff] }
 0x51d   :  { %v8602_v17 = vld [vmem:[#allocation16_spill] sm:$0xff] }
 0x51f   :  { %5448 = vmatpush1.bf16.msra.mxu0 %v8592_v48  ;;  %5480 = vmatpush1.bf16.msra.mxu1 %v8593_v53  ;;  %v8603_v48 = vld [vmem:[#allocation17_spill] sm:$0xff] }
 0x520   :  { %5450 = vmatprep.subr.bf16.mxu0 %v8594_v41  ;;  %5482 = vmatprep.subr.bf16.mxu1 %v8595_v55 }
 0x523   :  { %5452 = vmatpush1.bf16.msra.mxu0 %v8596_v26  ;;  %5484 = vmatpush1.bf16.msra.mxu1 %v8597_v49 }
 0x524   :  { %5454 = vmatprep.subr.bf16.mxu0 %v8598_v0  ;;  %5486 = vmatprep.subr.bf16.mxu1 %v8599_v10 }
 0x527   :  { %5456 = vmatpush1.bf16.msra.mxu0 %v8600_v23  ;;  %5488 = vmatpush1.bf16.msra.mxu1 %v8601_v31 }
 0x528   :  { %5490 = vmatprep.subr.bf16.mxu0 %v8602_v17  ;;  %5522 = vmatprep.subr.bf16.mxu1 %v8603_v48 }
 0x5dd   :  { %v1924_v53 = vpop.f32.mrb[8].mxu0  ;;  %v1995_v41 = vpop.f32.mrb[8].mxu1 }
 0x5de   :  { %v6441_v55 = vadd.f32 %v1924_v53, %v8604_v21  ;;  %v1926_v13 = vpop.f32.mrb[9].mxu0  ;;  %v1997_v26 = vpop.f32.mrb[9].mxu1  ;;  %v6457_v31 = vadd.f32 %v1995_v41, %v7438_v16  ;;  %v8611_v41 = vld [vmem:[#allocation24_spill] sm:$0xff] }
 0x5df   :  { %v6442_v49 = vadd.f32 %v1926_v13, %v8537_v32  ;;  %v6458_v23 = vadd.f32 %v1997_v26, %v8538_v63 }
 0x5e0   :  { %v4699_v40 = vmul.f32 -1.442695, %v6441_v55 }
 0x5e1   :  { %v4700_v0 = vmul.f32 -1.442695, %v6442_v49  ;;  %v4701_v10 = vmul.f32 -1.442695, %v6458_v23 }
 0x5e2   :  { %6638 = vpow2.f32 %v4699_v40 }
 0x5e3   :  { %6640 = vpow2.f32 %v4700_v0 }
 0x5e4   :  { %6642 = vpow2.f32 %v4701_v10 }
 0x5e5   :  { %6644 = vtanh.f32 %v6457_v31  ;;  %v8609_v31 = vld [vmem:[#allocation22_spill] sm:$0xff] }
 0x5ec   :  { %v6639_v17 = vpop.eup %6638 }
 0x5ed   :  { %v6641_v57 = vpop.eup %6640  ;;  %v2007_v48 = vadd.f32 1.0, %v6639_v17 }
 0x5ee   :  { %v2013_v37 = vadd.f32 1.0, %v6641_v57  ;;  %v6643_v53 = vpop.eup %6642  ;;  %v8607_v57 = vld [vmem:[#allocation20_spill] sm:$0xff] }
 0x5ef   :  { %6646 = vrcp.f32 %v2007_v48  ;;  %v6645_v21 = vpop.eup %6644  ;;  %v2020_v40 = vadd.f32 1.0, %v6643_v53  ;;  %v8610_v48 = vld [vmem:[#allocation23_spill] sm:$0xff]  ;;  %v8612_v53 = vld [vmem:[#allocation25_spill] sm:$0xff] }
 0x5f0   :  { %6648 = vrcp.f32 %v2013_v37  ;;  %v8606_v37 = vld [vmem:[#allocation19_spill] sm:$0xff] }
 0x5f1   :  { %6650 = vrcp.f32 %v2020_v40  ;;  %v8616_v40 = vld [vmem:[#allocation29_spill] sm:$0xff] }
 0x5f9   :  { %v6647_v13 = vpop.eup %6646 }
 0x5fa   :  { %v6649_v55 = vpop.eup %6648  ;;  %v2024_v49 = vmul.f32 %v6647_v13, %v6645_v21  ;;  %v8608_v21 = vld [vmem:[#allocation21_spill] sm:$0xff]  ;;  %v8613_v13 = vld [vmem:[#allocation26_spill] sm:$0xff] }
 0x5fb   :  { %v2023_v0 = vmul.f32 %v6649_v55, %v7669_v62  ;;  %v6651_v23 = vpop.eup %6650  ;;  %v8605_v62 = vld [vmem:[#allocation18_spill] sm:$0xff]  ;;  %v8614_v55 = vld [vmem:[#allocation27_spill] sm:$0xff] }
 0x5fd   :  { %v7745_v26 = vadd.f32 %v2024_v49, %v2023_v0  ;;  %v8615_v49 = vld [vmem:[#allocation28_spill] sm:$0xff]  ;;  %v8617_v0 = vld [vmem:[#allocation30_spill] sm:$0xff] }
 0x5ff   :  { %6652 = vtanh.f32 %v7745_v26 }
 0x609   :  { %v6653_v17 = vpop.eup %6652 }
 0x60a   :  { %v2027_v10 = vmul.f32 %v6653_v17, %v6651_v23  ;;  %v8618_v23 = vld [vmem:[#allocation31_spill] sm:$0xff]  ;;  %v8619_v17 = vld [vmem:[#allocation32_spill] sm:$0xff] }
 0x60c   :  { %2093 = vmatmul.mubr.f32.vlgmr.msra.gmra.mrb[24].mxu0 %v2027_v10  ;;  %2164 = vmatmul.mubr.f32.vlgmr.msra.gmra.mrb[24].mxu1 %v2027_v10 }
 0x60d   :  { %5492 = vmatpush1.bf16.msra.mxu0 %v7165_v22  ;;  %5524 = vmatpush1.bf16.msra.mxu1 %v7168_v25 }
 0x60e   :  { %5494 = vmatprep.subr.bf16.mxu0 %v7172_v29  ;;  %5526 = vmatprep.subr.bf16.mxu1 %v7179_v34 }
 0x60f   :  { %2234 = vmatprep.mubr.f32.mxu0 %v8517_v3  ;;  %2305 = vmatprep.mubr.f32.mxu1 %v8517_v3 }
 0x611   :  { %5496 = vmatpush1.bf16.msra.mxu0 %v7181_v35  ;;  %5528 = vmatpush1.bf16.msra.mxu1 %v7185_v38 }
 0x612   :  { %5498 = vmatprep.subr.bf16.mxu0 %v7189_v42  ;;  %5530 = vmatprep.subr.bf16.mxu1 %v7196_v47 }
 0x615   :  { %5500 = vmatpush1.bf16.msra.mxu0 %v7200_v50  ;;  %5532 = vmatpush1.bf16.msra.mxu1 %v7204_v54 }
 0x616   :  { %5502 = vmatprep.subr.bf16.mxu0 %v7208_v58  ;;  %5534 = vmatprep.subr.bf16.mxu1 %v7212_v61 }
 0x619   :  { %5504 = vmatpush1.bf16.msra.mxu0 %v7219_v2  ;;  %5536 = vmatpush1.bf16.msra.mxu1 %v7223_v5 }
 0x61a   :  { %5506 = vmatprep.subr.bf16.mxu0 %v7227_v8  ;;  %5538 = vmatprep.subr.bf16.mxu1 %v7231_v11 }
 0x61d   :  { %5508 = vmatpush1.bf16.msra.mxu0 %v7238_v15  ;;  %5540 = vmatpush1.bf16.msra.mxu1 %v7242_v19 }
 0x61e   :  { %5510 = vmatprep.subr.bf16.mxu0 %v7246_v24  ;;  %5542 = vmatprep.subr.bf16.mxu1 %v7250_v28 }
 0x621   :  { %5512 = vmatpush1.bf16.msra.mxu0 %v7257_v33  ;;  %5544 = vmatpush1.bf16.msra.mxu1 %v7261_v39 }
 0x622   :  { %5514 = vmatprep.subr.bf16.mxu0 %v7265_v43  ;;  %5546 = vmatprep.subr.bf16.mxu1 %v7269_v46 }
 0x625   :  { %5516 = vmatpush1.bf16.msra.mxu0 %v7276_v52  ;;  %5548 = vmatpush1.bf16.msra.mxu1 %v7280_v56 }
 0x626   :  { %5518 = vmatprep.subr.bf16.mxu0 %v7284_v60  ;;  %5550 = vmatprep.subr.bf16.mxu1 %v7288_v1 }
 0x629   :  { %5520 = vmatpush1.bf16.msra.mxu0 %v7295_v4  ;;  %5552 = vmatpush1.bf16.msra.mxu1 %v7299_v6 }
 0x62a   :  { %5554 = vmatprep.subr.bf16.mxu0 %v7314_v12  ;;  %5586 = vmatprep.subr.bf16.mxu1 %v7316_v18 }
 0x62c   :  { %2235 = vmatmul.mubr.f32.vlgmr.msra.gmra.mrb[10].mxu0 %v2027_v10  ;;  %2306 = vmatmul.mubr.f32.vlgmr.msra.gmra.mrb[10].mxu1 %v2027_v10  ;;  %v8620_v10 = vld [vmem:[#allocation33_spill] sm:$0xff] }
 0x62d   :  { %5556 = vmatpush1.bf16.msra.mxu0 %v7318_v20  ;;  %5588 = vmatpush1.bf16.msra.mxu1 %v7321_v27 }
 0x62e   :  { %5558 = vmatprep.subr.bf16.mxu0 %v7326_v36  ;;  %5590 = vmatprep.subr.bf16.mxu1 %v7328_v44 }
 0x62f   :  { %2404 = vmatprep.mubr.f32.mxu0 %v8517_v3  ;;  %2475 = vmatprep.mubr.f32.mxu1 %v8517_v3 }
 0x631   :  { %5560 = vmatpush1.bf16.msra.mxu0 %v7330_v45  ;;  %5592 = vmatpush1.bf16.msra.mxu1 %v7333_v51 }
 0x632   :  { %5562 = vmatprep.subr.bf16.mxu0 %v7338_v59  ;;  %5594 = vmatprep.subr.bf16.mxu1 %v7340_v7 }
 0x635   :  { %5564 = vmatpush1.bf16.msra.mxu0 %v7342_v9  ;;  %5596 = vmatpush1.bf16.msra.mxu1 %v7345_v14 }
 0x636   :  { %5566 = vmatprep.subr.bf16.mxu0 %v7350_v30  ;;  %5598 = vmatprep.subr.bf16.mxu1 %v8605_v62 }
 0x639   :  { %5568 = vmatpush1.bf16.msra.mxu0 %v8606_v37  ;;  %5600 = vmatpush1.bf16.msra.mxu1 %v8607_v57 }
 0x63a   :  { %5570 = vmatprep.subr.bf16.mxu0 %v8608_v21  ;;  %5602 = vmatprep.subr.bf16.mxu1 %v8609_v31  ;;  %v8626_v31 = vld [vmem:[#allocation38_spill] sm:$0xff] }
 0x63d   :  { %5572 = vmatpush1.bf16.msra.mxu0 %v8610_v48  ;;  %5604 = vmatpush1.bf16.msra.mxu1 %v8611_v41  ;;  %v8621_v48 = vld [vmem:[#allocation34_spill] sm:$0xff]  ;;  %v8622_v41 = vld [vmem:[#allocation35_spill] sm:$0xff] }
 0x63e   :  { %5574 = vmatprep.subr.bf16.mxu0 %v8612_v53  ;;  %5606 = vmatprep.subr.bf16.mxu1 %v8613_v13  ;;  %v8623_v53 = vld [vmem:[#allocation36_spill] sm:$0xff] }
 0x63f   :  { %v8624_v13 = vld [vmem:[#allocation16_spill] sm:$0xff] }
 0x641   :  { %5576 = vmatpush1.bf16.msra.mxu0 %v8614_v55  ;;  %5608 = vmatpush1.bf16.msra.mxu1 %v8615_v49  ;;  %v8625_v55 = vld [vmem:[#allocation17_spill] sm:$0xff] }
 0x642   :  { %5578 = vmatprep.subr.bf16.mxu0 %v8616_v40  ;;  %5610 = vmatprep.subr.bf16.mxu1 %v8617_v0 }
 0x645   :  { %5580 = vmatpush1.bf16.msra.mxu0 %v8618_v23  ;;  %5612 = vmatpush1.bf16.msra.mxu1 %v8619_v17 }
 0x646   :  { %5582 = vmatprep.subr.bf16.mxu0 %v8620_v10  ;;  %5614 = vmatprep.subr.bf16.mxu1 %v8621_v48 }
 0x649   :  { %5584 = vmatpush1.bf16.msra.mxu0 %v8622_v41  ;;  %5616 = vmatpush1.bf16.msra.mxu1 %v8623_v53 }
 0x64a   :  { %5618 = vmatprep.subr.bf16.mxu0 %v8624_v13  ;;  %5650 = vmatprep.subr.bf16.mxu1 %v8625_v55 }
 0x6ff   :  { %v2236_v49 = vpop.f32.mrb[10].mxu0  ;;  %v2307_v40 = vpop.f32.mrb[10].mxu1 }
 0x700   :  { %v6443_v0 = vadd.f32 %v2236_v49, %v8626_v31  ;;  %v2238_v21 = vpop.f32.mrb[11].mxu0  ;;  %v2309_v23 = vpop.f32.mrb[11].mxu1  ;;  %v6459_v53 = vadd.f32 %v2307_v40, %v7438_v16  ;;  %v8633_v40 = vld [vmem:[#allocation24_spill] sm:$0xff] }
 0x701   :  { %v6444_v17 = vadd.f32 %v2238_v21, %v8537_v32  ;;  %v6460_v41 = vadd.f32 %v2309_v23, %v8538_v63 }
 0x702   :  { %v4702_v57 = vmul.f32 -1.442695, %v6443_v0 }
 0x703   :  { %v4703_v10 = vmul.f32 -1.442695, %v6444_v17  ;;  %v4704_v48 = vmul.f32 -1.442695, %v6460_v41 }
 0x704   :  { %6654 = vpow2.f32 %v4702_v57 }
 0x705   :  { %6656 = vpow2.f32 %v4703_v10 }
 0x706   :  { %6658 = vpow2.f32 %v4704_v48 }
 0x707   :  { %6660 = vtanh.f32 %v6459_v53  ;;  %v8631_v53 = vld [vmem:[#allocation22_spill] sm:$0xff] }
 0x70e   :  { %v6655_v13 = vpop.eup %6654 }
 0x70f   :  { %v6657_v37 = vpop.eup %6656  ;;  %v2319_v55 = vadd.f32 1.0, %v6655_v13 }
 0x710   :  { %v2325_v62 = vadd.f32 1.0, %v6657_v37  ;;  %v6659_v49 = vpop.eup %6658  ;;  %v8629_v37 = vld [vmem:[#allocation20_spill] sm:$0xff] }
 0x711   :  { %6662 = vrcp.f32 %v2319_v55  ;;  %v6661_v31 = vpop.eup %6660  ;;  %v2332_v57 = vadd.f32 1.0, %v6659_v49  ;;  %v8632_v55 = vld [vmem:[#allocation23_spill] sm:$0xff]  ;;  %v8634_v49 = vld [vmem:[#allocation25_spill] sm:$0xff] }
 0x712   :  { %6664 = vrcp.f32 %v2325_v62  ;;  %v8628_v62 = vld [vmem:[#allocation19_spill] sm:$0xff] }
 0x713   :  { %6666 = vrcp.f32 %v2332_v57  ;;  %v8638_v57 = vld [vmem:[#allocation29_spill] sm:$0xff] }
 0x71b   :  { %v6663_v21 = vpop.eup %6662 }
 0x71c   :  { %v6665_v0 = vpop.eup %6664  ;;  %v2336_v17 = vmul.f32 %v6663_v21, %v6661_v31  ;;  %v8630_v31 = vld [vmem:[#allocation21_spill] sm:$0xff]  ;;  %v8635_v21 = vld [vmem:[#allocation26_spill] sm:$0xff] }
 0x71d   :  { %v2335_v10 = vmul.f32 %v6665_v0, %v7745_v26  ;;  %v6667_v41 = vpop.eup %6666  ;;  %v8627_v26 = vld [vmem:[#allocation18_spill] sm:$0xff]  ;;  %v8636_v0 = vld [vmem:[#allocation27_spill] sm:$0xff] }
 0x71f   :  { %v7821_v23 = vadd.f32 %v2336_v17, %v2335_v10  ;;  %v8637_v17 = vld [vmem:[#allocation28_spill] sm:$0xff]  ;;  %v8639_v10 = vld [vmem:[#allocation30_spill] sm:$0xff] }
 0x721   :  { %6668 = vtanh.f32 %v7821_v23 }
 0x72b   :  { %v6669_v13 = vpop.eup %6668 }
 0x72c   :  { %v2339_v48 = vmul.f32 %v6669_v13, %v6667_v41  ;;  %v8640_v41 = vld [vmem:[#allocation31_spill] sm:$0xff]  ;;  %v8641_v13 = vld [vmem:[#allocation32_spill] sm:$0xff] }
 0x72e   :  { %2405 = vmatmul.mubr.f32.vlgmr.msra.gmra.mrb[26].mxu0 %v2339_v48  ;;  %2476 = vmatmul.mubr.f32.vlgmr.msra.gmra.mrb[26].mxu1 %v2339_v48 }
 0x72f   :  { %5620 = vmatpush1.bf16.msra.mxu0 %v7165_v22  ;;  %5652 = vmatpush1.bf16.msra.mxu1 %v7168_v25 }
 0x730   :  { %5622 = vmatprep.subr.bf16.mxu0 %v7172_v29  ;;  %5654 = vmatprep.subr.bf16.mxu1 %v7179_v34 }
 0x731   :  { %2546 = vmatprep.mubr.f32.mxu0 %v8517_v3  ;;  %2617 = vmatprep.mubr.f32.mxu1 %v8517_v3 }
 0x733   :  { %5624 = vmatpush1.bf16.msra.mxu0 %v7181_v35  ;;  %5656 = vmatpush1.bf16.msra.mxu1 %v7185_v38 }
 0x734   :  { %5626 = vmatprep.subr.bf16.mxu0 %v7189_v42  ;;  %5658 = vmatprep.subr.bf16.mxu1 %v7196_v47 }
 0x737   :  { %5628 = vmatpush1.bf16.msra.mxu0 %v7200_v50  ;;  %5660 = vmatpush1.bf16.msra.mxu1 %v7204_v54 }
 0x738   :  { %5630 = vmatprep.subr.bf16.mxu0 %v7208_v58  ;;  %5662 = vmatprep.subr.bf16.mxu1 %v7212_v61 }
 0x73b   :  { %5632 = vmatpush1.bf16.msra.mxu0 %v7219_v2  ;;  %5664 = vmatpush1.bf16.msra.mxu1 %v7223_v5 }
 0x73c   :  { %5634 = vmatprep.subr.bf16.mxu0 %v7227_v8  ;;  %5666 = vmatprep.subr.bf16.mxu1 %v7231_v11 }
 0x73f   :  { %5636 = vmatpush1.bf16.msra.mxu0 %v7238_v15  ;;  %5668 = vmatpush1.bf16.msra.mxu1 %v7242_v19 }
 0x740   :  { %5638 = vmatprep.subr.bf16.mxu0 %v7246_v24  ;;  %5670 = vmatprep.subr.bf16.mxu1 %v7250_v28 }
 0x743   :  { %5640 = vmatpush1.bf16.msra.mxu0 %v7257_v33  ;;  %5672 = vmatpush1.bf16.msra.mxu1 %v7261_v39 }
 0x744   :  { %5642 = vmatprep.subr.bf16.mxu0 %v7265_v43  ;;  %5674 = vmatprep.subr.bf16.mxu1 %v7269_v46 }
 0x747   :  { %5644 = vmatpush1.bf16.msra.mxu0 %v7276_v52  ;;  %5676 = vmatpush1.bf16.msra.mxu1 %v7280_v56 }
 0x748   :  { %5646 = vmatprep.subr.bf16.mxu0 %v7284_v60  ;;  %5678 = vmatprep.subr.bf16.mxu1 %v7288_v1 }
 0x74b   :  { %5648 = vmatpush1.bf16.msra.mxu0 %v7295_v4  ;;  %5680 = vmatpush1.bf16.msra.mxu1 %v7299_v6 }
 0x74c   :  { %5682 = vmatprep.subr.bf16.mxu0 %v7314_v12  ;;  %5714 = vmatprep.subr.bf16.mxu1 %v7316_v18 }
 0x74e   :  { %2547 = vmatmul.mubr.f32.vlgmr.msra.gmra.mrb[12].mxu0 %v2339_v48  ;;  %2618 = vmatmul.mubr.f32.vlgmr.msra.gmra.mrb[12].mxu1 %v2339_v48  ;;  %v8642_v48 = vld [vmem:[#allocation33_spill] sm:$0xff] }
 0x74f   :  { %5684 = vmatpush1.bf16.msra.mxu0 %v7318_v20  ;;  %5716 = vmatpush1.bf16.msra.mxu1 %v7321_v27 }
 0x750   :  { %5686 = vmatprep.subr.bf16.mxu0 %v7326_v36  ;;  %5718 = vmatprep.subr.bf16.mxu1 %v7328_v44 }
 0x751   :  { %2716 = vmatprep.mubr.f32.mxu0 %v8517_v3  ;;  %2787 = vmatprep.mubr.f32.mxu1 %v8517_v3 }
 0x753   :  { %5688 = vmatpush1.bf16.msra.mxu0 %v7330_v45  ;;  %5720 = vmatpush1.bf16.msra.mxu1 %v7333_v51 }
 0x754   :  { %5690 = vmatprep.subr.bf16.mxu0 %v7338_v59  ;;  %5722 = vmatprep.subr.bf16.mxu1 %v7340_v7 }
 0x757   :  { %5692 = vmatpush1.bf16.msra.mxu0 %v7342_v9  ;;  %5724 = vmatpush1.bf16.msra.mxu1 %v7345_v14 }
 0x758   :  { %5694 = vmatprep.subr.bf16.mxu0 %v7350_v30  ;;  %5726 = vmatprep.subr.bf16.mxu1 %v8627_v26 }
 0x75b   :  { %5696 = vmatpush1.bf16.msra.mxu0 %v8628_v62  ;;  %5728 = vmatpush1.bf16.msra.mxu1 %v8629_v37 }
 0x75c   :  { %5698 = vmatprep.subr.bf16.mxu0 %v8630_v31  ;;  %5730 = vmatprep.subr.bf16.mxu1 %v8631_v53  ;;  %v8648_v53 = vld [vmem:[#allocation38_spill] sm:$0xff] }
 0x75f   :  { %5700 = vmatpush1.bf16.msra.mxu0 %v8632_v55  ;;  %5732 = vmatpush1.bf16.msra.mxu1 %v8633_v40  ;;  %v8643_v55 = vld [vmem:[#allocation34_spill] sm:$0xff]  ;;  %v8644_v40 = vld [vmem:[#allocation35_spill] sm:$0xff] }
 0x760   :  { %5702 = vmatprep.subr.bf16.mxu0 %v8634_v49  ;;  %5734 = vmatprep.subr.bf16.mxu1 %v8635_v21  ;;  %v8645_v49 = vld [vmem:[#allocation36_spill] sm:$0xff] }
 0x761   :  { %v8646_v21 = vld [vmem:[#allocation16_spill] sm:$0xff] }
 0x763   :  { %5704 = vmatpush1.bf16.msra.mxu0 %v8636_v0  ;;  %5736 = vmatpush1.bf16.msra.mxu1 %v8637_v17  ;;  %v8647_v0 = vld [vmem:[#allocation17_spill] sm:$0xff] }
 0x764   :  { %5706 = vmatprep.subr.bf16.mxu0 %v8638_v57  ;;  %5738 = vmatprep.subr.bf16.mxu1 %v8639_v10 }
 0x767   :  { %5708 = vmatpush1.bf16.msra.mxu0 %v8640_v41  ;;  %5740 = vmatpush1.bf16.msra.mxu1 %v8641_v13 }
 0x768   :  { %5710 = vmatprep.subr.bf16.mxu0 %v8642_v48  ;;  %5742 = vmatprep.subr.bf16.mxu1 %v8643_v55 }
 0x76b   :  { %5712 = vmatpush1.bf16.msra.mxu0 %v8644_v40  ;;  %5744 = vmatpush1.bf16.msra.mxu1 %v8645_v49 }
 0x76c   :  { %5746 = vmatprep.subr.bf16.mxu0 %v8646_v21  ;;  %5778 = vmatprep.subr.bf16.mxu1 %v8647_v0 }
 0x821   :  { %v2548_v17 = vpop.f32.mrb[12].mxu0  ;;  %v2619_v57 = vpop.f32.mrb[12].mxu1 }
 0x822   :  { %v6445_v10 = vadd.f32 %v2548_v17, %v8648_v53  ;;  %v2550_v31 = vpop.f32.mrb[13].mxu0  ;;  %v2621_v41 = vpop.f32.mrb[13].mxu1  ;;  %v6461_v49 = vadd.f32 %v2619_v57, %v7438_v16 }
 0x823   :  { %v6446_v13 = vadd.f32 %v2550_v31, %v8537_v32  ;;  %v6462_v40 = vadd.f32 %v2621_v41, %v8538_v63 }
 0x824   :  { %v4705_v37 = vmul.f32 -1.442695, %v6445_v10 }
 0x825   :  { %v4706_v48 = vmul.f32 -1.442695, %v6446_v13  ;;  %v4707_v55 = vmul.f32 -1.442695, %v6462_v40 }
 0x826   :  { %6670 = vpow2.f32 %v4705_v37 }
 0x827   :  { %6672 = vpow2.f32 %v4706_v48 }
 0x828   :  { %6674 = vpow2.f32 %v4707_v55 }
 0x829   :  { %6676 = vtanh.f32 %v6461_v49  ;;  %v239_v49 = vld [vmem:[#allocation7 + $0x20] sm:$0xff] }
 0x830   :  { %v6671_v21 = vpop.eup %6670 }
 0x831   :  { %v6673_v62 = vpop.eup %6672  ;;  %v2631_v0 = vadd.f32 1.0, %v6671_v21  ;;  %v237_v21 = vld [vmem:[#allocation7 + $0x10] sm:$0xff] }
 0x832   :  { %v2637_v26 = vadd.f32 1.0, %v6673_v62  ;;  %v6675_v17 = vpop.eup %6674 }
 0x833   :  { %6678 = vrcp.f32 %v2631_v0  ;;  %v6677_v53 = vpop.eup %6676  ;;  %v2644_v37 = vadd.f32 1.0, %v6675_v17  ;;  %v241_v0 = vld [vmem:[#allocation7 + $0x30] sm:$0xff]  ;;  %v244_v17 = vld [vmem:[#allocation7 + $0x48] sm:$0xff] }
 0x834   :  { %6680 = vrcp.f32 %v2637_v26 }
 0x835   :  { %6682 = vrcp.f32 %v2644_v37 }
 0x83d   :  { %v6679_v31 = vpop.eup %6678 }
 0x83e   :  { %v6681_v10 = vpop.eup %6680  ;;  %v2648_v13 = vmul.f32 %v6679_v31, %v6677_v53  ;;  %v248_v31 = vld [vmem:[#allocation7 + $0x68] sm:$0xff] }
 0x83f   :  { %v2647_v48 = vmul.f32 %v6681_v10, %v7821_v23  ;;  %v6683_v40 = vpop.eup %6682  ;;  %v246_v10 = vld [vmem:[#allocation7 + $0x58] sm:$0xff] }
 0x841   :  { %v7897_v41 = vadd.f32 %v2648_v13, %v2647_v48  ;;  %v250_v13 = vld [vmem:[#allocation7 + $0x78] sm:$0xff] }
 0x843   :  { %6684 = vtanh.f32 %v7897_v41 }
 0x84d   :  { %v6685_v57 = vpop.eup %6684 }
 0x84e   :  { %v2651_v55 = vmul.f32 %v6685_v57, %v6683_v40  ;;  %v7979_v57 = vpack.c.bf16 %v241_v0, %v237_v21 }
 0x850   :  { %2717 = vmatmul.mubr.f32.vlgmr.msra.gmra.mrb[28].mxu0 %v2651_v55  ;;  %2788 = vmatmul.mubr.f32.vlgmr.msra.gmra.mrb[28].mxu1 %v2651_v55 }
 0x851   :  { %5748 = vmatpush1.bf16.msra.mxu0 %v7165_v22  ;;  %5780 = vmatpush1.bf16.msra.mxu1 %v7168_v25  ;;  %v8649_v22 = vld [vmem:[#allocation18_spill] sm:$0xff]  ;;  %v8650_v25 = vld [vmem:[#allocation19_spill] sm:$0xff] }
 0x852   :  { %5750 = vmatprep.subr.bf16.mxu0 %v7172_v29  ;;  %5782 = vmatprep.subr.bf16.mxu1 %v7179_v34  ;;  %v8651_v29 = vld [vmem:[#allocation20_spill] sm:$0xff]  ;;  %v8652_v34 = vld [vmem:[#allocation21_spill] sm:$0xff] }
 0x853   :  { %2858 = vmatprep.mubr.f32.mxu0 %v8517_v3  ;;  %2929 = vmatprep.mubr.f32.mxu1 %v8517_v3 }
 0x855   :  { %5752 = vmatpush1.bf16.msra.mxu0 %v7181_v35  ;;  %5784 = vmatpush1.bf16.msra.mxu1 %v7185_v38  ;;  %v8653_v35 = vld [vmem:[#allocation22_spill] sm:$0xff]  ;;  %v8654_v38 = vld [vmem:[#allocation23_spill] sm:$0xff] }
 0x856   :  { %5754 = vmatprep.subr.bf16.mxu0 %v7189_v42  ;;  %5786 = vmatprep.subr.bf16.mxu1 %v7196_v47  ;;  %v8655_v42 = vld [vmem:[#allocation24_spill] sm:$0xff]  ;;  %v8656_v47 = vld [vmem:[#allocation25_spill] sm:$0xff] }
 0x859   :  { %5756 = vmatpush1.bf16.msra.mxu0 %v7200_v50  ;;  %5788 = vmatpush1.bf16.msra.mxu1 %v7204_v54  ;;  %v8657_v50 = vld [vmem:[#allocation26_spill] sm:$0xff]  ;;  %v8658_v54 = vld [vmem:[#allocation27_spill] sm:$0xff] }
 0x85a   :  { %5758 = vmatprep.subr.bf16.mxu0 %v7208_v58  ;;  %5790 = vmatprep.subr.bf16.mxu1 %v7212_v61  ;;  %v8659_v58 = vld [vmem:[#allocation28_spill] sm:$0xff]  ;;  %v8660_v61 = vld [vmem:[#allocation29_spill] sm:$0xff] }
 0x85d   :  { %5760 = vmatpush1.bf16.msra.mxu0 %v7219_v2  ;;  %5792 = vmatpush1.bf16.msra.mxu1 %v7223_v5  ;;  %v8661_v2 = vld [vmem:[#allocation30_spill] sm:$0xff]  ;;  %v8662_v5 = vld [vmem:[#allocation31_spill] sm:$0xff] }
 0x85e   :  { %5762 = vmatprep.subr.bf16.mxu0 %v7227_v8  ;;  %5794 = vmatprep.subr.bf16.mxu1 %v7231_v11  ;;  %v8663_v8 = vld [vmem:[#allocation32_spill] sm:$0xff]  ;;  %v8664_v11 = vld [vmem:[#allocation33_spill] sm:$0xff] }
 0x861   :  { %5764 = vmatpush1.bf16.msra.mxu0 %v7238_v15  ;;  %5796 = vmatpush1.bf16.msra.mxu1 %v7242_v19  ;;  %v8665_v15 = vld [vmem:[#allocation34_spill] sm:$0xff]  ;;  %v8666_v19 = vld [vmem:[#allocation35_spill] sm:$0xff] }
 0x862   :  { %5766 = vmatprep.subr.bf16.mxu0 %v7246_v24  ;;  %5798 = vmatprep.subr.bf16.mxu1 %v7250_v28  ;;  %v8667_v24 = vld [vmem:[#allocation36_spill] sm:$0xff] }
 0x863   :  { %v236_v28 = vld [vmem:[#allocation7 + $0x8] sm:$0xff] }
 0x865   :  { %5768 = vmatpush1.bf16.msra.mxu0 %v7257_v33  ;;  %5800 = vmatpush1.bf16.msra.mxu1 %v7261_v39  ;;  %v240_v33 = vld [vmem:[#allocation7 + $0x28] sm:$0xff]  ;;  %v238_v39 = vld [vmem:[#allocation7 + $0x18] sm:$0xff] }
 0x866   :  { %5770 = vmatprep.subr.bf16.mxu0 %v7265_v43  ;;  %5802 = vmatprep.subr.bf16.mxu1 %v7269_v46  ;;  %v7966_v43 = vpack.c.bf16 %v240_v33, %v236_v28  ;;  %v242_v46 = vld [vmem:[#allocation7 + $0x38] sm:$0xff] }
 0x867   :  { %v262_v28 = vld [vmem:[#allocation7 + $0xd8] sm:$0xff] }
 0x868   :  { %v266_v33 = vld [vmem:[#allocation7 + $0xf8] sm:$0xff] }
 0x869   :  { %5772 = vmatpush1.bf16.msra.mxu0 %v7276_v52  ;;  %5804 = vmatpush1.bf16.msra.mxu1 %v7280_v56  ;;  %v7968_v52 = vpack.c.bf16 %v242_v46, %v238_v39 }
 0x86a   :  { %5774 = vmatprep.subr.bf16.mxu0 %v7284_v60  ;;  %5806 = vmatprep.subr.bf16.mxu1 %v7288_v1  ;;  %v8668_v1 = vld [vmem:[#allocation38_spill] sm:$0xff] }
 0x86d   :  { %5776 = vmatpush1.bf16.msra.mxu0 %v7295_v4  ;;  %5808 = vmatpush1.bf16.msra.mxu1 %v7299_v6 }
 0x86e   :  { %5810 = vmatprep.subr.bf16.mxu0 %v7314_v12  ;;  %5842 = vmatprep.subr.bf16.mxu1 %v7316_v18 }
 0x870   :  { %2859 = vmatmul.mubr.f32.vlgmr.msra.gmra.mrb[14].mxu0 %v2651_v55  ;;  %2930 = vmatmul.mubr.f32.vlgmr.msra.gmra.mrb[14].mxu1 %v2651_v55  ;;  %v243_v55 = vld [vmem:[#allocation7 + $0x40] sm:$0xff] }
 0x871   :  { %5812 = vmatpush1.bf16.msra.mxu0 %v7318_v20  ;;  %5844 = vmatpush1.bf16.msra.mxu1 %v7321_v27 }
 0x872   :  { %5814 = vmatprep.subr.bf16.mxu0 %v7326_v36  ;;  %5846 = vmatprep.subr.bf16.mxu1 %v7328_v44 }
 0x873   :  { %3028 = vmatprep.mubr.f32.mxu0 %v8517_v3  ;;  %3099 = vmatprep.mubr.f32.mxu1 %v8517_v3 }
 0x875   :  { %5816 = vmatpush1.bf16.msra.mxu0 %v7330_v45  ;;  %5848 = vmatpush1.bf16.msra.mxu1 %v7333_v51 }
 0x876   :  { %5818 = vmatprep.subr.bf16.mxu0 %v7338_v59  ;;  %5850 = vmatprep.subr.bf16.mxu1 %v7340_v7 }
 0x879   :  { %5820 = vmatpush1.bf16.msra.mxu0 %v7342_v9  ;;  %5852 = vmatpush1.bf16.msra.mxu1 %v7345_v14 }
 0x87a   :  { %5822 = vmatprep.subr.bf16.mxu0 %v7350_v30  ;;  %5854 = vmatprep.subr.bf16.mxu1 %v8649_v22  ;;  %v247_v22 = vld [vmem:[#allocation7 + $0x60] sm:$0xff] }
 0x87d   :  { %5824 = vmatpush1.bf16.msra.mxu0 %v8650_v25  ;;  %5856 = vmatpush1.bf16.msra.mxu1 %v8651_v29  ;;  %v7981_v25 = vpack.c.bf16 %v248_v31, %v244_v17  ;;  %v7983_v29 = vpack.c.bf16 %v250_v13, %v246_v10  ;;  %v277_v17 = vld [vmem:[#allocation7 + $0x150] sm:$0xff]  ;;  %v284_v10 = vld [vmem:[#allocation7 + $0x188] sm:$0xff] }
 0x87e   :  { %5826 = vmatprep.subr.bf16.mxu0 %v8652_v34  ;;  %5858 = vmatprep.subr.bf16.mxu1 %v8653_v35  ;;  %v245_v34 = vld [vmem:[#allocation7 + $0x50] sm:$0xff]  ;;  %v288_v13 = vld [vmem:[#allocation7 + $0x1a8] sm:$0xff] }
 0x87f   :  { %v249_v35 = vld [vmem:[#allocation7 + $0x70] sm:$0xff] }
 0x880   :  { %v281_v31 = vld [vmem:[#allocation7 + $0x170] sm:$0xff] }
 0x881   :  { %5828 = vmatpush1.bf16.msra.mxu0 %v8654_v38  ;;  %5860 = vmatpush1.bf16.msra.mxu1 %v8655_v42  ;;  %v252_v38 = vld [vmem:[#allocation7 + $0x88] sm:$0xff] }
 0x882   :  { %5830 = vmatprep.subr.bf16.mxu0 %v8656_v47  ;;  %5862 = vmatprep.subr.bf16.mxu1 %v8657_v50  ;;  %v256_v42 = vld [vmem:[#allocation7 + $0xa8] sm:$0xff]  ;;  %v254_v47 = vld [vmem:[#allocation7 + $0x98] sm:$0xff] }
 0x883   :  { %v258_v50 = vld [vmem:[#allocation7 + $0xb8] sm:$0xff] }
 0x885   :  { %5832 = vmatpush1.bf16.msra.mxu0 %v8658_v54  ;;  %5864 = vmatpush1.bf16.msra.mxu1 %v8659_v58  ;;  %v7987_v54 = vpack.c.bf16 %v247_v22, %v243_v55  ;;  %v7989_v58 = vpack.c.bf16 %v249_v35, %v245_v34  ;;  %v8039_v22 = vpack.c.bf16 %v281_v31, %v277_v17  ;;  %v287_v34 = vld [vmem:[#allocation7 + $0x1a0] sm:$0xff] }
 0x886   :  { %5834 = vmatprep.subr.bf16.mxu0 %v8660_v61  ;;  %5866 = vmatprep.subr.bf16.mxu1 %v8661_v2  ;;  %v251_v61 = vld [vmem:[#allocation7 + $0x80] sm:$0xff]  ;;  %v8043_v35 = vpack.c.bf16 %v288_v13, %v284_v10 }
 0x887   :  { %v255_v2 = vld [vmem:[#allocation7 + $0xa0] sm:$0xff] }
 0x888   :  { %v8001_v39 = vpack.c.bf16 %v255_v2, %v251_v61  ;;  %v296_v61 = vld [vmem:[#allocation7 + $0x1e8] sm:$0xff]  ;;  %v294_v2 = vld [vmem:[#allocation7 + $0x1d8] sm:$0xff] }
 0x889   :  { %5836 = vmatpush1.bf16.msra.mxu0 %v8662_v5  ;;  %5868 = vmatpush1.bf16.msra.mxu1 %v8663_v8  ;;  %v7993_v5 = vpack.c.bf16 %v256_v42, %v252_v38  ;;  %v7995_v8 = vpack.c.bf16 %v258_v50, %v254_v47  ;;  %v285_v42 = vld [vmem:[#allocation7 + $0x190] sm:$0xff]  ;;  %v292_v50 = vld [vmem:[#allocation7 + $0x1c8] sm:$0xff] }
 0x88a   :  { %5838 = vmatprep.subr.bf16.mxu0 %v8664_v11  ;;  %5870 = vmatprep.subr.bf16.mxu1 %v8665_v15  ;;  %v253_v11 = vld [vmem:[#allocation7 + $0x90] sm:$0xff] }
 0x88b   :  { %v257_v15 = vld [vmem:[#allocation7 + $0xb0] sm:$0xff] }
 0x88c   :  { %v8003_v46 = vpack.c.bf16 %v257_v15, %v253_v11  ;;  %v289_v47 = vld [vmem:[#allocation7 + $0x1b0] sm:$0xff]  ;;  %v298_v11 = vld [vmem:[#allocation7 + $0x1f8] sm:$0xff] }
 0x88d   :  { %5840 = vmatpush1.bf16.msra.mxu0 %v8666_v19  ;;  %5872 = vmatpush1.bf16.msra.mxu1 %v8667_v24  ;;  %v260_v19 = vld [vmem:[#allocation7 + $0xc8] sm:$0xff] }
 0x88e   :  { %5874 = vmatprep.subr.bf16.mxu0 %v7966_v43  ;;  %5906 = vmatprep.subr.bf16.mxu1 %v7968_v52  ;;  %v264_v24 = vld [vmem:[#allocation7 + $0xe8] sm:$0xff] }
 0x943   :  { %v2860_v56 = vpop.f32.mrb[14].mxu0  ;;  %v2931_v60 = vpop.f32.mrb[14].mxu1 }
 0x944   :  { %v6447_v4 = vadd.f32 %v2860_v56, %v8668_v1  ;;  %v2862_v6 = vpop.f32.mrb[15].mxu0  ;;  %v2933_v12 = vpop.f32.mrb[15].mxu1  ;;  %v6463_v45 = vadd.f32 %v2931_v60, %v7438_v16  ;;  %v235_v16 = vld [vmem:[#allocation7] sm:$0xff]  ;;  %v8007_v1 = vpack.c.bf16 %v264_v24, %v260_v19  ;;  %v8051_v19 = vpack.c.bf16 %v289_v47, %v285_v42 }
 0x945   :  { %v6448_v18 = vadd.f32 %v2862_v6, %v8537_v32  ;;  %v6464_v36 = vadd.f32 %v2933_v12, %v8538_v63  ;;  %v7977_v40 = vpack.c.bf16 %v239_v49, %v235_v16  ;;  %v259_v56 = vld [vmem:[#allocation7 + $0xc0] sm:$0xff]  ;;  %v261_v6 = vld [vmem:[#allocation7 + $0xd0] sm:$0xff] }
 0x946   :  { %v4708_v20 = vmul.f32 -1.442695, %v6447_v4  ;;  %v263_v60 = vld [vmem:[#allocation7 + $0xe0] sm:$0xff]  ;;  %v8009_v4 = vpack.c.bf16 %v266_v33, %v262_v28  ;;  %v265_v12 = vld [vmem:[#allocation7 + $0xf0] sm:$0xff]  ;;  %v8055_v28 = vpack.c.bf16 %v296_v61, %v292_v50  ;;  %v8057_v33 = vpack.c.bf16 %v298_v11, %v294_v2 }
 0x947   :  { %v4709_v27 = vmul.f32 -1.442695, %v6448_v18  ;;  %v4710_v44 = vmul.f32 -1.442695, %v6464_v36  ;;  %v268_v18 = vld [vmem:[#allocation7 + $0x108] sm:$0xff]  ;;  %v274_v36 = vld [vmem:[#allocation7 + $0x138] sm:$0xff] }
 0x948   :  { %6686 = vpow2.f32 %v4708_v20  ;;  %v272_v20 = vld [vmem:[#allocation7 + $0x128] sm:$0xff]  ;;  %v275_v16 = vld [vmem:[#allocation7 + $0x140] sm:$0xff] }
 0x949   :  { %6688 = vpow2.f32 %v4709_v27  ;;  %v270_v27 = vld [vmem:[#allocation7 + $0x118] sm:$0xff]  ;;  %v279_v49 = vld [vmem:[#allocation7 + $0x160] sm:$0xff] }
 0x94a   :  { %6690 = vpow2.f32 %v4710_v44  ;;  %v8013_v44 = vpack.c.bf16 %v263_v60, %v259_v56  ;;  %v8037_v55 = vpack.c.bf16 %v279_v49, %v275_v16  ;;  %v291_v24 = vld [vmem:[#allocation7 + $0x1c0] sm:$0xff]  ;;  %v293_v60 = vld [vmem:[#allocation7 + $0x1d0] sm:$0xff] }
 0x94b   :  { %6692 = vtanh.f32 %v6463_v45  ;;  %v8015_v45 = vpack.c.bf16 %v265_v12, %v261_v6  ;;  %v295_v56 = vld [vmem:[#allocation7 + $0x1e0] sm:$0xff]  ;;  %v297_v6 = vld [vmem:[#allocation7 + $0x1f0] sm:$0xff] }
 0x94c   :  { %v8061_v12 = vpack.c.bf16 %v295_v56, %v291_v24 }
 0x952   :  { %v6687_v51 = vpop.eup %6686 }
 0x953   :  { %v6689_v59 = vpop.eup %6688  ;;  %v2943_v7 = vadd.f32 1.0, %v6687_v51  ;;  %v267_v51 = vld [vmem:[#allocation7 + $0x100] sm:$0xff] }
 0x954   :  { %v2949_v9 = vadd.f32 1.0, %v6689_v59  ;;  %v6691_v14 = vpop.eup %6690  ;;  %v271_v59 = vld [vmem:[#allocation7 + $0x120] sm:$0xff] }
 0x955   :  { %6694 = vrcp.f32 %v2943_v7  ;;  %v6693_v30 = vpop.eup %6692  ;;  %v2956_v62 = vadd.f32 1.0, %v6691_v14  ;;  %v8019_v7 = vpack.c.bf16 %v272_v20, %v268_v18  ;;  %v269_v14 = vld [vmem:[#allocation7 + $0x110] sm:$0xff]  ;;  %v8063_v18 = vpack.c.bf16 %v297_v6, %v293_v60  ;;  %v299_v20 = vld [vmem:[%s8430_s6] sm:$0xf] }
 0x956   :  { %6696 = vrcp.f32 %v2949_v9  ;;  %v8021_v9 = vpack.c.bf16 %v274_v36, %v270_v27  ;;  %v8669_v27 = vld [vmem:[#allocation37_spill] sm:$0xff] }
 0x957   :  { %6698 = vrcp.f32 %v2956_v62  ;;  %v282_v62 = vld [vmem:[#allocation7 + $0x178] sm:$0xff]  ;;  %v8670_v36 = vsub.s32 0, %v8669_v27  ;;  %v8672_v31 = vsub.s32 3, %v8669_v27 }
 0x959   :  { %v8122_v10 = vrot.slane %v299_v20, %v8672_v31 }
 0x95f   :  { %v6695_v32 = vpop.eup %6694 }
 0x960   :  { %v6697_v23 = vpop.eup %6696  ;;  %v2960_v26 = vmul.f32 %v6695_v32, %v6693_v30  ;;  %v273_v30 = vld [vmem:[#allocation7 + $0x130] sm:$0xff]  ;;  %v276_v32 = vld [vmem:[#allocation7 + $0x148] sm:$0xff] }
 0x961   :  { %v2959_v53 = vmul.f32 %v6697_v23, %v7897_v41  ;;  %v6699_v37 = vpop.eup %6698  ;;  %v280_v23 = vld [vmem:[#allocation7 + $0x168] sm:$0xff] }
 0x962   :  { %v8031_v21 = vpack.c.bf16 %v280_v23, %v276_v32 }
 0x963   :  { %v2961_v63 = vadd.f32 %v2960_v26, %v2959_v53  ;;  %v278_v26 = vld [vmem:[#allocation7 + $0x158] sm:$0xff]  ;;  %v8025_v53 = vpack.c.bf16 %v271_v59, %v267_v51  ;;  %v8112_v51 = vrot.slane %v299_v20, %v8670_v36  ;;  %v8671_v59 = vsub.s32 1, %v8669_v27 }
 0x964   :  { %v8033_v0 = vpack.c.bf16 %v282_v62, %v278_v26 }
 0x965   :  { %6700 = vtanh.f32 %v2961_v63  ;;  %v8027_v63 = vpack.c.bf16 %v273_v30, %v269_v14  ;;  %v8116_v14 = vrot.slane %v299_v20, %v8671_v59 }
 0x96f   :  { %v6701_v48 = vpop.eup %6700 }
 0x970   :  { %v2963_v41 = vmul.f32 %v6701_v48, %v6699_v37  ;;  %v286_v37 = vld [vmem:[#allocation7 + $0x198] sm:$0xff] }
 0x971   :  { %v290_v48 = vld [vmem:[#allocation7 + $0x1b8] sm:$0xff] }
 0x972   :  { %3029 = vmatmul.mubr.f32.vlgmr.msra.gmra.mrb[30].mxu0 %v2963_v41  ;;  %3100 = vmatmul.mubr.f32.vlgmr.msra.gmra.mrb[30].mxu1 %v2963_v41  ;;  %v283_v41 = vld [vmem:[#allocation7 + $0x180] sm:$0xff]  ;;  %v8045_v38 = vpack.c.bf16 %v290_v48, %v286_v37  ;;  %v8673_v37 = vsub.s32 2, %v8669_v27 }
 0x973   :  { %5876 = vmatpush1.bf16.msra.mxu0 %v7977_v40  ;;  %5908 = vmatpush1.bf16.msra.mxu1 %v7979_v57  ;;  %v8049_v15 = vpack.c.bf16 %v287_v34, %v283_v41 }
 0x974   :  { %5878 = vmatprep.subr.bf16.mxu0 %v7981_v25  ;;  %5910 = vmatprep.subr.bf16.mxu1 %v7983_v29  ;;  %v8127_v48 = vrot.slane %v299_v20, %v8673_v37 }
 0x975   :  { %3170 = vmatprep.mubr.f32.mxu0 %v8517_v3  ;;  %3241 = vmatprep.mubr.f32.mxu1 %v8517_v3 }
 0x977   :  { %5880 = vmatpush1.bf16.msra.mxu0 %v7987_v54  ;;  %5912 = vmatpush1.bf16.msra.mxu1 %v7989_v58 }
 0x978   :  { %5882 = vmatprep.subr.bf16.mxu0 %v7993_v5  ;;  %5914 = vmatprep.subr.bf16.mxu1 %v7995_v8 }
 0x97b   :  { %5884 = vmatpush1.bf16.msra.mxu0 %v8001_v39  ;;  %5916 = vmatpush1.bf16.msra.mxu1 %v8003_v46 }
 0x97c   :  { %5886 = vmatprep.subr.bf16.mxu0 %v8007_v1  ;;  %5918 = vmatprep.subr.bf16.mxu1 %v8009_v4 }
 0x97f   :  { %5888 = vmatpush1.bf16.msra.mxu0 %v8013_v44  ;;  %5920 = vmatpush1.bf16.msra.mxu1 %v8015_v45 }
 0x980   :  { %5890 = vmatprep.subr.bf16.mxu0 %v8019_v7  ;;  %5922 = vmatprep.subr.bf16.mxu1 %v8021_v9 }
 0x983   :  { %5892 = vmatpush1.bf16.msra.mxu0 %v8025_v53  ;;  %5924 = vmatpush1.bf16.msra.mxu1 %v8027_v63 }
 0x984   :  { %5894 = vmatprep.subr.bf16.mxu0 %v8031_v21  ;;  %5926 = vmatprep.subr.bf16.mxu1 %v8033_v0 }
 0x987   :  { %5896 = vmatpush1.bf16.msra.mxu0 %v8037_v55  ;;  %5928 = vmatpush1.bf16.msra.mxu1 %v8039_v22 }
 0x988   :  { %5898 = vmatprep.subr.bf16.mxu0 %v8043_v35  ;;  %5930 = vmatprep.subr.bf16.mxu1 %v8045_v38 }
 0x98b   :  { %5900 = vmatpush1.bf16.msra.mxu0 %v8049_v15  ;;  %5932 = vmatpush1.bf16.msra.mxu1 %v8051_v19 }
 0x98c   :  { %5902 = vmatprep.subr.bf16.mxu0 %v8055_v28  ;;  %5934 = vmatprep.subr.bf16.mxu1 %v8057_v33 }
 0x98f   :  { %5904 = vmatpush1.bf16.msra.mxu0 %v8061_v12  ;;  %5936 = vmatpush1.bf16.msra.mxu1 %v8063_v18 }
 0x990   :  { %5938 = vmatprep.subr.bf16.mxu0 %v7966_v43  ;;  %5970 = vmatprep.subr.bf16.mxu1 %v7968_v52 }
 0x992   :  { %3171 = vmatmul.mubr.f32.vlgmr.msra.gmra.mrb[16].mxu0 %v8517_v3  ;;  %3242 = vmatmul.mubr.f32.vlgmr.msra.gmra.mrb[16].mxu1 %v8517_v3 }
 0x993   :  { %5940 = vmatpush1.bf16.msra.mxu0 %v7977_v40  ;;  %5972 = vmatpush1.bf16.msra.mxu1 %v7979_v57 }
 0x994   :  { %5942 = vmatprep.subr.bf16.mxu0 %v7981_v25  ;;  %5974 = vmatprep.subr.bf16.mxu1 %v7983_v29 }
 0x995   :  { %3340 = vmatprep.mubr.f32.mxu0 %v8517_v3  ;;  %3411 = vmatprep.mubr.f32.mxu1 %v8517_v3 }
 0x997   :  { %5944 = vmatpush1.bf16.msra.mxu0 %v7987_v54  ;;  %5976 = vmatpush1.bf16.msra.mxu1 %v7989_v58 }
 0x998   :  { %5946 = vmatprep.subr.bf16.mxu0 %v7993_v5  ;;  %5978 = vmatprep.subr.bf16.mxu1 %v7995_v8 }
 0x99b   :  { %5948 = vmatpush1.bf16.msra.mxu0 %v8001_v39  ;;  %5980 = vmatpush1.bf16.msra.mxu1 %v8003_v46 }
 0x99c   :  { %5950 = vmatprep.subr.bf16.mxu0 %v8007_v1  ;;  %5982 = vmatprep.subr.bf16.mxu1 %v8009_v4 }
 0x99f   :  { %5952 = vmatpush1.bf16.msra.mxu0 %v8013_v44  ;;  %5984 = vmatpush1.bf16.msra.mxu1 %v8015_v45 }
 0x9a0   :  { %5954 = vmatprep.subr.bf16.mxu0 %v8019_v7  ;;  %5986 = vmatprep.subr.bf16.mxu1 %v8021_v9 }
 0x9a3   :  { %5956 = vmatpush1.bf16.msra.mxu0 %v8025_v53  ;;  %5988 = vmatpush1.bf16.msra.mxu1 %v8027_v63 }
 0x9a4   :  { %5958 = vmatprep.subr.bf16.mxu0 %v8031_v21  ;;  %5990 = vmatprep.subr.bf16.mxu1 %v8033_v0 }
 0x9a7   :  { %5960 = vmatpush1.bf16.msra.mxu0 %v8037_v55  ;;  %5992 = vmatpush1.bf16.msra.mxu1 %v8039_v22 }
 0x9a8   :  { %5962 = vmatprep.subr.bf16.mxu0 %v8043_v35  ;;  %5994 = vmatprep.subr.bf16.mxu1 %v8045_v38 }
 0x9ab   :  { %5964 = vmatpush1.bf16.msra.mxu0 %v8049_v15  ;;  %5996 = vmatpush1.bf16.msra.mxu1 %v8051_v19 }
 0x9ac   :  { %5966 = vmatprep.subr.bf16.mxu0 %v8055_v28  ;;  %5998 = vmatprep.subr.bf16.mxu1 %v8057_v33 }
 0x9af   :  { %5968 = vmatpush1.bf16.msra.mxu0 %v8061_v12  ;;  %6000 = vmatpush1.bf16.msra.mxu1 %v8063_v18 }
 0x9b0   :  { %6002 = vmatprep.subr.bf16.mxu0 %v7966_v43  ;;  %6034 = vmatprep.subr.bf16.mxu1 %v7968_v52 }
 0xa65   :  { %v3172_v30 = vpop.f32.mrb[16].mxu0  ;;  %v3243_v32 = vpop.f32.mrb[16].mxu1 }
 0xa66   :  { %v6465_v23 = vadd.f32 %v3172_v30, %v8112_v51  ;;  %v3174_v26 = vpop.f32.mrb[17].mxu0  ;;  %v3245_v62 = vpop.f32.mrb[17].mxu1  ;;  %v6467_v34 = vadd.f32 %v3243_v32, %v8127_v48 }
 0xa67   :  { %v6466_v16 = vadd.f32 %v3174_v26, %v8116_v14  ;;  %v6468_v13 = vadd.f32 %v3245_v62, %v8122_v10 }
 0xa68   :  { %v4711_v49 = vmul.f32 -1.442695, %v6465_v23 }
 0xa69   :  { %v4712_v17 = vmul.f32 -1.442695, %v6466_v16  ;;  %v4713_v41 = vmul.f32 -1.442695, %v6468_v13 }
 0xa6a   :  { %6702 = vpow2.f32 %v4711_v49 }
 0xa6b   :  { %6704 = vpow2.f32 %v4712_v17 }
 0xa6c   :  { %6706 = vpow2.f32 %v4713_v41 }
 0xa6d   :  { %6708 = vtanh.f32 %v6467_v34 }
 0xa74   :  { %v6703_v42 = vpop.eup %6702 }
 0xa75   :  { %v6705_v47 = vpop.eup %6704  ;;  %v3255_v50 = vadd.f32 1.0, %v6703_v42 }
 0xa76   :  { %v3261_v61 = vadd.f32 1.0, %v6705_v47  ;;  %v6707_v2 = vpop.eup %6706 }
 0xa77   :  { %6710 = vrcp.f32 %v3255_v50  ;;  %v6709_v11 = vpop.eup %6708  ;;  %v3268_v6 = vadd.f32 1.0, %v6707_v2 }
 0xa78   :  { %6712 = vrcp.f32 %v3261_v61 }
 0xa79   :  { %6714 = vrcp.f32 %v3268_v6 }
 0xa81   :  { %v6711_v24 = vpop.eup %6710 }
 0xa82   :  { %v6713_v56 = vpop.eup %6712  ;;  %v3272_v60 = vmul.f32 %v6711_v24, %v6709_v11 }
 0xa83   :  { %v3271_v27 = vmul.f32 0.0, %v6713_v56  ;;  %v6715_v36 = vpop.eup %6714 }
 0xa85   :  { %v8130_v20 = vadd.f32 %v3272_v60, %v3271_v27 }
 0xa87   :  { %6716 = vtanh.f32 %v8130_v20 }
 0xa91   :  { %v6717_v59 = vpop.eup %6716 }
 0xa92   :  { %v3275_v30 = vmul.f32 %v6717_v59, %v6715_v36 }
 0xa94   :  { %3341 = vmatmul.mubr.f32.vlgmr.msra.gmra.mrb[18].mxu0 %v3275_v30  ;;  %3412 = vmatmul.mubr.f32.vlgmr.msra.gmra.mrb[18].mxu1 %v3275_v30 }
 0xa95   :  { %6004 = vmatpush1.bf16.msra.mxu0 %v7977_v40  ;;  %6036 = vmatpush1.bf16.msra.mxu1 %v7979_v57 }
 0xa96   :  { %6006 = vmatprep.subr.bf16.mxu0 %v7981_v25  ;;  %6038 = vmatprep.subr.bf16.mxu1 %v7983_v29 }
 0xa97   :  { %3510 = vmatprep.mubr.f32.mxu0 %v8517_v3  ;;  %3581 = vmatprep.mubr.f32.mxu1 %v8517_v3 }
 0xa99   :  { %6008 = vmatpush1.bf16.msra.mxu0 %v7987_v54  ;;  %6040 = vmatpush1.bf16.msra.mxu1 %v7989_v58 }
 0xa9a   :  { %6010 = vmatprep.subr.bf16.mxu0 %v7993_v5  ;;  %6042 = vmatprep.subr.bf16.mxu1 %v7995_v8 }
 0xa9d   :  { %6012 = vmatpush1.bf16.msra.mxu0 %v8001_v39  ;;  %6044 = vmatpush1.bf16.msra.mxu1 %v8003_v46 }
 0xa9e   :  { %6014 = vmatprep.subr.bf16.mxu0 %v8007_v1  ;;  %6046 = vmatprep.subr.bf16.mxu1 %v8009_v4 }
 0xaa1   :  { %6016 = vmatpush1.bf16.msra.mxu0 %v8013_v44  ;;  %6048 = vmatpush1.bf16.msra.mxu1 %v8015_v45 }
 0xaa2   :  { %6018 = vmatprep.subr.bf16.mxu0 %v8019_v7  ;;  %6050 = vmatprep.subr.bf16.mxu1 %v8021_v9 }
 0xaa5   :  { %6020 = vmatpush1.bf16.msra.mxu0 %v8025_v53  ;;  %6052 = vmatpush1.bf16.msra.mxu1 %v8027_v63 }
 0xaa6   :  { %6022 = vmatprep.subr.bf16.mxu0 %v8031_v21  ;;  %6054 = vmatprep.subr.bf16.mxu1 %v8033_v0 }
 0xaa9   :  { %6024 = vmatpush1.bf16.msra.mxu0 %v8037_v55  ;;  %6056 = vmatpush1.bf16.msra.mxu1 %v8039_v22 }
 0xaaa   :  { %6026 = vmatprep.subr.bf16.mxu0 %v8043_v35  ;;  %6058 = vmatprep.subr.bf16.mxu1 %v8045_v38 }
 0xaad   :  { %6028 = vmatpush1.bf16.msra.mxu0 %v8049_v15  ;;  %6060 = vmatpush1.bf16.msra.mxu1 %v8051_v19 }
 0xaae   :  { %6030 = vmatprep.subr.bf16.mxu0 %v8055_v28  ;;  %6062 = vmatprep.subr.bf16.mxu1 %v8057_v33 }
 0xab1   :  { %6032 = vmatpush1.bf16.msra.mxu0 %v8061_v12  ;;  %6064 = vmatpush1.bf16.msra.mxu1 %v8063_v18 }
 0xab2   :  { %6066 = vmatprep.subr.bf16.mxu0 %v7966_v43  ;;  %6098 = vmatprep.subr.bf16.mxu1 %v7968_v52 }
 0xb67   :  { %v3342_v32 = vpop.f32.mrb[18].mxu0  ;;  %v3413_v23 = vpop.f32.mrb[18].mxu1 }
 0xb68   :  { %v6469_v26 = vadd.f32 %v3342_v32, %v8112_v51  ;;  %v3344_v62 = vpop.f32.mrb[19].mxu0  ;;  %v3415_v16 = vpop.f32.mrb[19].mxu1  ;;  %v6471_v41 = vadd.f32 %v3413_v23, %v8127_v48 }
 0xb69   :  { %v6470_v49 = vadd.f32 %v3344_v62, %v8116_v14  ;;  %v6472_v13 = vadd.f32 %v3415_v16, %v8122_v10 }
 0xb6a   :  { %v4714_v17 = vmul.f32 -1.442695, %v6469_v26 }
 0xb6b   :  { %v4715_v31 = vmul.f32 -1.442695, %v6470_v49  ;;  %v4716_v37 = vmul.f32 -1.442695, %v6472_v13 }
 0xb6c   :  { %6718 = vpow2.f32 %v4714_v17 }
 0xb6d   :  { %6720 = vpow2.f32 %v4715_v31 }
 0xb6e   :  { %6722 = vpow2.f32 %v4716_v37 }
 0xb6f   :  { %6724 = vtanh.f32 %v6471_v41 }
 0xb76   :  { %v6719_v34 = vpop.eup %6718 }
 0xb77   :  { %v6721_v42 = vpop.eup %6720  ;;  %v3425_v47 = vadd.f32 1.0, %v6719_v34 }
 0xb78   :  { %v3431_v50 = vadd.f32 1.0, %v6721_v42  ;;  %v6723_v61 = vpop.eup %6722 }
 0xb79   :  { %6726 = vrcp.f32 %v3425_v47  ;;  %v6725_v2 = vpop.eup %6724  ;;  %v3438_v60 = vadd.f32 1.0, %v6723_v61 }
 0xb7a   :  { %6728 = vrcp.f32 %v3431_v50 }
 0xb7b   :  { %6730 = vrcp.f32 %v3438_v60 }
 0xb83   :  { %v6727_v11 = vpop.eup %6726 }
 0xb84   :  { %v6729_v24 = vpop.eup %6728  ;;  %v3442_v56 = vmul.f32 %v6727_v11, %v6725_v2 }
 0xb85   :  { %v3441_v6 = vmul.f32 %v6729_v24, %v8130_v20  ;;  %v6731_v36 = vpop.eup %6730 }
 0xb87   :  { %v8172_v27 = vadd.f32 %v3442_v56, %v3441_v6 }
 0xb89   :  { %6732 = vtanh.f32 %v8172_v27 }
 0xb93   :  { %v6733_v59 = vpop.eup %6732 }
 0xb94   :  { %v3445_v30 = vmul.f32 %v6733_v59, %v6731_v36 }
 0xb96   :  { %3511 = vmatmul.mubr.f32.vlgmr.msra.gmra.mrb[20].mxu0 %v3445_v30  ;;  %3582 = vmatmul.mubr.f32.vlgmr.msra.gmra.mrb[20].mxu1 %v3445_v30 }
 0xb97   :  { %6068 = vmatpush1.bf16.msra.mxu0 %v7977_v40  ;;  %6100 = vmatpush1.bf16.msra.mxu1 %v7979_v57 }
 0xb98   :  { %6070 = vmatprep.subr.bf16.mxu0 %v7981_v25  ;;  %6102 = vmatprep.subr.bf16.mxu1 %v7983_v29 }
 0xb99   :  { %3680 = vmatprep.mubr.f32.mxu0 %v8517_v3  ;;  %3751 = vmatprep.mubr.f32.mxu1 %v8517_v3 }
 0xb9b   :  { %6072 = vmatpush1.bf16.msra.mxu0 %v7987_v54  ;;  %6104 = vmatpush1.bf16.msra.mxu1 %v7989_v58 }
 0xb9c   :  { %6074 = vmatprep.subr.bf16.mxu0 %v7993_v5  ;;  %6106 = vmatprep.subr.bf16.mxu1 %v7995_v8 }
 0xb9f   :  { %6076 = vmatpush1.bf16.msra.mxu0 %v8001_v39  ;;  %6108 = vmatpush1.bf16.msra.mxu1 %v8003_v46 }
 0xba0   :  { %6078 = vmatprep.subr.bf16.mxu0 %v8007_v1  ;;  %6110 = vmatprep.subr.bf16.mxu1 %v8009_v4 }
 0xba3   :  { %6080 = vmatpush1.bf16.msra.mxu0 %v8013_v44  ;;  %6112 = vmatpush1.bf16.msra.mxu1 %v8015_v45 }
 0xba4   :  { %6082 = vmatprep.subr.bf16.mxu0 %v8019_v7  ;;  %6114 = vmatprep.subr.bf16.mxu1 %v8021_v9 }
 0xba7   :  { %6084 = vmatpush1.bf16.msra.mxu0 %v8025_v53  ;;  %6116 = vmatpush1.bf16.msra.mxu1 %v8027_v63 }
 0xba8   :  { %6086 = vmatprep.subr.bf16.mxu0 %v8031_v21  ;;  %6118 = vmatprep.subr.bf16.mxu1 %v8033_v0 }
 0xbab   :  { %6088 = vmatpush1.bf16.msra.mxu0 %v8037_v55  ;;  %6120 = vmatpush1.bf16.msra.mxu1 %v8039_v22 }
 0xbac   :  { %6090 = vmatprep.subr.bf16.mxu0 %v8043_v35  ;;  %6122 = vmatprep.subr.bf16.mxu1 %v8045_v38 }
 0xbaf   :  { %6092 = vmatpush1.bf16.msra.mxu0 %v8049_v15  ;;  %6124 = vmatpush1.bf16.msra.mxu1 %v8051_v19 }
 0xbb0   :  { %6094 = vmatprep.subr.bf16.mxu0 %v8055_v28  ;;  %6126 = vmatprep.subr.bf16.mxu1 %v8057_v33 }
 0xbb3   :  { %6096 = vmatpush1.bf16.msra.mxu0 %v8061_v12  ;;  %6128 = vmatpush1.bf16.msra.mxu1 %v8063_v18 }
 0xbb4   :  { %6130 = vmatprep.subr.bf16.mxu0 %v7966_v43  ;;  %6162 = vmatprep.subr.bf16.mxu1 %v7968_v52 }
 0xc69   :  { %v3512_v20 = vpop.f32.mrb[20].mxu0  ;;  %v3583_v32 = vpop.f32.mrb[20].mxu1 }
 0xc6a   :  { %v6473_v23 = vadd.f32 %v3512_v20, %v8112_v51  ;;  %v3514_v26 = vpop.f32.mrb[21].mxu0  ;;  %v3585_v62 = vpop.f32.mrb[21].mxu1  ;;  %v6475_v37 = vadd.f32 %v3583_v32, %v8127_v48 }
 0xc6b   :  { %v6474_v16 = vadd.f32 %v3514_v26, %v8116_v14  ;;  %v6476_v31 = vadd.f32 %v3585_v62, %v8122_v10 }
 0xc6c   :  { %v4717_v49 = vmul.f32 -1.442695, %v6473_v23 }
 0xc6d   :  { %v4718_v17 = vmul.f32 -1.442695, %v6474_v16  ;;  %v4719_v13 = vmul.f32 -1.442695, %v6476_v31 }
 0xc6e   :  { %6734 = vpow2.f32 %v4717_v49 }
 0xc6f   :  { %6736 = vpow2.f32 %v4718_v17 }
 0xc70   :  { %6738 = vpow2.f32 %v4719_v13 }
 0xc71   :  { %6740 = vtanh.f32 %v6475_v37 }
 0xc78   :  { %v6735_v41 = vpop.eup %6734 }
 0xc79   :  { %v6737_v34 = vpop.eup %6736  ;;  %v3595_v42 = vadd.f32 1.0, %v6735_v41 }
 0xc7a   :  { %v3601_v47 = vadd.f32 1.0, %v6737_v34  ;;  %v6739_v50 = vpop.eup %6738 }
 0xc7b   :  { %6742 = vrcp.f32 %v3595_v42  ;;  %v6741_v61 = vpop.eup %6740  ;;  %v3608_v56 = vadd.f32 1.0, %v6739_v50 }
 0xc7c   :  { %6744 = vrcp.f32 %v3601_v47 }
 0xc7d   :  { %6746 = vrcp.f32 %v3608_v56 }
 0xc85   :  { %v6743_v2 = vpop.eup %6742 }
 0xc86   :  { %v6745_v11 = vpop.eup %6744  ;;  %v3612_v24 = vmul.f32 %v6743_v2, %v6741_v61 }
 0xc87   :  { %v3611_v60 = vmul.f32 %v6745_v11, %v8172_v27  ;;  %v6747_v36 = vpop.eup %6746 }
 0xc89   :  { %v8214_v6 = vadd.f32 %v3612_v24, %v3611_v60 }
 0xc8b   :  { %6748 = vtanh.f32 %v8214_v6 }
 0xc95   :  { %v6749_v59 = vpop.eup %6748 }
 0xc96   :  { %v3615_v30 = vmul.f32 %v6749_v59, %v6747_v36 }
 0xc98   :  { %3681 = vmatmul.mubr.f32.vlgmr.msra.gmra.mrb[22].mxu0 %v3615_v30  ;;  %3752 = vmatmul.mubr.f32.vlgmr.msra.gmra.mrb[22].mxu1 %v3615_v30 }
 0xc99   :  { %6132 = vmatpush1.bf16.msra.mxu0 %v7977_v40  ;;  %6164 = vmatpush1.bf16.msra.mxu1 %v7979_v57 }
 0xc9a   :  { %6134 = vmatprep.subr.bf16.mxu0 %v7981_v25  ;;  %6166 = vmatprep.subr.bf16.mxu1 %v7983_v29 }
 0xc9b   :  { %3850 = vmatprep.mubr.f32.mxu0 %v8517_v3  ;;  %3921 = vmatprep.mubr.f32.mxu1 %v8517_v3 }
 0xc9d   :  { %6136 = vmatpush1.bf16.msra.mxu0 %v7987_v54  ;;  %6168 = vmatpush1.bf16.msra.mxu1 %v7989_v58 }
 0xc9e   :  { %6138 = vmatprep.subr.bf16.mxu0 %v7993_v5  ;;  %6170 = vmatprep.subr.bf16.mxu1 %v7995_v8 }
 0xca1   :  { %6140 = vmatpush1.bf16.msra.mxu0 %v8001_v39  ;;  %6172 = vmatpush1.bf16.msra.mxu1 %v8003_v46 }
 0xca2   :  { %6142 = vmatprep.subr.bf16.mxu0 %v8007_v1  ;;  %6174 = vmatprep.subr.bf16.mxu1 %v8009_v4 }
 0xca5   :  { %6144 = vmatpush1.bf16.msra.mxu0 %v8013_v44  ;;  %6176 = vmatpush1.bf16.msra.mxu1 %v8015_v45 }
 0xca6   :  { %6146 = vmatprep.subr.bf16.mxu0 %v8019_v7  ;;  %6178 = vmatprep.subr.bf16.mxu1 %v8021_v9 }
 0xca9   :  { %6148 = vmatpush1.bf16.msra.mxu0 %v8025_v53  ;;  %6180 = vmatpush1.bf16.msra.mxu1 %v8027_v63 }
 0xcaa   :  { %6150 = vmatprep.subr.bf16.mxu0 %v8031_v21  ;;  %6182 = vmatprep.subr.bf16.mxu1 %v8033_v0 }
 0xcad   :  { %6152 = vmatpush1.bf16.msra.mxu0 %v8037_v55  ;;  %6184 = vmatpush1.bf16.msra.mxu1 %v8039_v22 }
 0xcae   :  { %6154 = vmatprep.subr.bf16.mxu0 %v8043_v35  ;;  %6186 = vmatprep.subr.bf16.mxu1 %v8045_v38 }
 0xcb1   :  { %6156 = vmatpush1.bf16.msra.mxu0 %v8049_v15  ;;  %6188 = vmatpush1.bf16.msra.mxu1 %v8051_v19 }
 0xcb2   :  { %6158 = vmatprep.subr.bf16.mxu0 %v8055_v28  ;;  %6190 = vmatprep.subr.bf16.mxu1 %v8057_v33 }
 0xcb5   :  { %6160 = vmatpush1.bf16.msra.mxu0 %v8061_v12  ;;  %6192 = vmatpush1.bf16.msra.mxu1 %v8063_v18 }
 0xcb6   :  { %6194 = vmatprep.subr.bf16.mxu0 %v7966_v43  ;;  %6226 = vmatprep.subr.bf16.mxu1 %v7968_v52 }
 0xd6b   :  { %v3682_v27 = vpop.f32.mrb[22].mxu0  ;;  %v3753_v20 = vpop.f32.mrb[22].mxu1 }
 0xd6c   :  { %v6477_v32 = vadd.f32 %v3682_v27, %v8112_v51  ;;  %v3684_v23 = vpop.f32.mrb[23].mxu0  ;;  %v3755_v26 = vpop.f32.mrb[23].mxu1  ;;  %v6479_v13 = vadd.f32 %v3753_v20, %v8127_v48 }
 0xd6d   :  { %v6478_v62 = vadd.f32 %v3684_v23, %v8116_v14  ;;  %v6480_v17 = vadd.f32 %v3755_v26, %v8122_v10 }
 0xd6e   :  { %v4720_v16 = vmul.f32 -1.442695, %v6477_v32 }
 0xd6f   :  { %v4721_v49 = vmul.f32 -1.442695, %v6478_v62  ;;  %v4722_v31 = vmul.f32 -1.442695, %v6480_v17 }
 0xd70   :  { %6750 = vpow2.f32 %v4720_v16 }
 0xd71   :  { %6752 = vpow2.f32 %v4721_v49 }
 0xd72   :  { %6754 = vpow2.f32 %v4722_v31 }
 0xd73   :  { %6756 = vtanh.f32 %v6479_v13 }
 0xd7a   :  { %v6751_v37 = vpop.eup %6750 }
 0xd7b   :  { %v6753_v41 = vpop.eup %6752  ;;  %v3765_v34 = vadd.f32 1.0, %v6751_v37 }
 0xd7c   :  { %v3771_v42 = vadd.f32 1.0, %v6753_v41  ;;  %v6755_v47 = vpop.eup %6754 }
 0xd7d   :  { %6758 = vrcp.f32 %v3765_v34  ;;  %v6757_v50 = vpop.eup %6756  ;;  %v3778_v24 = vadd.f32 1.0, %v6755_v47 }
 0xd7e   :  { %6760 = vrcp.f32 %v3771_v42 }
 0xd7f   :  { %6762 = vrcp.f32 %v3778_v24 }
 0xd87   :  { %v6759_v61 = vpop.eup %6758 }
 0xd88   :  { %v6761_v2 = vpop.eup %6760  ;;  %v3782_v11 = vmul.f32 %v6759_v61, %v6757_v50 }
 0xd89   :  { %v3781_v56 = vmul.f32 %v6761_v2, %v8214_v6  ;;  %v6763_v36 = vpop.eup %6762 }
 0xd8b   :  { %v8256_v60 = vadd.f32 %v3782_v11, %v3781_v56 }
 0xd8d   :  { %6764 = vtanh.f32 %v8256_v60 }
 0xd97   :  { %v6765_v59 = vpop.eup %6764 }
 0xd98   :  { %v3785_v30 = vmul.f32 %v6765_v59, %v6763_v36 }
 0xd9a   :  { %3851 = vmatmul.mubr.f32.vlgmr.msra.gmra.mrb[24].mxu0 %v3785_v30  ;;  %3922 = vmatmul.mubr.f32.vlgmr.msra.gmra.mrb[24].mxu1 %v3785_v30 }
 0xd9b   :  { %6196 = vmatpush1.bf16.msra.mxu0 %v7977_v40  ;;  %6228 = vmatpush1.bf16.msra.mxu1 %v7979_v57 }
 0xd9c   :  { %6198 = vmatprep.subr.bf16.mxu0 %v7981_v25  ;;  %6230 = vmatprep.subr.bf16.mxu1 %v7983_v29 }
 0xd9d   :  { %4020 = vmatprep.mubr.f32.mxu0 %v8517_v3  ;;  %4091 = vmatprep.mubr.f32.mxu1 %v8517_v3 }
 0xd9f   :  { %6200 = vmatpush1.bf16.msra.mxu0 %v7987_v54  ;;  %6232 = vmatpush1.bf16.msra.mxu1 %v7989_v58 }
 0xda0   :  { %6202 = vmatprep.subr.bf16.mxu0 %v7993_v5  ;;  %6234 = vmatprep.subr.bf16.mxu1 %v7995_v8 }
 0xda3   :  { %6204 = vmatpush1.bf16.msra.mxu0 %v8001_v39  ;;  %6236 = vmatpush1.bf16.msra.mxu1 %v8003_v46 }
 0xda4   :  { %6206 = vmatprep.subr.bf16.mxu0 %v8007_v1  ;;  %6238 = vmatprep.subr.bf16.mxu1 %v8009_v4 }
 0xda7   :  { %6208 = vmatpush1.bf16.msra.mxu0 %v8013_v44  ;;  %6240 = vmatpush1.bf16.msra.mxu1 %v8015_v45 }
 0xda8   :  { %6210 = vmatprep.subr.bf16.mxu0 %v8019_v7  ;;  %6242 = vmatprep.subr.bf16.mxu1 %v8021_v9 }
 0xdab   :  { %6212 = vmatpush1.bf16.msra.mxu0 %v8025_v53  ;;  %6244 = vmatpush1.bf16.msra.mxu1 %v8027_v63 }
 0xdac   :  { %6214 = vmatprep.subr.bf16.mxu0 %v8031_v21  ;;  %6246 = vmatprep.subr.bf16.mxu1 %v8033_v0 }
 0xdaf   :  { %6216 = vmatpush1.bf16.msra.mxu0 %v8037_v55  ;;  %6248 = vmatpush1.bf16.msra.mxu1 %v8039_v22 }
 0xdb0   :  { %6218 = vmatprep.subr.bf16.mxu0 %v8043_v35  ;;  %6250 = vmatprep.subr.bf16.mxu1 %v8045_v38 }
 0xdb3   :  { %6220 = vmatpush1.bf16.msra.mxu0 %v8049_v15  ;;  %6252 = vmatpush1.bf16.msra.mxu1 %v8051_v19 }
 0xdb4   :  { %6222 = vmatprep.subr.bf16.mxu0 %v8055_v28  ;;  %6254 = vmatprep.subr.bf16.mxu1 %v8057_v33 }
 0xdb7   :  { %6224 = vmatpush1.bf16.msra.mxu0 %v8061_v12  ;;  %6256 = vmatpush1.bf16.msra.mxu1 %v8063_v18 }
 0xdb8   :  { %6258 = vmatprep.subr.bf16.mxu0 %v7966_v43  ;;  %6290 = vmatprep.subr.bf16.mxu1 %v7968_v52 }
 0xe6d   :  { %v3852_v6 = vpop.f32.mrb[24].mxu0  ;;  %v3923_v27 = vpop.f32.mrb[24].mxu1 }
 0xe6e   :  { %v6481_v20 = vadd.f32 %v3852_v6, %v8112_v51  ;;  %v3854_v32 = vpop.f32.mrb[25].mxu0  ;;  %v3925_v23 = vpop.f32.mrb[25].mxu1  ;;  %v6483_v31 = vadd.f32 %v3923_v27, %v8127_v48 }
 0xe6f   :  { %v6482_v26 = vadd.f32 %v3854_v32, %v8116_v14  ;;  %v6484_v49 = vadd.f32 %v3925_v23, %v8122_v10 }
 0xe70   :  { %v4723_v62 = vmul.f32 -1.442695, %v6481_v20 }
 0xe71   :  { %v4724_v16 = vmul.f32 -1.442695, %v6482_v26  ;;  %v4725_v17 = vmul.f32 -1.442695, %v6484_v49 }
 0xe72   :  { %6766 = vpow2.f32 %v4723_v62 }
 0xe73   :  { %6768 = vpow2.f32 %v4724_v16 }
 0xe74   :  { %6770 = vpow2.f32 %v4725_v17 }
 0xe75   :  { %6772 = vtanh.f32 %v6483_v31 }
 0xe7c   :  { %v6767_v13 = vpop.eup %6766 }
 0xe7d   :  { %v6769_v37 = vpop.eup %6768  ;;  %v3935_v41 = vadd.f32 1.0, %v6767_v13 }
 0xe7e   :  { %v3941_v34 = vadd.f32 1.0, %v6769_v37  ;;  %v6771_v42 = vpop.eup %6770 }
 0xe7f   :  { %6774 = vrcp.f32 %v3935_v41  ;;  %v6773_v47 = vpop.eup %6772  ;;  %v3948_v11 = vadd.f32 1.0, %v6771_v42 }
 0xe80   :  { %6776 = vrcp.f32 %v3941_v34 }
 0xe81   :  { %6778 = vrcp.f32 %v3948_v11 }
 0xe89   :  { %v6775_v50 = vpop.eup %6774 }
 0xe8a   :  { %v6777_v61 = vpop.eup %6776  ;;  %v3952_v2 = vmul.f32 %v6775_v50, %v6773_v47 }
 0xe8b   :  { %v3951_v24 = vmul.f32 %v6777_v61, %v8256_v60  ;;  %v6779_v36 = vpop.eup %6778 }
 0xe8d   :  { %v8298_v56 = vadd.f32 %v3952_v2, %v3951_v24 }
 0xe8f   :  { %6780 = vtanh.f32 %v8298_v56 }
 0xe99   :  { %v6781_v59 = vpop.eup %6780 }
 0xe9a   :  { %v3955_v30 = vmul.f32 %v6781_v59, %v6779_v36  ;;  %v4469_v59 = vld [vmem:[#allocation8 + $0x18] sm:$0xff] }
 0xe9c   :  { %4021 = vmatmul.mubr.f32.vlgmr.msra.gmra.mrb[26].mxu0 %v3955_v30  ;;  %4092 = vmatmul.mubr.f32.vlgmr.msra.gmra.mrb[26].mxu1 %v3955_v30 }
 0xe9d   :  { %6260 = vmatpush1.bf16.msra.mxu0 %v7977_v40  ;;  %6292 = vmatpush1.bf16.msra.mxu1 %v7979_v57 }
 0xe9e   :  { %6262 = vmatprep.subr.bf16.mxu0 %v7981_v25  ;;  %6294 = vmatprep.subr.bf16.mxu1 %v7983_v29 }
 0xe9f   :  { %4190 = vmatprep.mubr.f32.mxu0 %v8517_v3  ;;  %4261 = vmatprep.mubr.f32.mxu1 %v8517_v3 }
 0xea1   :  { %6264 = vmatpush1.bf16.msra.mxu0 %v7987_v54  ;;  %6296 = vmatpush1.bf16.msra.mxu1 %v7989_v58 }
 0xea2   :  { %6266 = vmatprep.subr.bf16.mxu0 %v7993_v5  ;;  %6298 = vmatprep.subr.bf16.mxu1 %v7995_v8 }
 0xea5   :  { %6268 = vmatpush1.bf16.msra.mxu0 %v8001_v39  ;;  %6300 = vmatpush1.bf16.msra.mxu1 %v8003_v46 }
 0xea6   :  { %6270 = vmatprep.subr.bf16.mxu0 %v8007_v1  ;;  %6302 = vmatprep.subr.bf16.mxu1 %v8009_v4 }
 0xea9   :  { %6272 = vmatpush1.bf16.msra.mxu0 %v8013_v44  ;;  %6304 = vmatpush1.bf16.msra.mxu1 %v8015_v45 }
 0xeaa   :  { %6274 = vmatprep.subr.bf16.mxu0 %v8019_v7  ;;  %6306 = vmatprep.subr.bf16.mxu1 %v8021_v9 }
 0xead   :  { %6276 = vmatpush1.bf16.msra.mxu0 %v8025_v53  ;;  %6308 = vmatpush1.bf16.msra.mxu1 %v8027_v63 }
 0xeae   :  { %6278 = vmatprep.subr.bf16.mxu0 %v8031_v21  ;;  %6310 = vmatprep.subr.bf16.mxu1 %v8033_v0 }
 0xeb1   :  { %6280 = vmatpush1.bf16.msra.mxu0 %v8037_v55  ;;  %6312 = vmatpush1.bf16.msra.mxu1 %v8039_v22 }
 0xeb2   :  { %6282 = vmatprep.subr.bf16.mxu0 %v8043_v35  ;;  %6314 = vmatprep.subr.bf16.mxu1 %v8045_v38 }
 0xeb5   :  { %6284 = vmatpush1.bf16.msra.mxu0 %v8049_v15  ;;  %6316 = vmatpush1.bf16.msra.mxu1 %v8051_v19 }
 0xeb6   :  { %6286 = vmatprep.subr.bf16.mxu0 %v8055_v28  ;;  %6318 = vmatprep.subr.bf16.mxu1 %v8057_v33 }
 0xeb9   :  { %6288 = vmatpush1.bf16.msra.mxu0 %v8061_v12  ;;  %6320 = vmatpush1.bf16.msra.mxu1 %v8063_v18 }
 0xeba   :  { %6322 = vmatprep.subr.bf16.mxu0 %v7966_v43  ;;  %6354 = vmatprep.subr.bf16.mxu1 %v7968_v52 }
 0xf6f   :  { %v4022_v60 = vpop.f32.mrb[26].mxu0  ;;  %v4093_v6 = vpop.f32.mrb[26].mxu1 }
 0xf70   :  { %v6485_v27 = vadd.f32 %v4022_v60, %v8112_v51  ;;  %v4024_v20 = vpop.f32.mrb[27].mxu0  ;;  %v4095_v32 = vpop.f32.mrb[27].mxu1  ;;  %v6487_v17 = vadd.f32 %v4093_v6, %v8127_v48  ;;  %v4470_v60 = vld [vmem:[#allocation8 + $0x20] sm:$0xff]  ;;  %v4471_v6 = vld [vmem:[#allocation8 + $0x28] sm:$0xff] }
 0xf71   :  { %v6486_v23 = vadd.f32 %v4024_v20, %v8116_v14  ;;  %v6488_v16 = vadd.f32 %v4095_v32, %v8122_v10  ;;  %v4472_v20 = vld [vmem:[#allocation8 + $0x30] sm:$0xff]  ;;  %v4473_v32 = vld [vmem:[#allocation8 + $0x38] sm:$0xff] }
 0xf72   :  { %v4726_v26 = vmul.f32 -1.442695, %v6485_v27  ;;  %v6392_v27 = vpack.c.bf16 %v4471_v6, %v4470_v60 }
 0xf73   :  { %v4727_v62 = vmul.f32 -1.442695, %v6486_v23  ;;  %v4728_v49 = vmul.f32 -1.442695, %v6488_v16  ;;  %v6395_v23 = vpack.c.bf16 %v4473_v32, %v4472_v20  ;;  %v4575_v20 = vld [vmem:[#allocation10 + $0x78] sm:$0xff] }
 0xf74   :  { %6782 = vpow2.f32 %v4726_v26  ;;  %v4474_v26 = vld [vmem:[#allocation8 + $0x40] sm:$0xff] }
 0xf75   :  { %6784 = vpow2.f32 %v4727_v62  ;;  %v4475_v62 = vld [vmem:[#allocation8 + $0x48] sm:$0xff] }
 0xf76   :  { %6786 = vpow2.f32 %v4728_v49  ;;  %v6398_v16 = vpack.c.bf16 %v4475_v62, %v4474_v26  ;;  %v4476_v49 = vld [vmem:[#allocation8 + $0x50] sm:$0xff] }
 0xf77   :  { %6788 = vtanh.f32 %v6487_v17  ;;  %v4477_v17 = vld [vmem:[#allocation8 + $0x58] sm:$0xff] }
 0xf7e   :  { %v6783_v43 = vpop.eup %6782 }
 0xf7f   :  { %v6785_v31 = vpop.eup %6784  ;;  %v4105_v52 = vadd.f32 1.0, %v6783_v43  ;;  %v4478_v43 = vld [vmem:[#allocation8 + $0x60] sm:$0xff] }
 0xf80   :  { %v4111_v13 = vadd.f32 1.0, %v6785_v31  ;;  %v6787_v37 = vpop.eup %6786  ;;  %v6401_v31 = vpack.c.bf16 %v4477_v17, %v4476_v49 }
 0xf81   :  { %6790 = vrcp.f32 %v4105_v52  ;;  %v6789_v41 = vpop.eup %6788  ;;  %v4118_v50 = vadd.f32 1.0, %v6787_v37  ;;  %v4479_v52 = vld [vmem:[#allocation8 + $0x68] sm:$0xff]  ;;  %v4480_v37 = vld [vmem:[#allocation8 + $0x70] sm:$0xff] }
 0xf82   :  { %6792 = vrcp.f32 %v4111_v13  ;;  %v6404_v13 = vpack.c.bf16 %v4479_v52, %v4478_v43 }
 0xf83   :  { %6794 = vrcp.f32 %v4118_v50  ;;  %v4562_v50 = vld [vmem:[#allocation10 + $0x10] sm:$0xff] }
 0xf8b   :  { %v6791_v34 = vpop.eup %6790 }
 0xf8c   :  { %v6793_v42 = vpop.eup %6792  ;;  %v4122_v47 = vmul.f32 %v6791_v34, %v6789_v41  ;;  %v4481_v41 = vld [vmem:[#allocation8 + $0x78] sm:$0xff] }
 0xf8d   :  { %v4121_v61 = vmul.f32 %v6793_v42, %v8298_v56  ;;  %v6795_v11 = vpop.eup %6794  ;;  %v4468_v56 = vld [vmem:[#allocation8 + $0x10] sm:$0xff]  ;;  %v6407_v34 = vpack.c.bf16 %v4481_v41, %v4480_v37  ;;  %v4560_v42 = vld [vmem:[#allocation10] sm:$0xff] }
 0xf8e   :  { %v6389_v30 = vpack.c.bf16 %v4469_v59, %v4468_v56 }
 0xf8f   :  { %v8340_v2 = vadd.f32 %v4122_v47, %v4121_v61  ;;  %v4561_v47 = vld [vmem:[#allocation10 + $0x8] sm:$0xff] }
 0xf90   :  { %v6410_v61 = vpack.c.bf16 %v4561_v47, %v4560_v42 }
 0xf91   :  { %6796 = vtanh.f32 %v8340_v2 }
 0xf9b   :  { %v6797_v24 = vpop.eup %6796 }
 0xf9c   :  { %v4125_v36 = vmul.f32 %v6797_v24, %v6795_v11  ;;  %v4565_v24 = vld [vmem:[#allocation10 + $0x28] sm:$0xff] }
 0xf9e   :  { %4191 = vmatmul.mubr.f32.vlgmr.msra.gmra.mrb[28].mxu0 %v4125_v36  ;;  %4262 = vmatmul.mubr.f32.vlgmr.msra.gmra.mrb[28].mxu1 %v4125_v36 }
 0xf9f   :  { %6324 = vmatpush1.bf16.msra.mxu0 %v7977_v40  ;;  %6356 = vmatpush1.bf16.msra.mxu1 %v7979_v57 }
 0xfa0   :  { %6326 = vmatprep.subr.bf16.mxu0 %v7981_v25  ;;  %6358 = vmatprep.subr.bf16.mxu1 %v7983_v29 }
 0xfa1   :  { %4360 = vmatprep.mubr.f32.mxu0 %v8517_v3  ;;  %4431 = vmatprep.mubr.f32.mxu1 %v8517_v3 }
 0xfa3   :  { %6328 = vmatpush1.bf16.msra.mxu0 %v7987_v54  ;;  %6360 = vmatpush1.bf16.msra.mxu1 %v7989_v58 }
 0xfa4   :  { %6330 = vmatprep.subr.bf16.mxu0 %v7993_v5  ;;  %6362 = vmatprep.subr.bf16.mxu1 %v7995_v8 }
 0xfa7   :  { %6332 = vmatpush1.bf16.msra.mxu0 %v8001_v39  ;;  %6364 = vmatpush1.bf16.msra.mxu1 %v8003_v46 }
 0xfa8   :  { %6334 = vmatprep.subr.bf16.mxu0 %v8007_v1  ;;  %6366 = vmatprep.subr.bf16.mxu1 %v8009_v4 }
 0xfab   :  { %6336 = vmatpush1.bf16.msra.mxu0 %v8013_v44  ;;  %6368 = vmatpush1.bf16.msra.mxu1 %v8015_v45 }
 0xfac   :  { %6338 = vmatprep.subr.bf16.mxu0 %v8019_v7  ;;  %6370 = vmatprep.subr.bf16.mxu1 %v8021_v9 }
 0xfaf   :  { %6340 = vmatpush1.bf16.msra.mxu0 %v8025_v53  ;;  %6372 = vmatpush1.bf16.msra.mxu1 %v8027_v63 }
 0xfb0   :  { %6342 = vmatprep.subr.bf16.mxu0 %v8031_v21  ;;  %6374 = vmatprep.subr.bf16.mxu1 %v8033_v0 }
 0xfb3   :  { %6344 = vmatpush1.bf16.msra.mxu0 %v8037_v55  ;;  %6376 = vmatpush1.bf16.msra.mxu1 %v8039_v22 }
 0xfb4   :  { %6346 = vmatprep.subr.bf16.mxu0 %v8043_v35  ;;  %6378 = vmatprep.subr.bf16.mxu1 %v8045_v38 }
 0xfb7   :  { %6348 = vmatpush1.bf16.msra.mxu0 %v8049_v15  ;;  %6380 = vmatpush1.bf16.msra.mxu1 %v8051_v19 }
 0xfb8   :  { %6350 = vmatprep.subr.bf16.mxu0 %v8055_v28  ;;  %6382 = vmatprep.subr.bf16.mxu1 %v8057_v33  ;;  %v4466_v28 = vld [vmem:[#allocation8] sm:$0xff]  ;;  %v4467_v33 = vld [vmem:[#allocation8 + $0x8] sm:$0xff] }
 0xfbb   :  { %6352 = vmatpush1.bf16.msra.mxu0 %v8061_v12  ;;  %6384 = vmatpush1.bf16.msra.mxu1 %v8063_v18  ;;  %v6386_v12 = vpack.c.bf16 %v4467_v33, %v4466_v28  ;;  %v6980_v18 = vmov 0.0|0.0  }
 0xfbc   :  { %6385 = vmatprep.subr.bf16.mxu0 %v6980_v18  ;;  %6409 = vmatprep.subr.bf16.mxu1 %v6980_v18 }
0x1071   :  { %v4192_v40 = vpop.f32.mrb[28].mxu0  ;;  %v4263_v57 = vpop.f32.mrb[28].mxu1 }
0x1072   :  { %v6489_v25 = vadd.f32 %v4192_v40, %v8112_v51  ;;  %v4194_v29 = vpop.f32.mrb[29].mxu0  ;;  %v4265_v54 = vpop.f32.mrb[29].mxu1  ;;  %v6491_v1 = vadd.f32 %v4263_v57, %v8127_v48  ;;  %v4566_v40 = vld [vmem:[#allocation10 + $0x30] sm:$0xff]  ;;  %v4567_v57 = vld [vmem:[#allocation10 + $0x38] sm:$0xff] }
0x1073   :  { %v6490_v58 = vadd.f32 %v4194_v29, %v8116_v14  ;;  %v6492_v39 = vadd.f32 %v4265_v54, %v8122_v10  ;;  %v4568_v29 = vld [vmem:[#allocation10 + $0x40] sm:$0xff]  ;;  %v4569_v54 = vld [vmem:[#allocation10 + $0x48] sm:$0xff] }
0x1074   :  { %v4729_v5 = vmul.f32 -1.442695, %v6489_v25  ;;  %v6419_v25 = vpack.c.bf16 %v4567_v57, %v4566_v40 }
0x1075   :  { %v4730_v8 = vmul.f32 -1.442695, %v6490_v58  ;;  %v4731_v46 = vmul.f32 -1.442695, %v6492_v39  ;;  %v6422_v58 = vpack.c.bf16 %v4569_v54, %v4568_v29 }
0x1076   :  { %6798 = vpow2.f32 %v4729_v5  ;;  %v4570_v5 = vld [vmem:[#allocation10 + $0x50] sm:$0xff] }
0x1077   :  { %6800 = vpow2.f32 %v4730_v8  ;;  %v4571_v8 = vld [vmem:[#allocation10 + $0x58] sm:$0xff] }
0x1078   :  { %6802 = vpow2.f32 %v4731_v46  ;;  %v6425_v39 = vpack.c.bf16 %v4571_v8, %v4570_v5  ;;  %v4572_v46 = vld [vmem:[#allocation10 + $0x60] sm:$0xff] }
0x1079   :  { %6804 = vtanh.f32 %v6491_v1  ;;  %v4573_v1 = vld [vmem:[#allocation10 + $0x68] sm:$0xff] }
0x1080   :  { %v6799_v4 = vpop.eup %6798 }
0x1081   :  { %v6801_v44 = vpop.eup %6800  ;;  %v4275_v45 = vadd.f32 1.0, %v6799_v4  ;;  %v6428_v4 = vpack.c.bf16 %v4573_v1, %v4572_v46 }
0x1082   :  { %v4281_v7 = vadd.f32 1.0, %v6801_v44  ;;  %v6803_v9 = vpop.eup %6802 }
0x1083   :  { %6806 = vrcp.f32 %v4275_v45  ;;  %v6805_v53 = vpop.eup %6804  ;;  %v4288_v55 = vadd.f32 1.0, %v6803_v9 }
0x1084   :  { %6808 = vrcp.f32 %v4281_v7 }
0x1085   :  { %6810 = vrcp.f32 %v4288_v55 }
0x108d   :  { %v6807_v63 = vpop.eup %6806 }
0x108e   :  { %v6809_v21 = vpop.eup %6808  ;;  %v4292_v0 = vmul.f32 %v6807_v63, %v6805_v53 }
0x108f   :  { %v4291_v22 = vmul.f32 %v6809_v21, %v8340_v2  ;;  %v6811_v38 = vpop.eup %6810  ;;  %v4563_v2 = vld [vmem:[#allocation10 + $0x18] sm:$0xff] }
0x1090   :  { %v6413_v11 = vpack.c.bf16 %v4563_v2, %v4562_v50 }
0x1091   :  { %v8380_v35 = vadd.f32 %v4292_v0, %v4291_v22 }
0x1093   :  { %6812 = vtanh.f32 %v8380_v35 }
0x109d   :  { %v6813_v15 = vpop.eup %6812 }
0x109e   :  { %v4295_v19 = vmul.f32 %v6813_v15, %v6811_v38 }
0x10a0   :  { %4361 = vmatmul.mubr.f32.vlgmr.msra.gmra.mrb[30].mxu0 %v4295_v19  ;;  %4432 = vmatmul.mubr.f32.vlgmr.msra.gmra.mrb[30].mxu1 %v4295_v19 }
0x10a1   :  { %6387 = vmatpush3.bf16.msra.mxu0 %v6386_v12  ;;  %4803 = vmatprep.mubr.msk.f32.mxu0 %vm6981_vm1, %v8517_v3 }
0x10a2   :  { %6388 = vmatprep.subr.bf16.mxu0 %v6980_v18  ;;  %4838 = vmatprep.mubr.msk.f32.mxu1 %vm6981_vm1, %v8517_v3  ;;  %v4564_v3 = vld [vmem:[#allocation10 + $0x20] sm:$0xff] }
0x10a3   :  { %6411 = vmatpush3.bf16.msra.mxu1 %v6410_v61  ;;  %v6416_v36 = vpack.c.bf16 %v4565_v24, %v4564_v3 }
0x10a4   :  { %6412 = vmatprep.subr.bf16.mxu1 %v6980_v18 }
0x10a5   :  { %6390 = vmatpush3.bf16.msra.mxu0 %v6389_v30 }
0x10a6   :  { %6391 = vmatprep.subr.bf16.mxu0 %v6980_v18 }
0x10a7   :  { %6414 = vmatpush3.bf16.msra.mxu1 %v6413_v11 }
0x10a8   :  { %6415 = vmatprep.subr.bf16.mxu1 %v6980_v18 }
0x10a9   :  { %6393 = vmatpush3.bf16.msra.mxu0 %v6392_v27  ;;  %v4574_v27 = vld [vmem:[#allocation10 + $0x70] sm:$0xff] }
0x10aa   :  { %6394 = vmatprep.subr.bf16.mxu0 %v6980_v18  ;;  %v6431_v32 = vpack.c.bf16 %v4575_v20, %v4574_v27 }
0x10ab   :  { %6417 = vmatpush3.bf16.msra.mxu1 %v6416_v36 }
0x10ac   :  { %6418 = vmatprep.subr.bf16.mxu1 %v6980_v18 }
0x10ad   :  { %6396 = vmatpush3.bf16.msra.mxu0 %v6395_v23  ;;  %v4735_v23 = vld [vmem:[%s8432_s8] ss:$0 sm:$0xff] }
0x10ae   :  { %6397 = vmatprep.subr.bf16.mxu0 %v6980_v18 }
0x10af   :  { %6420 = vmatpush3.bf16.msra.mxu1 %v6419_v25 }
0x10b0   :  { %6421 = vmatprep.subr.bf16.mxu1 %v6980_v18 }
0x10b1   :  { %6399 = vmatpush3.bf16.msra.mxu0 %v6398_v16 }
0x10b2   :  { %6400 = vmatprep.subr.bf16.mxu0 %v6980_v18 }
0x10b3   :  { %6423 = vmatpush3.bf16.msra.mxu1 %v6422_v58 }
0x10b4   :  { %6424 = vmatprep.subr.bf16.mxu1 %v6980_v18 }
0x10b5   :  { %6402 = vmatpush3.bf16.msra.mxu0 %v6401_v31 }
0x10b6   :  { %6403 = vmatprep.subr.bf16.mxu0 %v6980_v18 }
0x10b7   :  { %6426 = vmatpush3.bf16.msra.mxu1 %v6425_v39 }
0x10b8   :  { %6427 = vmatprep.subr.bf16.mxu1 %v6980_v18 }
0x10b9   :  { %6405 = vmatpush3.bf16.msra.mxu0 %v6404_v13 }
0x10ba   :  { %6406 = vmatprep.subr.bf16.mxu0 %v6980_v18 }
0x10bb   :  { %6429 = vmatpush3.bf16.msra.mxu1 %v6428_v4 }
0x10bc   :  { %6430 = vmatprep.subr.bf16.mxu1 %v6980_v18 }
0x10bd   :  { %6408 = vmatpush3.bf16.msra.mxu0 %v6407_v34 }
0x10bf   :  { %6432 = vmatpush3.bf16.msra.mxu1 %v6431_v32 }
0x1173   :  { %v4362_v44 = vpop.f32.mrb[30].mxu0  ;;  %v4433_v45 = vpop.f32.mrb[30].mxu1 }
0x1174   :  { %v6493_v7 = vadd.f32 %v4362_v44, %v8112_v51  ;;  %v4364_v9 = vpop.f32.mrb[31].mxu0  ;;  %v4435_v53 = vpop.f32.mrb[31].mxu1  ;;  %v6495_v38 = vadd.f32 %v4433_v45, %v8127_v48 }
0x1175   :  { %v6494_v63 = vadd.f32 %v4364_v9, %v8116_v14  ;;  %v6496_v55 = vadd.f32 %v4435_v53, %v8122_v10 }
0x1176   :  { %v4732_v21 = vmul.f32 -1.442695, %v6493_v7 }
0x1177   :  { %v4733_v0 = vmul.f32 -1.442695, %v6494_v63  ;;  %v4734_v22 = vmul.f32 -1.442695, %v6496_v55 }
0x1178   :  { %6814 = vpow2.f32 %v4732_v21 }
0x1179   :  { %6816 = vpow2.f32 %v4733_v0 }
0x117a   :  { %6818 = vpow2.f32 %v4734_v22 }
0x117b   :  { %6820 = vtanh.f32 %v6495_v38 }
0x1182   :  { %v6815_v15 = vpop.eup %6814 }
0x1183   :  { %v6817_v19 = vpop.eup %6816  ;;  %v4445_v28 = vadd.f32 1.0, %v6815_v15 }
0x1184   :  { %v4451_v33 = vadd.f32 1.0, %v6817_v19  ;;  %v6819_v51 = vpop.eup %6818 }
0x1185   :  { %6822 = vrcp.f32 %v4445_v28  ;;  %v6821_v12 = vpop.eup %6820  ;;  %v4458_v59 = vadd.f32 1.0, %v6819_v51 }
0x1186   :  { %6824 = vrcp.f32 %v4451_v33 }
0x1187   :  { %6826 = vrcp.f32 %v4458_v59 }
0x118f   :  { %v6823_v14 = vpop.eup %6822 }
0x1190   :  { %v6825_v18 = vpop.eup %6824  ;;  %v4462_v56 = vmul.f32 %v6823_v14, %v6821_v12 }
0x1191   :  { %v4461_v30 = vmul.f32 %v6825_v18, %v8380_v35  ;;  %v6827_v48 = vpop.eup %6826  ;;  %v4736_v35 = vld [vmem:[%s8434_s10] ss:$0 sm:$0xff] }
0x1193   :  { %v4463_v10 = vadd.f32 %v4462_v56, %v4461_v30 }
0x1195   :  { %6828 = vtanh.f32 %v4463_v10 }
0x119f   :  { %v6829_v60 = vpop.eup %6828 }
0x11a0   :  { %v4465_v6 = vmul.f32 %v6829_v60, %v6827_v48 }
0x11a2   :  { %4804 = vmatmul.mubr.f32.vlgmr.msra.gmra.mrb[32].mxu0 %v4465_v6 }
0x1275   :  { %v4555_v26 = vpop.f32.mrb[32].mxu0 }
0x1276   :  { %v4556_v62 = vadd.f32 %v4735_v23, %v4555_v26  ;;  %v4805_v16 = vpop.f32.mrb[33].mxu0 }
0x1278   :  { %v4559_v49 = vmax.f32 %v4556_v62, 0.0 }
0x127a   :  { %4839 = vmatmul.mubr.f32.vlgmr.msra.gmra.mrb[32].mxu1 %v4559_v49 }
0x134d   :  { %v4649_v17 = vpop.f32.mrb[32].mxu1 }
0x134e   :  { %v4650_v43 = vadd.f32 %v4736_v35, %v4649_v17  ;;  %v4840_v31 = vpop.f32.mrb[33].mxu1 }
0x1350   :  { %4653 = vst [vmem:[#allocation11] sm:$0xff] %v4650_v43 }
0x1351   :  { %6951 = shalt.err (!%p6948_p2)
}
0x1352   :  { %s6952_s7 = scalar_lea.hbm %s8435_s11, 128 }
0x1353   :  { %p6953_p3 = scmp.ne.s32.totalorder %s8435_s11, %s6952_s7  ;;  %p6956_p4 = scmp.lt.u32.totalorder %s6952_s7, %s8435_s11 }
0x1355   :  { %p6958_p5 = pnand %p6956_p4, %p6953_p3 }
0x1357   :  { %6961 = shalt.err (!%p6958_p5)
}
0x1358   :  { %4663 = dma.vmem_to_hbm [thread:$0]  %s4661_s17, 128, %s8435_s11, [#allocation4]  }
0x1359   :  { %6968 = dma.done.wait [#allocation4], 128  }
0x135a   :  { %6969 = vsyncadd [#allocation4], 4294967168 }
0x135b   :  { %4667 = vsyncpa [#allocation3], 1 }
0x135c   :  { %4668 = vsyncpa [#allocation6], 1 }
0x135d   :  { %4669 = vsyncpa [#allocation9], 1 }
0x135e   :  { %4670 = vsyncpa [#allocation4], 1 }

</bundles_post_ra>
